<compile_context>
chip_gen: v7x
topology: tpu7x:2x2x1
jax: 0.10.0
libtpu: 0.0.40
codegen_flags: <defaults>
</compile_context>

<pallas_src>
import math

import jax
import jax.numpy as jnp
from jax.experimental import pallas as pl
from jax.experimental.pallas import tpu as pltpu


def _vmem_capacity_bytes():
    """Physical VMEM per TensorCore (best effort; conservative fallback)."""
    try:
        info = pltpu.get_tpu_info()
        cap = getattr(info, "vmem_capacity_bytes", None)
        if cap:
            return int(cap)
    except Exception:
        pass
    return 64 * 1024 * 1024  # conservative (v7x per-TC)


def _pick_batch_tile(b_s, nq, target_rows=256):
    """Largest divisor of b_s with bt*nq <= target_rows (MXU-friendly M,
    bounded VMEM), preferring an even number of grid steps (v7x has 2 TCs)
    and at least 2 steps when possible."""
    divs = [d for d in range(1, b_s + 1) if b_s % d == 0]
    cands = [d for d in divs if d * nq <= max(target_rows, nq)] or [1]

    def score(d):
        steps = b_s // d
        return (steps % 2 == 0, steps >= 2, d)

    return max(cands, key=score)


def _make_kernel(h, d_k, d_v, bt, nq, d_model):
    C = h * d_v
    M = bt * nq
    f32 = jnp.float32
    bf16 = jnp.bfloat16
    shifts = (-2, -1, 0, 1, 2)

    def kernel(q_ref, k_ref, v_ref,
               wq, bq, wk, bk, wv, bv,
               wo, wc, bout,
               out_ref):
        # ---- fused Q/K/V projections over the whole batch tile ----
        xq = q_ref[...].reshape(M, d_model).astype(bf16)
        xk = k_ref[...].reshape(M, d_model).astype(bf16)
        xv = v_ref[...].reshape(M, d_model).astype(bf16)

        # wq/bq are pre-scaled by 1/sqrt(d_k) on the wrapper side.
        Q = jnp.dot(xq, wq[...], preferred_element_type=f32) + bq[...]
        K = jnp.dot(xk, wk[...], preferred_element_type=f32) + bk[...]
        V = jnp.dot(xv, wv[...], preferred_element_type=f32) + bv[...]

        # ---- multi-head attention: all (batch, head) pairs batched ----
        Qb = Q.astype(bf16).reshape(bt, nq, h * d_k)
        Kb = K.astype(bf16).reshape(bt, nq, h * d_k)
        Vb = V.astype(bf16).reshape(bt, nq, C)

        def split_heads(x, d):
            # (bt, nq, h*d) -> (h*bt, nq, d); z = head * bt + b.
            return jnp.concatenate(
                [x[:, :, i * d:(i + 1) * d] for i in range(h)], axis=0)

        Qz = split_heads(Qb, d_k)           # (h*bt, nq, d_k)
        Kz = split_heads(Kb, d_k)
        Vz = split_heads(Vb, d_v)

        # TODO(synk): kv-tile (flash-style online softmax) when the f32
        #             (h*bt, nq, nk) score tensor would not fit VMEM (v7x).
        s = jnp.einsum('zqd,zkd->zqk', Qz, Kz,
                       preferred_element_type=f32)           # (h*bt, nq, nk)
        s = s - jnp.max(s, axis=-1, keepdims=True)
        p = jnp.exp(s)
        denom = jnp.sum(p, axis=-1, keepdims=True)
        p = p * pl.reciprocal(denom, approx=True)            # softmax, f32
        # TODO(synk): attention dropout (p=0.1) is identity here.

        ctx = jnp.einsum('zqk,zkd->zqd', p.astype(bf16), Vz,
                         preferred_element_type=f32)         # (h*bt, nq, d_v)
        ctx4 = ctx.reshape(h, bt, nq, d_v)

        # fc_o as ONE full-depth matmul: repack heads lane-major -> (M, C).
        ctx_flat = jnp.concatenate(
            [ctx4[i].reshape(M, d_v) for i in range(h)], axis=-1).astype(bf16)
        acc = jnp.dot(ctx_flat, wo[...], preferred_element_type=f32)  # (M, d_model)

        # ---- conv branch ----
        # Depthwise taps + dy gates are pre-folded into wc[j] (C, d_model) for
        # shift j-2.  Each shifted copy of V is built in registers with a
        # sublane roll + row-validity mask (per-batch zero padding), then
        # accumulated via its own (M, C)@(C, d_model) matmul.
        q_idx = jax.lax.broadcasted_iota(
            jnp.int32, (bt, nq, C), 1).reshape(M, C)
        for j, sft in enumerate(shifts):
            if sft == 0:
                xs = V.astype(bf16)                          # (M, C)
            else:
                rolled = pltpu.roll(V, shift=(-sft) % M, axis=0)
                valid = jnp.logical_and(q_idx + sft >= 0, q_idx + sft < nq)
                xs = jnp.where(valid, rolled, 0.0).astype(bf16)
            acc = acc + jnp.dot(xs, wc[j], preferred_element_type=f32)

        # single fused epilogue (bout = fc_o bias + gated conv biases)
        y = acc + bout[...]
        out_ref[...] = y.reshape(bt, nq, d_model).astype(out_ref.dtype)

    return kernel


def prepare_weights(p, h, d_k, d_v):
    """One-time wrapper-side weight folding (scale, dy gates, depthwise taps)."""
    f32 = jnp.float32
    bf16 = jnp.bfloat16
    scale = 1.0 / math.sqrt(d_k)
    dy = jax.nn.softmax(p['dy'].reshape(-1))                 # (3,)

    w = {}
    w['wq'] = (p['wq'] * scale).astype(bf16)
    w['bq'] = (p['bq'] * scale).astype(f32)
    w['wk'] = p['wk'].astype(bf16)
    w['bk'] = p['bk'].astype(f32)
    w['wv'] = p['wv'].astype(bf16)
    w['bv'] = p['bv'].astype(f32)
    w['wo'] = p['wo'].astype(bf16)                           # (C, d_model)

    # Per-shift pointwise blocks W_s (C, d_model), s = -2..2:
    #   out2[t] = sum_s V[t+s] @ W_s + b_conv    (zero-padded shifts)
    w3 = {s: dy[1] * p['wd3'][s + 1][:, None] * p['wp3'] for s in (-1, 0, 1)}
    w5 = {s: dy[2] * p['wd5'][s + 2][:, None] * p['wp5'] for s in (-2, -1, 0, 1, 2)}
    blocks = []
    for s in (-2, -1, 0, 1, 2):
        blk = w5[s]
        if s in w3:
            blk = blk + w3[s]
        if s == 0:
            blk = blk + dy[0] * p['wp1']
        blocks.append(blk)
    w['wc'] = jnp.stack(blocks, axis=0).astype(bf16)         # (5, C, d_model)

    b_conv = (dy[0] * p['bp1']
              + dy[1] * (p['bd3'] @ p['wp3'] + p['bp3'])
              + dy[2] * (p['bd5'] @ p['wp5'] + p['bp5']))    # (1, d_model), f32
    w['bout'] = (p['bo'] + b_conv).astype(f32)
    return w


def muse_attention_pallas(queries, keys, values, params, h, d_k, d_v,
                          batch_tile=None, out_dtype=jnp.float32):
    b_s, nq, d_model = queries.shape
    nk = keys.shape[1]
    assert nq == nk, "residual add of the conv branch requires nq == nk"

    # Hardware-aware VMEM budget and tile target (v5e/v6e: 128 MiB, v7x: 64 MiB).
    vmem_cap = _vmem_capacity_bytes()
    vmem_limit = int(min(max(32 * 1024 * 1024, (vmem_cap * 3) // 4),
                         100 * 1024 * 1024))
    target_rows = 512 if vmem_cap >= 100 * 1024 * 1024 else 256

    bt = batch_tile if batch_tile is not None else _pick_batch_tile(
        b_s, nq, target_rows)
    assert b_s % bt == 0
    grid = (b_s // bt,)

    w = prepare_weights(params, h, d_k, d_v)
    weight_list = [w['wq'], w['bq'], w['wk'], w['bk'], w['wv'], w['bv'],
                   w['wo'], w['wc'], w['bout']]

    kernel = _make_kernel(h, d_k, d_v, bt, nq, d_model)

    act_spec = pl.BlockSpec((bt, nq, d_model), lambda i: (i, 0, 0))
    out_spec = pl.BlockSpec((bt, nq, d_model), lambda i: (i, 0, 0))

    def run(weight_spec_kwargs):
        def full_spec(arr):
            nd = arr.ndim
            return pl.BlockSpec(arr.shape, lambda i, nd=nd: (0,) * nd,
                                **weight_spec_kwargs)

        in_specs = ([act_spec, act_spec, act_spec]
                    + [full_spec(x) for x in weight_list])
        return pl.pallas_call(
            kernel,
            grid=grid,
            in_specs=in_specs,
            out_specs=out_spec,
            out_shape=jax.ShapeDtypeStruct((b_s, nq, d_model), out_dtype),
            compiler_params=pltpu.CompilerParams(
                dimension_semantics=("parallel",),
                vmem_limit_bytes=vmem_limit,
            ),
        )(queries, keys, values, *weight_list)

    try:
        # Constant-index weight blocks only need a single VMEM buffer.
        return run({"pipeline_mode": pl.Buffered(1)})
    except Exception:
        # TODO(synk): pl.Buffered(1) unsupported on this JAX version; fall back
        # to default double-buffered weight blocks.
        return run({})


def init_params(key, d_model, d_k, d_v, h):
    """Deterministic synthetic parameters (PyTorch layout, pre-transposed so
    y = x @ W + b).  Linear layers follow init_weights (normal std=0.001, zero
    bias); Conv1d layers get small deterministic normals."""
    C = h * d_v
    ks = jax.random.split(key, 14)
    std = 0.001
    p = {}
    p['wq'] = std * jax.random.normal(ks[0], (d_model, h * d_k), jnp.float32)
    p['bq'] = jnp.zeros((1, h * d_k), jnp.float32)
    p['wk'] = std * jax.random.normal(ks[1], (d_model, h * d_k), jnp.float32)
    p['bk'] = jnp.zeros((1, h * d_k), jnp.float32)
    p['wv'] = std * jax.random.normal(ks[2], (d_model, h * d_v), jnp.float32)
    p['bv'] = jnp.zeros((1, h * d_v), jnp.float32)
    p['wo'] = std * jax.random.normal(ks[3], (h * d_v, d_model), jnp.float32)
    p['bo'] = jnp.zeros((1, d_model), jnp.float32)
    # conv1: pointwise only (depth part is Identity for k=1)
    p['wp1'] = 0.1 * jax.random.normal(ks[4], (C, d_model), jnp.float32)
    p['bp1'] = 0.1 * jax.random.normal(ks[5], (1, d_model), jnp.float32)
    # conv3: depthwise (k=3) + pointwise
    p['wd3'] = 0.1 * jax.random.normal(ks[6], (3, C), jnp.float32)
    p['bd3'] = 0.1 * jax.random.normal(ks[7], (1, C), jnp.float32)
    p['wp3'] = 0.1 * jax.random.normal(ks[8], (C, d_model), jnp.float32)
    p['bp3'] = 0.1 * jax.random.normal(ks[9], (1, d_model), jnp.float32)
    # conv5: depthwise (k=5) + pointwise
    p['wd5'] = 0.1 * jax.random.normal(ks[10], (5, C), jnp.float32)
    p['bd5'] = 0.1 * jax.random.normal(ks[11], (1, C), jnp.float32)
    p['wp5'] = 0.1 * jax.random.normal(ks[12], (C, d_model), jnp.float32)
    p['bp5'] = 0.1 * jax.random.normal(ks[13], (1, d_model), jnp.float32)
    # raw dy parameters (softmax applied in the forward pass, as in PyTorch)
    p['dy'] = jnp.ones((3,), jnp.float32)
    return p


def muse_attention_ref(queries, keys, values, p, h, d_k, d_v):
    """Pure-JAX f32 reference mirroring the PyTorch forward (dropout = identity)."""
    b_s, nq, d_model = queries.shape
    nk = keys.shape[1]
    Q = queries @ p['wq'] + p['bq']
    K = keys @ p['wk'] + p['bk']
    V = values @ p['wv'] + p['bv']
    q = Q.reshape(b_s, nq, h, d_k).transpose(0, 2, 1, 3)
    k = K.reshape(b_s, nk, h, d_k).transpose(0, 2, 3, 1)
    v = V.reshape(b_s, nk, h, d_v).transpose(0, 2, 1, 3)
    att = jnp.matmul(q, k) / math.sqrt(d_k)
    att = jax.nn.softmax(att, -1)
    out = jnp.matmul(att, v).transpose(0, 2, 1, 3).reshape(b_s, nq, h * d_v)
    out = out @ p['wo'] + p['bo']

    v2 = v.transpose(0, 1, 3, 2).reshape(b_s, h * d_v, nk)   # (b, C, nk)

    def dpconv(x, wd, bd, wp, bp, ksz):
        if ksz == 1:
            d = x
        else:
            pad = ksz // 2
            xp = jnp.pad(x, ((0, 0), (0, 0), (pad, pad)))
            d = jnp.zeros_like(x)
            for j in range(ksz):
                d = d + wd[j][None, :, None] * xp[:, :, j:j + x.shape[2]]
            d = d + bd[0][None, :, None]
        return jnp.einsum('bcn,cm->bmn', d, wp) + bp[0][None, :, None]

    o1 = dpconv(v2, None, None, p['wp1'], p['bp1'], 1)
    o3 = dpconv(v2, p['wd3'], p['bd3'], p['wp3'], p['bp3'], 3)
    o5 = dpconv(v2, p['wd5'], p['bd5'], p['wp5'], p['bp5'], 5)
    dy = jax.nn.softmax(p['dy'].reshape(-1))
    out2 = dy[0] * o1 + dy[1] * o3 + dy[2] * o5
    out2 = out2.transpose(0, 2, 1)
    return out + out2


if __name__ == "__main__":
    d_model, d_k, d_v, h = 32, 8, 8, 4
    b_s, seq = 4, 8

    key = jax.random.PRNGKey(0)
    kq, kk, kv, kp = jax.random.split(key, 4)
    queries = jax.random.normal(kq, (b_s, seq, d_model), jnp.float32)
    keys_ = jax.random.normal(kk, (b_s, seq, d_model), jnp.float32)
    values = jax.random.normal(kv, (b_s, seq, d_model), jnp.float32)
    params = init_params(kp, d_model, d_k, d_v, h)

    out = muse_attention_pallas(queries, keys_, values, params, h, d_k, d_v)
    out = jax.block_until_ready(out)

    ref = muse_attention_ref(queries, keys_, values, params, h, d_k, d_v)
    assert out.shape == (b_s, seq, d_model)
    # bf16 MXU operands (f32 accumulation, biases folded in f32) => slightly
    # looser tolerance than a pure-f32 kernel.
    err = jnp.max(jnp.abs(out - ref))
    assert jnp.allclose(out, ref, atol=1e-3, rtol=1e-2), (
        f"Pallas kernel mismatch vs reference: max abs err {err}")
    print("KERNEL_OK")
</pallas_src>

<mosaic_0001>
module attributes {stable_mosaic.version = 11 : i64} {
  func.func @kernel(%arg0: i32, %arg1: memref<2x8x32xf32, #tpu.memory_space<vmem>>, %arg2: memref<2x8x32xf32, #tpu.memory_space<vmem>>, %arg3: memref<2x8x32xf32, #tpu.memory_space<vmem>>, %arg4: memref<32x32xbf16, #tpu.memory_space<vmem>>, %arg5: memref<1x32xf32, #tpu.memory_space<vmem>>, %arg6: memref<32x32xbf16, #tpu.memory_space<vmem>>, %arg7: memref<1x32xf32, #tpu.memory_space<vmem>>, %arg8: memref<32x32xbf16, #tpu.memory_space<vmem>>, %arg9: memref<1x32xf32, #tpu.memory_space<vmem>>, %arg10: memref<32x32xbf16, #tpu.memory_space<vmem>>, %arg11: memref<5x32x32xbf16, #tpu.memory_space<vmem>>, %arg12: memref<1x32xf32, #tpu.memory_space<vmem>>, %arg13: memref<2x8x32xf32, #tpu.memory_space<vmem>>) attributes {dimension_semantics = [#tpu.dimension_semantics<parallel>], iteration_bounds = array<i64: 2>, scalar_prefetch = 0 : i64, scratch_operands = 0 : i64, tpu.core_type = #tpu.core_type<tc>, window_params = [{transform_indices = @transform_0, window_bounds = array<i64: 2, 8, 32>}, {transform_indices = @transform_1, window_bounds = array<i64: 2, 8, 32>}, {transform_indices = @transform_2, window_bounds = array<i64: 2, 8, 32>}, {pipeline_mode = #tpu.pipeline_mode<synchronous>, transform_indices = @transform_3, window_bounds = array<i64: 32, 32>}, {pipeline_mode = #tpu.pipeline_mode<synchronous>, transform_indices = @transform_4, window_bounds = array<i64: 1, 32>}, {pipeline_mode = #tpu.pipeline_mode<synchronous>, transform_indices = @transform_5, window_bounds = array<i64: 32, 32>}, {pipeline_mode = #tpu.pipeline_mode<synchronous>, transform_indices = @transform_6, window_bounds = array<i64: 1, 32>}, {pipeline_mode = #tpu.pipeline_mode<synchronous>, transform_indices = @transform_7, window_bounds = array<i64: 32, 32>}, {pipeline_mode = #tpu.pipeline_mode<synchronous>, transform_indices = @transform_8, window_bounds = array<i64: 1, 32>}, {pipeline_mode = #tpu.pipeline_mode<synchronous>, transform_indices = @transform_9, window_bounds = array<i64: 32, 32>}, {pipeline_mode = #tpu.pipeline_mode<synchronous>, transform_indices = @transform_10, window_bounds = array<i64: 5, 32, 32>}, {pipeline_mode = #tpu.pipeline_mode<synchronous>, transform_indices = @transform_11, window_bounds = array<i64: 1, 32>}, {transform_indices = @transform_12, window_bounds = array<i64: 2, 8, 32>}]} {
    %c0 = arith.constant 0 : index
    %c0_0 = arith.constant 0 : index
    %c0_1 = arith.constant 0 : index
    %0 = vector.load %arg1[%c0, %c0_0, %c0_1] : memref<2x8x32xf32, #tpu.memory_space<vmem>>, vector<2x8x32xf32>
    %1 = vector.shape_cast %0 : vector<2x8x32xf32> to vector<16x32xf32>
    %2 = arith.truncf %1 : vector<16x32xf32> to vector<16x32xbf16>
    %c0_2 = arith.constant 0 : index
    %c0_3 = arith.constant 0 : index
    %c0_4 = arith.constant 0 : index
    %3 = vector.load %arg2[%c0_2, %c0_3, %c0_4] : memref<2x8x32xf32, #tpu.memory_space<vmem>>, vector<2x8x32xf32>
    %4 = vector.shape_cast %3 : vector<2x8x32xf32> to vector<16x32xf32>
    %5 = arith.truncf %4 : vector<16x32xf32> to vector<16x32xbf16>
    %c0_5 = arith.constant 0 : index
    %c0_6 = arith.constant 0 : index
    %c0_7 = arith.constant 0 : index
    %6 = vector.load %arg3[%c0_5, %c0_6, %c0_7] : memref<2x8x32xf32, #tpu.memory_space<vmem>>, vector<2x8x32xf32>
    %7 = vector.shape_cast %6 : vector<2x8x32xf32> to vector<16x32xf32>
    %8 = arith.truncf %7 : vector<16x32xf32> to vector<16x32xbf16>
    %c0_8 = arith.constant 0 : index
    %c0_9 = arith.constant 0 : index
    %9 = vector.load %arg4[%c0_8, %c0_9] : memref<32x32xbf16, #tpu.memory_space<vmem>>, vector<32x32xbf16>
    %cst = arith.constant dense<0.000000e+00> : vector<16x32xf32>
    %10 = tpu.matmul %2, %9, %cst {dimension_numbers = #tpu.dot_dimension_numbers<[1], [0], [0], [1], [0, 0, 1, 1], [], []>} : vector<16x32xbf16>, vector<32x32xbf16>, vector<16x32xf32> -> vector<16x32xf32>
    %c0_10 = arith.constant 0 : index
    %c0_11 = arith.constant 0 : index
    %11 = vector.load %arg5[%c0_10, %c0_11] : memref<1x32xf32, #tpu.memory_space<vmem>>, vector<1x32xf32>
    %12 = vector.broadcast %11 : vector<1x32xf32> to vector<16x32xf32>
    %13 = arith.addf %10, %12 : vector<16x32xf32>
    %c0_12 = arith.constant 0 : index
    %c0_13 = arith.constant 0 : index
    %14 = vector.load %arg6[%c0_12, %c0_13] : memref<32x32xbf16, #tpu.memory_space<vmem>>, vector<32x32xbf16>
    %cst_14 = arith.constant dense<0.000000e+00> : vector<16x32xf32>
    %15 = tpu.matmul %5, %14, %cst_14 {dimension_numbers = #tpu.dot_dimension_numbers<[1], [0], [0], [1], [0, 0, 1, 1], [], []>} : vector<16x32xbf16>, vector<32x32xbf16>, vector<16x32xf32> -> vector<16x32xf32>
    %c0_15 = arith.constant 0 : index
    %c0_16 = arith.constant 0 : index
    %16 = vector.load %arg7[%c0_15, %c0_16] : memref<1x32xf32, #tpu.memory_space<vmem>>, vector<1x32xf32>
    %17 = vector.broadcast %16 : vector<1x32xf32> to vector<16x32xf32>
    %18 = arith.addf %15, %17 : vector<16x32xf32>
    %c0_17 = arith.constant 0 : index
    %c0_18 = arith.constant 0 : index
    %19 = vector.load %arg8[%c0_17, %c0_18] : memref<32x32xbf16, #tpu.memory_space<vmem>>, vector<32x32xbf16>
    %cst_19 = arith.constant dense<0.000000e+00> : vector<16x32xf32>
    %20 = tpu.matmul %8, %19, %cst_19 {dimension_numbers = #tpu.dot_dimension_numbers<[1], [0], [0], [1], [0, 0, 1, 1], [], []>} : vector<16x32xbf16>, vector<32x32xbf16>, vector<16x32xf32> -> vector<16x32xf32>
    %c0_20 = arith.constant 0 : index
    %c0_21 = arith.constant 0 : index
    %21 = vector.load %arg9[%c0_20, %c0_21] : memref<1x32xf32, #tpu.memory_space<vmem>>, vector<1x32xf32>
    %22 = vector.broadcast %21 : vector<1x32xf32> to vector<16x32xf32>
    %23 = arith.addf %20, %22 : vector<16x32xf32>
    %24 = arith.truncf %13 : vector<16x32xf32> to vector<16x32xbf16>
    %25 = vector.shape_cast %24 : vector<16x32xbf16> to vector<2x8x32xbf16>
    %26 = arith.truncf %18 : vector<16x32xf32> to vector<16x32xbf16>
    %27 = vector.shape_cast %26 : vector<16x32xbf16> to vector<2x8x32xbf16>
    %28 = arith.truncf %23 : vector<16x32xf32> to vector<16x32xbf16>
    %29 = vector.shape_cast %28 : vector<16x32xbf16> to vector<2x8x32xbf16>
    %30 = vector.extract_strided_slice %25 {offsets = [0, 0, 0], sizes = [2, 8, 8], strides = [1, 1, 1]} : vector<2x8x32xbf16> to vector<2x8x8xbf16>
    %31 = vector.extract_strided_slice %25 {offsets = [0, 0, 8], sizes = [2, 8, 8], strides = [1, 1, 1]} : vector<2x8x32xbf16> to vector<2x8x8xbf16>
    %32 = vector.extract_strided_slice %25 {offsets = [0, 0, 16], sizes = [2, 8, 8], strides = [1, 1, 1]} : vector<2x8x32xbf16> to vector<2x8x8xbf16>
    %33 = vector.extract_strided_slice %25 {offsets = [0, 0, 24], sizes = [2, 8, 8], strides = [1, 1, 1]} : vector<2x8x32xbf16> to vector<2x8x8xbf16>
    %34 = tpu.concatenate %30, %31, %32, %33 in 0 : vector<2x8x8xbf16>, vector<2x8x8xbf16>, vector<2x8x8xbf16>, vector<2x8x8xbf16> -> vector<8x8x8xbf16>
    %35 = vector.extract_strided_slice %27 {offsets = [0, 0, 0], sizes = [2, 8, 8], strides = [1, 1, 1]} : vector<2x8x32xbf16> to vector<2x8x8xbf16>
    %36 = vector.extract_strided_slice %27 {offsets = [0, 0, 8], sizes = [2, 8, 8], strides = [1, 1, 1]} : vector<2x8x32xbf16> to vector<2x8x8xbf16>
    %37 = vector.extract_strided_slice %27 {offsets = [0, 0, 16], sizes = [2, 8, 8], strides = [1, 1, 1]} : vector<2x8x32xbf16> to vector<2x8x8xbf16>
    %38 = vector.extract_strided_slice %27 {offsets = [0, 0, 24], sizes = [2, 8, 8], strides = [1, 1, 1]} : vector<2x8x32xbf16> to vector<2x8x8xbf16>
    %39 = tpu.concatenate %35, %36, %37, %38 in 0 : vector<2x8x8xbf16>, vector<2x8x8xbf16>, vector<2x8x8xbf16>, vector<2x8x8xbf16> -> vector<8x8x8xbf16>
    %40 = vector.extract_strided_slice %29 {offsets = [0, 0, 0], sizes = [2, 8, 8], strides = [1, 1, 1]} : vector<2x8x32xbf16> to vector<2x8x8xbf16>
    %41 = vector.extract_strided_slice %29 {offsets = [0, 0, 8], sizes = [2, 8, 8], strides = [1, 1, 1]} : vector<2x8x32xbf16> to vector<2x8x8xbf16>
    %42 = vector.extract_strided_slice %29 {offsets = [0, 0, 16], sizes = [2, 8, 8], strides = [1, 1, 1]} : vector<2x8x32xbf16> to vector<2x8x8xbf16>
    %43 = vector.extract_strided_slice %29 {offsets = [0, 0, 24], sizes = [2, 8, 8], strides = [1, 1, 1]} : vector<2x8x32xbf16> to vector<2x8x8xbf16>
    %44 = tpu.concatenate %40, %41, %42, %43 in 0 : vector<2x8x8xbf16>, vector<2x8x8xbf16>, vector<2x8x8xbf16>, vector<2x8x8xbf16> -> vector<8x8x8xbf16>
    "tpu.trace_start"() <{level = 10 : i32, message = "zqd,zkd->zqk"}> : () -> ()
    %cst_22 = arith.constant dense<0.000000e+00> : vector<8x8x8xf32>
    %45 = tpu.matmul %34, %39, %cst_22 {dimension_numbers = #tpu.dot_dimension_numbers<[2], [2], [1], [1], [0, 0, 0, 1, 1, 1], [0], [0]>} : vector<8x8x8xbf16>, vector<8x8x8xbf16>, vector<8x8x8xf32> -> vector<8x8x8xf32>
    "tpu.trace_stop"() : () -> ()
    %cst_23 = arith.constant dense<0xFF800000> : vector<8x8xf32>
    %46 = vector.multi_reduction <maximumf>, %45, %cst_23 [2] : vector<8x8x8xf32> to vector<8x8xf32>
    %47 = vector.shape_cast %46 : vector<8x8xf32> to vector<8x8x1xf32>
    %48 = vector.broadcast %47 : vector<8x8x1xf32> to vector<8x8x8xf32>
    %49 = arith.subf %45, %48 : vector<8x8x8xf32>
    %50 = math.exp %49 : vector<8x8x8xf32>
    %cst_24 = arith.constant dense<0.000000e+00> : vector<8x8xf32>
    %51 = vector.multi_reduction <add>, %50, %cst_24 [2] : vector<8x8x8xf32> to vector<8x8xf32>
    %52 = vector.shape_cast %51 : vector<8x8xf32> to vector<8x8x1xf32>
    %53 = tpu.reciprocal %52 {approx = true} : vector<8x8x1xf32> -> vector<8x8x1xf32>
    %54 = vector.broadcast %53 : vector<8x8x1xf32> to vector<8x8x8xf32>
    %55 = arith.mulf %50, %54 : vector<8x8x8xf32>
    %56 = arith.truncf %55 : vector<8x8x8xf32> to vector<8x8x8xbf16>
    "tpu.trace_start"() <{level = 10 : i32, message = "zqk,zkd->zqd"}> : () -> ()
    %cst_25 = arith.constant dense<0.000000e+00> : vector<8x8x8xf32>
    %57 = tpu.matmul %56, %44, %cst_25 {dimension_numbers = #tpu.dot_dimension_numbers<[2], [1], [1], [2], [0, 0, 0, 1, 1, 2], [0], [0]>} : vector<8x8x8xbf16>, vector<8x8x8xbf16>, vector<8x8x8xf32> -> vector<8x8x8xf32>
    "tpu.trace_stop"() : () -> ()
    %58 = vector.shape_cast %57 : vector<8x8x8xf32> to vector<4x2x8x8xf32>
    %59 = vector.extract_strided_slice %58 {offsets = [0, 0, 0, 0], sizes = [1, 2, 8, 8], strides = [1, 1, 1, 1]} : vector<4x2x8x8xf32> to vector<1x2x8x8xf32>
    %60 = vector.shape_cast %59 : vector<1x2x8x8xf32> to vector<2x8x8xf32>
    %61 = vector.shape_cast %60 : vector<2x8x8xf32> to vector<16x8xf32>
    %62 = vector.extract_strided_slice %58 {offsets = [1, 0, 0, 0], sizes = [1, 2, 8, 8], strides = [1, 1, 1, 1]} : vector<4x2x8x8xf32> to vector<1x2x8x8xf32>
    %63 = vector.shape_cast %62 : vector<1x2x8x8xf32> to vector<2x8x8xf32>
    %64 = vector.shape_cast %63 : vector<2x8x8xf32> to vector<16x8xf32>
    %65 = vector.extract_strided_slice %58 {offsets = [2, 0, 0, 0], sizes = [1, 2, 8, 8], strides = [1, 1, 1, 1]} : vector<4x2x8x8xf32> to vector<1x2x8x8xf32>
    %66 = vector.shape_cast %65 : vector<1x2x8x8xf32> to vector<2x8x8xf32>
    %67 = vector.shape_cast %66 : vector<2x8x8xf32> to vector<16x8xf32>
    %68 = vector.extract_strided_slice %58 {offsets = [3, 0, 0, 0], sizes = [1, 2, 8, 8], strides = [1, 1, 1, 1]} : vector<4x2x8x8xf32> to vector<1x2x8x8xf32>
    %69 = vector.shape_cast %68 : vector<1x2x8x8xf32> to vector<2x8x8xf32>
    %70 = vector.shape_cast %69 : vector<2x8x8xf32> to vector<16x8xf32>
    %71 = tpu.concatenate %61, %64, %67, %70 in 1 : vector<16x8xf32>, vector<16x8xf32>, vector<16x8xf32>, vector<16x8xf32> -> vector<16x32xf32>
    %72 = arith.truncf %71 : vector<16x32xf32> to vector<16x32xbf16>
    %c0_26 = arith.constant 0 : index
    %c0_27 = arith.constant 0 : index
    %73 = vector.load %arg10[%c0_26, %c0_27] : memref<32x32xbf16, #tpu.memory_space<vmem>>, vector<32x32xbf16>
    %cst_28 = arith.constant dense<0.000000e+00> : vector<16x32xf32>
    %74 = tpu.matmul %72, %73, %cst_28 {dimension_numbers = #tpu.dot_dimension_numbers<[1], [0], [0], [1], [0, 0, 1, 1], [], []>} : vector<16x32xbf16>, vector<32x32xbf16>, vector<16x32xf32> -> vector<16x32xf32>
    %75 = tpu.iota {dimensions = array<i32: 1>} : vector<2x8x32xi32>
    %76 = vector.shape_cast %75 : vector<2x8x32xi32> to vector<16x32xi32>
    %c2_i32 = arith.constant 2 : i32
    %77 = tpu.dynamic_rotate %23 by %c2_i32 dim 0 : vector<16x32xf32>, i32 -> vector<16x32xf32>
    %c-2_i32 = arith.constant -2 : i32
    %78 = vector.broadcast %c-2_i32 : i32 to vector<16x32xi32>
    %79 = arith.addi %76, %78 : vector<16x32xi32>
    %c0_i32 = arith.constant 0 : i32
    %80 = vector.broadcast %c0_i32 : i32 to vector<16x32xi32>
    %81 = arith.cmpi sge, %79, %80 : vector<16x32xi32>
    %c-2_i32_29 = arith.constant -2 : i32
    %82 = vector.broadcast %c-2_i32_29 : i32 to vector<16x32xi32>
    %83 = arith.addi %76, %82 : vector<16x32xi32>
    %c8_i32 = arith.constant 8 : i32
    %84 = vector.broadcast %c8_i32 : i32 to vector<16x32xi32>
    %85 = arith.cmpi slt, %83, %84 : vector<16x32xi32>
    %86 = arith.andi %81, %85 : vector<16x32xi1>
    %cst_30 = arith.constant 0.000000e+00 : f32
    %87 = vector.broadcast %cst_30 : f32 to vector<16x32xf32>
    %88 = arith.select %86, %77, %87 : vector<16x32xi1>, vector<16x32xf32>
    %89 = arith.truncf %88 : vector<16x32xf32> to vector<16x32xbf16>
    %c0_31 = arith.constant 0 : index
    %c0_32 = arith.constant 0 : index
    %c0_33 = arith.constant 0 : index
    %90 = vector.load %arg11[%c0_31, %c0_32, %c0_33] : memref<5x32x32xbf16, #tpu.memory_space<vmem>>, vector<1x32x32xbf16>
    %91 = vector.shape_cast %90 : vector<1x32x32xbf16> to vector<32x32xbf16>
    %cst_34 = arith.constant dense<0.000000e+00> : vector<16x32xf32>
    %92 = tpu.matmul %89, %91, %cst_34 {dimension_numbers = #tpu.dot_dimension_numbers<[1], [0], [0], [1], [0, 0, 1, 1], [], []>} : vector<16x32xbf16>, vector<32x32xbf16>, vector<16x32xf32> -> vector<16x32xf32>
    %93 = arith.addf %74, %92 : vector<16x32xf32>
    %c1_i32 = arith.constant 1 : i32
    %94 = tpu.dynamic_rotate %23 by %c1_i32 dim 0 : vector<16x32xf32>, i32 -> vector<16x32xf32>
    %c-1_i32 = arith.constant -1 : i32
    %95 = vector.broadcast %c-1_i32 : i32 to vector<16x32xi32>
    %96 = arith.addi %76, %95 : vector<16x32xi32>
    %c0_i32_35 = arith.constant 0 : i32
    %97 = vector.broadcast %c0_i32_35 : i32 to vector<16x32xi32>
    %98 = arith.cmpi sge, %96, %97 : vector<16x32xi32>
    %c-1_i32_36 = arith.constant -1 : i32
    %99 = vector.broadcast %c-1_i32_36 : i32 to vector<16x32xi32>
    %100 = arith.addi %76, %99 : vector<16x32xi32>
    %c8_i32_37 = arith.constant 8 : i32
    %101 = vector.broadcast %c8_i32_37 : i32 to vector<16x32xi32>
    %102 = arith.cmpi slt, %100, %101 : vector<16x32xi32>
    %103 = arith.andi %98, %102 : vector<16x32xi1>
    %cst_38 = arith.constant 0.000000e+00 : f32
    %104 = vector.broadcast %cst_38 : f32 to vector<16x32xf32>
    %105 = arith.select %103, %94, %104 : vector<16x32xi1>, vector<16x32xf32>
    %106 = arith.truncf %105 : vector<16x32xf32> to vector<16x32xbf16>
    %c1 = arith.constant 1 : index
    %c0_39 = arith.constant 0 : index
    %c0_40 = arith.constant 0 : index
    %107 = vector.load %arg11[%c1, %c0_39, %c0_40] : memref<5x32x32xbf16, #tpu.memory_space<vmem>>, vector<1x32x32xbf16>
    %108 = vector.shape_cast %107 : vector<1x32x32xbf16> to vector<32x32xbf16>
    %cst_41 = arith.constant dense<0.000000e+00> : vector<16x32xf32>
    %109 = tpu.matmul %106, %108, %cst_41 {dimension_numbers = #tpu.dot_dimension_numbers<[1], [0], [0], [1], [0, 0, 1, 1], [], []>} : vector<16x32xbf16>, vector<32x32xbf16>, vector<16x32xf32> -> vector<16x32xf32>
    %110 = arith.addf %93, %109 : vector<16x32xf32>
    %111 = arith.truncf %23 : vector<16x32xf32> to vector<16x32xbf16>
    %c2 = arith.constant 2 : index
    %c0_42 = arith.constant 0 : index
    %c0_43 = arith.constant 0 : index
    %112 = vector.load %arg11[%c2, %c0_42, %c0_43] : memref<5x32x32xbf16, #tpu.memory_space<vmem>>, vector<1x32x32xbf16>
    %113 = vector.shape_cast %112 : vector<1x32x32xbf16> to vector<32x32xbf16>
    %cst_44 = arith.constant dense<0.000000e+00> : vector<16x32xf32>
    %114 = tpu.matmul %111, %113, %cst_44 {dimension_numbers = #tpu.dot_dimension_numbers<[1], [0], [0], [1], [0, 0, 1, 1], [], []>} : vector<16x32xbf16>, vector<32x32xbf16>, vector<16x32xf32> -> vector<16x32xf32>
    %115 = arith.addf %110, %114 : vector<16x32xf32>
    %c15_i32 = arith.constant 15 : i32
    %116 = tpu.dynamic_rotate %23 by %c15_i32 dim 0 : vector<16x32xf32>, i32 -> vector<16x32xf32>
    %c1_i32_45 = arith.constant 1 : i32
    %117 = vector.broadcast %c1_i32_45 : i32 to vector<16x32xi32>
    %118 = arith.addi %76, %117 : vector<16x32xi32>
    %c0_i32_46 = arith.constant 0 : i32
    %119 = vector.broadcast %c0_i32_46 : i32 to vector<16x32xi32>
    %120 = arith.cmpi sge, %118, %119 : vector<16x32xi32>
    %c1_i32_47 = arith.constant 1 : i32
    %121 = vector.broadcast %c1_i32_47 : i32 to vector<16x32xi32>
    %122 = arith.addi %76, %121 : vector<16x32xi32>
    %c8_i32_48 = arith.constant 8 : i32
    %123 = vector.broadcast %c8_i32_48 : i32 to vector<16x32xi32>
    %124 = arith.cmpi slt, %122, %123 : vector<16x32xi32>
    %125 = arith.andi %120, %124 : vector<16x32xi1>
    %cst_49 = arith.constant 0.000000e+00 : f32
    %126 = vector.broadcast %cst_49 : f32 to vector<16x32xf32>
    %127 = arith.select %125, %116, %126 : vector<16x32xi1>, vector<16x32xf32>
    %128 = arith.truncf %127 : vector<16x32xf32> to vector<16x32xbf16>
    %c3 = arith.constant 3 : index
    %c0_50 = arith.constant 0 : index
    %c0_51 = arith.constant 0 : index
    %129 = vector.load %arg11[%c3, %c0_50, %c0_51] : memref<5x32x32xbf16, #tpu.memory_space<vmem>>, vector<1x32x32xbf16>
    %130 = vector.shape_cast %129 : vector<1x32x32xbf16> to vector<32x32xbf16>
    %cst_52 = arith.constant dense<0.000000e+00> : vector<16x32xf32>
    %131 = tpu.matmul %128, %130, %cst_52 {dimension_numbers = #tpu.dot_dimension_numbers<[1], [0], [0], [1], [0, 0, 1, 1], [], []>} : vector<16x32xbf16>, vector<32x32xbf16>, vector<16x32xf32> -> vector<16x32xf32>
    %132 = arith.addf %115, %131 : vector<16x32xf32>
    %c14_i32 = arith.constant 14 : i32
    %133 = tpu.dynamic_rotate %23 by %c14_i32 dim 0 : vector<16x32xf32>, i32 -> vector<16x32xf32>
    %c2_i32_53 = arith.constant 2 : i32
    %134 = vector.broadcast %c2_i32_53 : i32 to vector<16x32xi32>
    %135 = arith.addi %76, %134 : vector<16x32xi32>
    %c0_i32_54 = arith.constant 0 : i32
    %136 = vector.broadcast %c0_i32_54 : i32 to vector<16x32xi32>
    %137 = arith.cmpi sge, %135, %136 : vector<16x32xi32>
    %c2_i32_55 = arith.constant 2 : i32
    %138 = vector.broadcast %c2_i32_55 : i32 to vector<16x32xi32>
    %139 = arith.addi %76, %138 : vector<16x32xi32>
    %c8_i32_56 = arith.constant 8 : i32
    %140 = vector.broadcast %c8_i32_56 : i32 to vector<16x32xi32>
    %141 = arith.cmpi slt, %139, %140 : vector<16x32xi32>
    %142 = arith.andi %137, %141 : vector<16x32xi1>
    %cst_57 = arith.constant 0.000000e+00 : f32
    %143 = vector.broadcast %cst_57 : f32 to vector<16x32xf32>
    %144 = arith.select %142, %133, %143 : vector<16x32xi1>, vector<16x32xf32>
    %145 = arith.truncf %144 : vector<16x32xf32> to vector<16x32xbf16>
    %c4 = arith.constant 4 : index
    %c0_58 = arith.constant 0 : index
    %c0_59 = arith.constant 0 : index
    %146 = vector.load %arg11[%c4, %c0_58, %c0_59] : memref<5x32x32xbf16, #tpu.memory_space<vmem>>, vector<1x32x32xbf16>
    %147 = vector.shape_cast %146 : vector<1x32x32xbf16> to vector<32x32xbf16>
    %cst_60 = arith.constant dense<0.000000e+00> : vector<16x32xf32>
    %148 = tpu.matmul %145, %147, %cst_60 {dimension_numbers = #tpu.dot_dimension_numbers<[1], [0], [0], [1], [0, 0, 1, 1], [], []>} : vector<16x32xbf16>, vector<32x32xbf16>, vector<16x32xf32> -> vector<16x32xf32>
    %149 = arith.addf %132, %148 : vector<16x32xf32>
    %c0_61 = arith.constant 0 : index
    %c0_62 = arith.constant 0 : index
    %150 = vector.load %arg12[%c0_61, %c0_62] : memref<1x32xf32, #tpu.memory_space<vmem>>, vector<1x32xf32>
    %151 = vector.broadcast %150 : vector<1x32xf32> to vector<16x32xf32>
    %152 = arith.addf %149, %151 : vector<16x32xf32>
    %153 = vector.shape_cast %152 : vector<16x32xf32> to vector<2x8x32xf32>
    %c0_63 = arith.constant 0 : index
    %c0_64 = arith.constant 0 : index
    %c0_65 = arith.constant 0 : index
    %154 = vector.load %arg13[%c0_63, %c0_64, %c0_65] : memref<2x8x32xf32, #tpu.memory_space<vmem>>, vector<2x8x32xf32>
    tpu.vector_store %arg13[%c0_63, %c0_64, %c0_65], %153 {strides = array<i32>} : memref<2x8x32xf32, #tpu.memory_space<vmem>>, vector<2x8x32xf32>,
    return
  }
  func.func @transform_0(%arg0: i32) -> (i32, i32, i32) {
    %c0_i32 = arith.constant 0 : i32
    %c0_i32_0 = arith.constant 0 : i32
    %c0_i32_1 = arith.constant 0 : i32
    return %arg0, %c0_i32, %c0_i32_0 : i32, i32, i32
  }
  func.func @transform_1(%arg0: i32) -> (i32, i32, i32) {
    %c0_i32 = arith.constant 0 : i32
    %c0_i32_0 = arith.constant 0 : i32
    %c0_i32_1 = arith.constant 0 : i32
    return %arg0, %c0_i32, %c0_i32_0 : i32, i32, i32
  }
  func.func @transform_2(%arg0: i32) -> (i32, i32, i32) {
    %c0_i32 = arith.constant 0 : i32
    %c0_i32_0 = arith.constant 0 : i32
    %c0_i32_1 = arith.constant 0 : i32
    return %arg0, %c0_i32, %c0_i32_0 : i32, i32, i32
  }
  func.func @transform_3(%arg0: i32) -> (i32, i32) {
    %c0_i32 = arith.constant 0 : i32
    %c0_i32_0 = arith.constant 0 : i32
    %c0_i32_1 = arith.constant 0 : i32
    return %c0_i32, %c0_i32_0 : i32, i32
  }
  func.func @transform_4(%arg0: i32) -> (i32, i32) {
    %c0_i32 = arith.constant 0 : i32
    %c0_i32_0 = arith.constant 0 : i32
    %c0_i32_1 = arith.constant 0 : i32
    return %c0_i32, %c0_i32_0 : i32, i32
  }
  func.func @transform_5(%arg0: i32) -> (i32, i32) {
    %c0_i32 = arith.constant 0 : i32
    %c0_i32_0 = arith.constant 0 : i32
    %c0_i32_1 = arith.constant 0 : i32
    return %c0_i32, %c0_i32_0 : i32, i32
  }
  func.func @transform_6(%arg0: i32) -> (i32, i32) {
    %c0_i32 = arith.constant 0 : i32
    %c0_i32_0 = arith.constant 0 : i32
    %c0_i32_1 = arith.constant 0 : i32
    return %c0_i32, %c0_i32_0 : i32, i32
  }
  func.func @transform_7(%arg0: i32) -> (i32, i32) {
    %c0_i32 = arith.constant 0 : i32
    %c0_i32_0 = arith.constant 0 : i32
    %c0_i32_1 = arith.constant 0 : i32
    return %c0_i32, %c0_i32_0 : i32, i32
  }
  func.func @transform_8(%arg0: i32) -> (i32, i32) {
    %c0_i32 = arith.constant 0 : i32
    %c0_i32_0 = arith.constant 0 : i32
    %c0_i32_1 = arith.constant 0 : i32
    return %c0_i32, %c0_i32_0 : i32, i32
  }
  func.func @transform_9(%arg0: i32) -> (i32, i32) {
    %c0_i32 = arith.constant 0 : i32
    %c0_i32_0 = arith.constant 0 : i32
    %c0_i32_1 = arith.constant 0 : i32
    return %c0_i32, %c0_i32_0 : i32, i32
  }
  func.func @transform_10(%arg0: i32) -> (i32, i32, i32) {
    %c0_i32 = arith.constant 0 : i32
    %c0_i32_0 = arith.constant 0 : i32
    %c0_i32_1 = arith.constant 0 : i32
    %c0_i32_2 = arith.constant 0 : i32
    return %c0_i32, %c0_i32_0, %c0_i32_1 : i32, i32, i32
  }
  func.func @transform_11(%arg0: i32) -> (i32, i32) {
    %c0_i32 = arith.constant 0 : i32
    %c0_i32_0 = arith.constant 0 : i32
    %c0_i32_1 = arith.constant 0 : i32
    return %c0_i32, %c0_i32_0 : i32, i32
  }
  func.func @transform_12(%arg0: i32) -> (i32, i32, i32) {
    %c0_i32 = arith.constant 0 : i32
    %c0_i32_0 = arith.constant 0 : i32
    %c0_i32_1 = arith.constant 0 : i32
    return %arg0, %c0_i32, %c0_i32_0 : i32, i32, i32
  }
}

module attributes {stable_mosaic.version = 11 : i64} {
  func.func @kernel(%arg0: i32, %arg1: memref<2x8x32xf32, #tpu.memory_space<vmem>>, %arg2: memref<2x8x32xf32, #tpu.memory_space<vmem>>, %arg3: memref<2x8x32xf32, #tpu.memory_space<vmem>>, %arg4: memref<32x32xbf16, #tpu.memory_space<vmem>>, %arg5: memref<1x32xf32, #tpu.memory_space<vmem>>, %arg6: memref<32x32xbf16, #tpu.memory_space<vmem>>, %arg7: memref<1x32xf32, #tpu.memory_space<vmem>>, %arg8: memref<32x32xbf16, #tpu.memory_space<vmem>>, %arg9: memref<1x32xf32, #tpu.memory_space<vmem>>, %arg10: memref<32x32xbf16, #tpu.memory_space<vmem>>, %arg11: memref<5x32x32xbf16, #tpu.memory_space<vmem>>, %arg12: memref<1x32xf32, #tpu.memory_space<vmem>>, %arg13: memref<2x8x32xf32, #tpu.memory_space<vmem>>) attributes {dimension_semantics = [#tpu.dimension_semantics<parallel>], iteration_bounds = array<i64: 2>, scalar_prefetch = 0 : i64, scratch_operands = 0 : i64, tpu.core_type = #tpu.core_type<tc>, window_params = [{transform_indices = @transform_0, window_bounds = array<i64: 2, 8, 32>}, {transform_indices = @transform_1, window_bounds = array<i64: 2, 8, 32>}, {transform_indices = @transform_2, window_bounds = array<i64: 2, 8, 32>}, {pipeline_mode = #tpu.pipeline_mode<synchronous>, transform_indices = @transform_3, window_bounds = array<i64: 32, 32>}, {pipeline_mode = #tpu.pipeline_mode<synchronous>, transform_indices = @transform_4, window_bounds = array<i64: 1, 32>}, {pipeline_mode = #tpu.pipeline_mode<synchronous>, transform_indices = @transform_5, window_bounds = array<i64: 32, 32>}, {pipeline_mode = #tpu.pipeline_mode<synchronous>, transform_indices = @transform_6, window_bounds = array<i64: 1, 32>}, {pipeline_mode = #tpu.pipeline_mode<synchronous>, transform_indices = @transform_7, window_bounds = array<i64: 32, 32>}, {pipeline_mode = #tpu.pipeline_mode<synchronous>, transform_indices = @transform_8, window_bounds = array<i64: 1, 32>}, {pipeline_mode = #tpu.pipeline_mode<synchronous>, transform_indices = @transform_9, window_bounds = array<i64: 32, 32>}, {pipeline_mode = #tpu.pipeline_mode<synchronous>, transform_indices = @transform_10, window_bounds = array<i64: 5, 32, 32>}, {pipeline_mode = #tpu.pipeline_mode<synchronous>, transform_indices = @transform_11, window_bounds = array<i64: 1, 32>}, {transform_indices = @transform_12, window_bounds = array<i64: 2, 8, 32>}]} {
    %c0 = arith.constant 0 : index
    %c0_0 = arith.constant 0 : index
    %c0_1 = arith.constant 0 : index
    %0 = vector.load %arg1[%c0, %c0_0, %c0_1] : memref<2x8x32xf32, #tpu.memory_space<vmem>>, vector<2x8x32xf32>
    %1 = vector.shape_cast %0 : vector<2x8x32xf32> to vector<16x32xf32>
    %2 = arith.truncf %1 : vector<16x32xf32> to vector<16x32xbf16>
    %c0_2 = arith.constant 0 : index
    %c0_3 = arith.constant 0 : index
    %c0_4 = arith.constant 0 : index
    %3 = vector.load %arg2[%c0_2, %c0_3, %c0_4] : memref<2x8x32xf32, #tpu.memory_space<vmem>>, vector<2x8x32xf32>
    %4 = vector.shape_cast %3 : vector<2x8x32xf32> to vector<16x32xf32>
    %5 = arith.truncf %4 : vector<16x32xf32> to vector<16x32xbf16>
    %c0_5 = arith.constant 0 : index
    %c0_6 = arith.constant 0 : index
    %c0_7 = arith.constant 0 : index
    %6 = vector.load %arg3[%c0_5, %c0_6, %c0_7] : memref<2x8x32xf32, #tpu.memory_space<vmem>>, vector<2x8x32xf32>
    %7 = vector.shape_cast %6 : vector<2x8x32xf32> to vector<16x32xf32>
    %8 = arith.truncf %7 : vector<16x32xf32> to vector<16x32xbf16>
    %c0_8 = arith.constant 0 : index
    %c0_9 = arith.constant 0 : index
    %9 = vector.load %arg4[%c0_8, %c0_9] : memref<32x32xbf16, #tpu.memory_space<vmem>>, vector<32x32xbf16>
    %cst = arith.constant dense<0.000000e+00> : vector<16x32xf32>
    %10 = tpu.matmul %2, %9, %cst {dimension_numbers = #tpu.dot_dimension_numbers<[1], [0], [0], [1], [0, 0, 1, 1], [], []>} : vector<16x32xbf16>, vector<32x32xbf16>, vector<16x32xf32> -> vector<16x32xf32>
    %c0_10 = arith.constant 0 : index
    %c0_11 = arith.constant 0 : index
    %11 = vector.load %arg5[%c0_10, %c0_11] : memref<1x32xf32, #tpu.memory_space<vmem>>, vector<1x32xf32>
    %12 = vector.broadcast %11 : vector<1x32xf32> to vector<16x32xf32>
    %13 = arith.addf %10, %12 : vector<16x32xf32>
    %c0_12 = arith.constant 0 : index
    %c0_13 = arith.constant 0 : index
    %14 = vector.load %arg6[%c0_12, %c0_13] : memref<32x32xbf16, #tpu.memory_space<vmem>>, vector<32x32xbf16>
    %cst_14 = arith.constant dense<0.000000e+00> : vector<16x32xf32>
    %15 = tpu.matmul %5, %14, %cst_14 {dimension_numbers = #tpu.dot_dimension_numbers<[1], [0], [0], [1], [0, 0, 1, 1], [], []>} : vector<16x32xbf16>, vector<32x32xbf16>, vector<16x32xf32> -> vector<16x32xf32>
    %c0_15 = arith.constant 0 : index
    %c0_16 = arith.constant 0 : index
    %16 = vector.load %arg7[%c0_15, %c0_16] : memref<1x32xf32, #tpu.memory_space<vmem>>, vector<1x32xf32>
    %17 = vector.broadcast %16 : vector<1x32xf32> to vector<16x32xf32>
    %18 = arith.addf %15, %17 : vector<16x32xf32>
    %c0_17 = arith.constant 0 : index
    %c0_18 = arith.constant 0 : index
    %19 = vector.load %arg8[%c0_17, %c0_18] : memref<32x32xbf16, #tpu.memory_space<vmem>>, vector<32x32xbf16>
    %cst_19 = arith.constant dense<0.000000e+00> : vector<16x32xf32>
    %20 = tpu.matmul %8, %19, %cst_19 {dimension_numbers = #tpu.dot_dimension_numbers<[1], [0], [0], [1], [0, 0, 1, 1], [], []>} : vector<16x32xbf16>, vector<32x32xbf16>, vector<16x32xf32> -> vector<16x32xf32>
    %c0_20 = arith.constant 0 : index
    %c0_21 = arith.constant 0 : index
    %21 = vector.load %arg9[%c0_20, %c0_21] : memref<1x32xf32, #tpu.memory_space<vmem>>, vector<1x32xf32>
    %22 = vector.broadcast %21 : vector<1x32xf32> to vector<16x32xf32>
    %23 = arith.addf %20, %22 : vector<16x32xf32>
    %24 = arith.truncf %13 : vector<16x32xf32> to vector<16x32xbf16>
    %25 = vector.shape_cast %24 : vector<16x32xbf16> to vector<2x8x32xbf16>
    %26 = arith.truncf %18 : vector<16x32xf32> to vector<16x32xbf16>
    %27 = vector.shape_cast %26 : vector<16x32xbf16> to vector<2x8x32xbf16>
    %28 = arith.truncf %23 : vector<16x32xf32> to vector<16x32xbf16>
    %29 = vector.shape_cast %28 : vector<16x32xbf16> to vector<2x8x32xbf16>
    %30 = vector.extract_strided_slice %25 {offsets = [0, 0, 0], sizes = [2, 8, 8], strides = [1, 1, 1]} : vector<2x8x32xbf16> to vector<2x8x8xbf16>
    %31 = vector.extract_strided_slice %25 {offsets = [0, 0, 8], sizes = [2, 8, 8], strides = [1, 1, 1]} : vector<2x8x32xbf16> to vector<2x8x8xbf16>
    %32 = vector.extract_strided_slice %25 {offsets = [0, 0, 16], sizes = [2, 8, 8], strides = [1, 1, 1]} : vector<2x8x32xbf16> to vector<2x8x8xbf16>
    %33 = vector.extract_strided_slice %25 {offsets = [0, 0, 24], sizes = [2, 8, 8], strides = [1, 1, 1]} : vector<2x8x32xbf16> to vector<2x8x8xbf16>
    %34 = tpu.concatenate %30, %31, %32, %33 in 0 : vector<2x8x8xbf16>, vector<2x8x8xbf16>, vector<2x8x8xbf16>, vector<2x8x8xbf16> -> vector<8x8x8xbf16>
    %35 = vector.extract_strided_slice %27 {offsets = [0, 0, 0], sizes = [2, 8, 8], strides = [1, 1, 1]} : vector<2x8x32xbf16> to vector<2x8x8xbf16>
    %36 = vector.extract_strided_slice %27 {offsets = [0, 0, 8], sizes = [2, 8, 8], strides = [1, 1, 1]} : vector<2x8x32xbf16> to vector<2x8x8xbf16>
    %37 = vector.extract_strided_slice %27 {offsets = [0, 0, 16], sizes = [2, 8, 8], strides = [1, 1, 1]} : vector<2x8x32xbf16> to vector<2x8x8xbf16>
    %38 = vector.extract_strided_slice %27 {offsets = [0, 0, 24], sizes = [2, 8, 8], strides = [1, 1, 1]} : vector<2x8x32xbf16> to vector<2x8x8xbf16>
    %39 = tpu.concatenate %35, %36, %37, %38 in 0 : vector<2x8x8xbf16>, vector<2x8x8xbf16>, vector<2x8x8xbf16>, vector<2x8x8xbf16> -> vector<8x8x8xbf16>
    %40 = vector.extract_strided_slice %29 {offsets = [0, 0, 0], sizes = [2, 8, 8], strides = [1, 1, 1]} : vector<2x8x32xbf16> to vector<2x8x8xbf16>
    %41 = vector.extract_strided_slice %29 {offsets = [0, 0, 8], sizes = [2, 8, 8], strides = [1, 1, 1]} : vector<2x8x32xbf16> to vector<2x8x8xbf16>
    %42 = vector.extract_strided_slice %29 {offsets = [0, 0, 16], sizes = [2, 8, 8], strides = [1, 1, 1]} : vector<2x8x32xbf16> to vector<2x8x8xbf16>
    %43 = vector.extract_strided_slice %29 {offsets = [0, 0, 24], sizes = [2, 8, 8], strides = [1, 1, 1]} : vector<2x8x32xbf16> to vector<2x8x8xbf16>
    %44 = tpu.concatenate %40, %41, %42, %43 in 0 : vector<2x8x8xbf16>, vector<2x8x8xbf16>, vector<2x8x8xbf16>, vector<2x8x8xbf16> -> vector<8x8x8xbf16>
    "tpu.trace_start"() <{level = 10 : i32, message = "zqd,zkd->zqk"}> : () -> ()
    %cst_22 = arith.constant dense<0.000000e+00> : vector<8x8x8xf32>
    %45 = tpu.matmul %34, %39, %cst_22 {dimension_numbers = #tpu.dot_dimension_numbers<[2], [2], [1], [1], [0, 0, 0, 1, 1, 1], [0], [0]>} : vector<8x8x8xbf16>, vector<8x8x8xbf16>, vector<8x8x8xf32> -> vector<8x8x8xf32>
    "tpu.trace_stop"() : () -> ()
    %cst_23 = arith.constant dense<0xFF800000> : vector<8x8xf32>
    %46 = vector.multi_reduction <maximumf>, %45, %cst_23 [2] : vector<8x8x8xf32> to vector<8x8xf32>
    %47 = vector.shape_cast %46 : vector<8x8xf32> to vector<8x8x1xf32>
    %48 = vector.broadcast %47 : vector<8x8x1xf32> to vector<8x8x8xf32>
    %49 = arith.subf %45, %48 : vector<8x8x8xf32>
    %50 = math.exp %49 : vector<8x8x8xf32>
    %cst_24 = arith.constant dense<0.000000e+00> : vector<8x8xf32>
    %51 = vector.multi_reduction <add>, %50, %cst_24 [2] : vector<8x8x8xf32> to vector<8x8xf32>
    %52 = vector.shape_cast %51 : vector<8x8xf32> to vector<8x8x1xf32>
    %53 = tpu.reciprocal %52 {approx = true} : vector<8x8x1xf32> -> vector<8x8x1xf32>
    %54 = vector.broadcast %53 : vector<8x8x1xf32> to vector<8x8x8xf32>
    %55 = arith.mulf %50, %54 : vector<8x8x8xf32>
    %56 = arith.truncf %55 : vector<8x8x8xf32> to vector<8x8x8xbf16>
    "tpu.trace_start"() <{level = 10 : i32, message = "zqk,zkd->zqd"}> : () -> ()
    %cst_25 = arith.constant dense<0.000000e+00> : vector<8x8x8xf32>
    %57 = tpu.matmul %56, %44, %cst_25 {dimension_numbers = #tpu.dot_dimension_numbers<[2], [1], [1], [2], [0, 0, 0, 1, 1, 2], [0], [0]>} : vector<8x8x8xbf16>, vector<8x8x8xbf16>, vector<8x8x8xf32> -> vector<8x8x8xf32>
    "tpu.trace_stop"() : () -> ()
    %58 = vector.shape_cast %57 : vector<8x8x8xf32> to vector<4x2x8x8xf32>
    %59 = vector.extract_strided_slice %58 {offsets = [0, 0, 0, 0], sizes = [1, 2, 8, 8], strides = [1, 1, 1, 1]} : vector<4x2x8x8xf32> to vector<1x2x8x8xf32>
    %60 = vector.shape_cast %59 : vector<1x2x8x8xf32> to vector<2x8x8xf32>
    %61 = vector.shape_cast %60 : vector<2x8x8xf32> to vector<16x8xf32>
    %62 = vector.extract_strided_slice %58 {offsets = [1, 0, 0, 0], sizes = [1, 2, 8, 8], strides = [1, 1, 1, 1]} : vector<4x2x8x8xf32> to vector<1x2x8x8xf32>
    %63 = vector.shape_cast %62 : vector<1x2x8x8xf32> to vector<2x8x8xf32>
    %64 = vector.shape_cast %63 : vector<2x8x8xf32> to vector<16x8xf32>
    %65 = vector.extract_strided_slice %58 {offsets = [2, 0, 0, 0], sizes = [1, 2, 8, 8], strides = [1, 1, 1, 1]} : vector<4x2x8x8xf32> to vector<1x2x8x8xf32>
    %66 = vector.shape_cast %65 : vector<1x2x8x8xf32> to vector<2x8x8xf32>
    %67 = vector.shape_cast %66 : vector<2x8x8xf32> to vector<16x8xf32>
    %68 = vector.extract_strided_slice %58 {offsets = [3, 0, 0, 0], sizes = [1, 2, 8, 8], strides = [1, 1, 1, 1]} : vector<4x2x8x8xf32> to vector<1x2x8x8xf32>
    %69 = vector.shape_cast %68 : vector<1x2x8x8xf32> to vector<2x8x8xf32>
    %70 = vector.shape_cast %69 : vector<2x8x8xf32> to vector<16x8xf32>
    %71 = tpu.concatenate %61, %64, %67, %70 in 1 : vector<16x8xf32>, vector<16x8xf32>, vector<16x8xf32>, vector<16x8xf32> -> vector<16x32xf32>
    %72 = arith.truncf %71 : vector<16x32xf32> to vector<16x32xbf16>
    %c0_26 = arith.constant 0 : index
    %c0_27 = arith.constant 0 : index
    %73 = vector.load %arg10[%c0_26, %c0_27] : memref<32x32xbf16, #tpu.memory_space<vmem>>, vector<32x32xbf16>
    %cst_28 = arith.constant dense<0.000000e+00> : vector<16x32xf32>
    %74 = tpu.matmul %72, %73, %cst_28 {dimension_numbers = #tpu.dot_dimension_numbers<[1], [0], [0], [1], [0, 0, 1, 1], [], []>} : vector<16x32xbf16>, vector<32x32xbf16>, vector<16x32xf32> -> vector<16x32xf32>
    %75 = tpu.iota {dimensions = array<i32: 1>} : vector<2x8x32xi32>
    %76 = vector.shape_cast %75 : vector<2x8x32xi32> to vector<16x32xi32>
    %c2_i32 = arith.constant 2 : i32
    %77 = tpu.dynamic_rotate %23 by %c2_i32 dim 0 : vector<16x32xf32>, i32 -> vector<16x32xf32>
    %c-2_i32 = arith.constant -2 : i32
    %78 = vector.broadcast %c-2_i32 : i32 to vector<16x32xi32>
    %79 = arith.addi %76, %78 : vector<16x32xi32>
    %c0_i32 = arith.constant 0 : i32
    %80 = vector.broadcast %c0_i32 : i32 to vector<16x32xi32>
    %81 = arith.cmpi sge, %79, %80 : vector<16x32xi32>
    %c-2_i32_29 = arith.constant -2 : i32
    %82 = vector.broadcast %c-2_i32_29 : i32 to vector<16x32xi32>
    %83 = arith.addi %76, %82 : vector<16x32xi32>
    %c8_i32 = arith.constant 8 : i32
    %84 = vector.broadcast %c8_i32 : i32 to vector<16x32xi32>
    %85 = arith.cmpi slt, %83, %84 : vector<16x32xi32>
    %86 = arith.andi %81, %85 : vector<16x32xi1>
    %cst_30 = arith.constant 0.000000e+00 : f32
    %87 = vector.broadcast %cst_30 : f32 to vector<16x32xf32>
    %88 = arith.select %86, %77, %87 : vector<16x32xi1>, vector<16x32xf32>
    %89 = arith.truncf %88 : vector<16x32xf32> to vector<16x32xbf16>
    %c0_31 = arith.constant 0 : index
    %c0_32 = arith.constant 0 : index
    %c0_33 = arith.constant 0 : index
    %90 = vector.load %arg11[%c0_31, %c0_32, %c0_33] : memref<5x32x32xbf16, #tpu.memory_space<vmem>>, vector<1x32x32xbf16>
    %91 = vector.shape_cast %90 : vector<1x32x32xbf16> to vector<32x32xbf16>
    %cst_34 = arith.constant dense<0.000000e+00> : vector<16x32xf32>
    %92 = tpu.matmul %89, %91, %cst_34 {dimension_numbers = #tpu.dot_dimension_numbers<[1], [0], [0], [1], [0, 0, 1, 1], [], []>} : vector<16x32xbf16>, vector<32x32xbf16>, vector<16x32xf32> -> vector<16x32xf32>
    %93 = arith.addf %74, %92 : vector<16x32xf32>
    %c1_i32 = arith.constant 1 : i32
    %94 = tpu.dynamic_rotate %23 by %c1_i32 dim 0 : vector<16x32xf32>, i32 -> vector<16x32xf32>
    %c-1_i32 = arith.constant -1 : i32
    %95 = vector.broadcast %c-1_i32 : i32 to vector<16x32xi32>
    %96 = arith.addi %76, %95 : vector<16x32xi32>
    %c0_i32_35 = arith.constant 0 : i32
    %97 = vector.broadcast %c0_i32_35 : i32 to vector<16x32xi32>
    %98 = arith.cmpi sge, %96, %97 : vector<16x32xi32>
    %c-1_i32_36 = arith.constant -1 : i32
    %99 = vector.broadcast %c-1_i32_36 : i32 to vector<16x32xi32>
    %100 = arith.addi %76, %99 : vector<16x32xi32>
    %c8_i32_37 = arith.constant 8 : i32
    %101 = vector.broadcast %c8_i32_37 : i32 to vector<16x32xi32>
    %102 = arith.cmpi slt, %100, %101 : vector<16x32xi32>
    %103 = arith.andi %98, %102 : vector<16x32xi1>
    %cst_38 = arith.constant 0.000000e+00 : f32
    %104 = vector.broadcast %cst_38 : f32 to vector<16x32xf32>
    %105 = arith.select %103, %94, %104 : vector<16x32xi1>, vector<16x32xf32>
    %106 = arith.truncf %105 : vector<16x32xf32> to vector<16x32xbf16>
    %c1 = arith.constant 1 : index
    %c0_39 = arith.constant 0 : index
    %c0_40 = arith.constant 0 : index
    %107 = vector.load %arg11[%c1, %c0_39, %c0_40] : memref<5x32x32xbf16, #tpu.memory_space<vmem>>, vector<1x32x32xbf16>
    %108 = vector.shape_cast %107 : vector<1x32x32xbf16> to vector<32x32xbf16>
    %cst_41 = arith.constant dense<0.000000e+00> : vector<16x32xf32>
    %109 = tpu.matmul %106, %108, %cst_41 {dimension_numbers = #tpu.dot_dimension_numbers<[1], [0], [0], [1], [0, 0, 1, 1], [], []>} : vector<16x32xbf16>, vector<32x32xbf16>, vector<16x32xf32> -> vector<16x32xf32>
    %110 = arith.addf %93, %109 : vector<16x32xf32>
    %111 = arith.truncf %23 : vector<16x32xf32> to vector<16x32xbf16>
    %c2 = arith.constant 2 : index
    %c0_42 = arith.constant 0 : index
    %c0_43 = arith.constant 0 : index
    %112 = vector.load %arg11[%c2, %c0_42, %c0_43] : memref<5x32x32xbf16, #tpu.memory_space<vmem>>, vector<1x32x32xbf16>
    %113 = vector.shape_cast %112 : vector<1x32x32xbf16> to vector<32x32xbf16>
    %cst_44 = arith.constant dense<0.000000e+00> : vector<16x32xf32>
    %114 = tpu.matmul %111, %113, %cst_44 {dimension_numbers = #tpu.dot_dimension_numbers<[1], [0], [0], [1], [0, 0, 1, 1], [], []>} : vector<16x32xbf16>, vector<32x32xbf16>, vector<16x32xf32> -> vector<16x32xf32>
    %115 = arith.addf %110, %114 : vector<16x32xf32>
    %c15_i32 = arith.constant 15 : i32
    %116 = tpu.dynamic_rotate %23 by %c15_i32 dim 0 : vector<16x32xf32>, i32 -> vector<16x32xf32>
    %c1_i32_45 = arith.constant 1 : i32
    %117 = vector.broadcast %c1_i32_45 : i32 to vector<16x32xi32>
    %118 = arith.addi %76, %117 : vector<16x32xi32>
    %c0_i32_46 = arith.constant 0 : i32
    %119 = vector.broadcast %c0_i32_46 : i32 to vector<16x32xi32>
    %120 = arith.cmpi sge, %118, %119 : vector<16x32xi32>
    %c1_i32_47 = arith.constant 1 : i32
    %121 = vector.broadcast %c1_i32_47 : i32 to vector<16x32xi32>
    %122 = arith.addi %76, %121 : vector<16x32xi32>
    %c8_i32_48 = arith.constant 8 : i32
    %123 = vector.broadcast %c8_i32_48 : i32 to vector<16x32xi32>
    %124 = arith.cmpi slt, %122, %123 : vector<16x32xi32>
    %125 = arith.andi %120, %124 : vector<16x32xi1>
    %cst_49 = arith.constant 0.000000e+00 : f32
    %126 = vector.broadcast %cst_49 : f32 to vector<16x32xf32>
    %127 = arith.select %125, %116, %126 : vector<16x32xi1>, vector<16x32xf32>
    %128 = arith.truncf %127 : vector<16x32xf32> to vector<16x32xbf16>
    %c3 = arith.constant 3 : index
    %c0_50 = arith.constant 0 : index
    %c0_51 = arith.constant 0 : index
    %129 = vector.load %arg11[%c3, %c0_50, %c0_51] : memref<5x32x32xbf16, #tpu.memory_space<vmem>>, vector<1x32x32xbf16>
    %130 = vector.shape_cast %129 : vector<1x32x32xbf16> to vector<32x32xbf16>
    %cst_52 = arith.constant dense<0.000000e+00> : vector<16x32xf32>
    %131 = tpu.matmul %128, %130, %cst_52 {dimension_numbers = #tpu.dot_dimension_numbers<[1], [0], [0], [1], [0, 0, 1, 1], [], []>} : vector<16x32xbf16>, vector<32x32xbf16>, vector<16x32xf32> -> vector<16x32xf32>
    %132 = arith.addf %115, %131 : vector<16x32xf32>
    %c14_i32 = arith.constant 14 : i32
    %133 = tpu.dynamic_rotate %23 by %c14_i32 dim 0 : vector<16x32xf32>, i32 -> vector<16x32xf32>
    %c2_i32_53 = arith.constant 2 : i32
    %134 = vector.broadcast %c2_i32_53 : i32 to vector<16x32xi32>
    %135 = arith.addi %76, %134 : vector<16x32xi32>
    %c0_i32_54 = arith.constant 0 : i32
    %136 = vector.broadcast %c0_i32_54 : i32 to vector<16x32xi32>
    %137 = arith.cmpi sge, %135, %136 : vector<16x32xi32>
    %c2_i32_55 = arith.constant 2 : i32
    %138 = vector.broadcast %c2_i32_55 : i32 to vector<16x32xi32>
    %139 = arith.addi %76, %138 : vector<16x32xi32>
    %c8_i32_56 = arith.constant 8 : i32
    %140 = vector.broadcast %c8_i32_56 : i32 to vector<16x32xi32>
    %141 = arith.cmpi slt, %139, %140 : vector<16x32xi32>
    %142 = arith.andi %137, %141 : vector<16x32xi1>
    %cst_57 = arith.constant 0.000000e+00 : f32
    %143 = vector.broadcast %cst_57 : f32 to vector<16x32xf32>
    %144 = arith.select %142, %133, %143 : vector<16x32xi1>, vector<16x32xf32>
    %145 = arith.truncf %144 : vector<16x32xf32> to vector<16x32xbf16>
    %c4 = arith.constant 4 : index
    %c0_58 = arith.constant 0 : index
    %c0_59 = arith.constant 0 : index
    %146 = vector.load %arg11[%c4, %c0_58, %c0_59] : memref<5x32x32xbf16, #tpu.memory_space<vmem>>, vector<1x32x32xbf16>
    %147 = vector.shape_cast %146 : vector<1x32x32xbf16> to vector<32x32xbf16>
    %cst_60 = arith.constant dense<0.000000e+00> : vector<16x32xf32>
    %148 = tpu.matmul %145, %147, %cst_60 {dimension_numbers = #tpu.dot_dimension_numbers<[1], [0], [0], [1], [0, 0, 1, 1], [], []>} : vector<16x32xbf16>, vector<32x32xbf16>, vector<16x32xf32> -> vector<16x32xf32>
    %149 = arith.addf %132, %148 : vector<16x32xf32>
    %c0_61 = arith.constant 0 : index
    %c0_62 = arith.constant 0 : index
    %150 = vector.load %arg12[%c0_61, %c0_62] : memref<1x32xf32, #tpu.memory_space<vmem>>, vector<1x32xf32>
    %151 = vector.broadcast %150 : vector<1x32xf32> to vector<16x32xf32>
    %152 = arith.addf %149, %151 : vector<16x32xf32>
    %153 = vector.shape_cast %152 : vector<16x32xf32> to vector<2x8x32xf32>
    %c0_63 = arith.constant 0 : index
    %c0_64 = arith.constant 0 : index
    %c0_65 = arith.constant 0 : index
    %154 = vector.load %arg13[%c0_63, %c0_64, %c0_65] : memref<2x8x32xf32, #tpu.memory_space<vmem>>, vector<2x8x32xf32>
    tpu.vector_store %arg13[%c0_63, %c0_64, %c0_65], %153 {strides = array<i32>} : memref<2x8x32xf32, #tpu.memory_space<vmem>>, vector<2x8x32xf32>,
    return
  }
  func.func @transform_0(%arg0: i32) -> (i32, i32, i32) {
    %c0_i32 = arith.constant 0 : i32
    %c0_i32_0 = arith.constant 0 : i32
    %c0_i32_1 = arith.constant 0 : i32
    return %arg0, %c0_i32, %c0_i32_0 : i32, i32, i32
  }
  func.func @transform_1(%arg0: i32) -> (i32, i32, i32) {
    %c0_i32 = arith.constant 0 : i32
    %c0_i32_0 = arith.constant 0 : i32
    %c0_i32_1 = arith.constant 0 : i32
    return %arg0, %c0_i32, %c0_i32_0 : i32, i32, i32
  }
  func.func @transform_2(%arg0: i32) -> (i32, i32, i32) {
    %c0_i32 = arith.constant 0 : i32
    %c0_i32_0 = arith.constant 0 : i32
    %c0_i32_1 = arith.constant 0 : i32
    return %arg0, %c0_i32, %c0_i32_0 : i32, i32, i32
  }
  func.func @transform_3(%arg0: i32) -> (i32, i32) {
    %c0_i32 = arith.constant 0 : i32
    %c0_i32_0 = arith.constant 0 : i32
    %c0_i32_1 = arith.constant 0 : i32
    return %c0_i32, %c0_i32_0 : i32, i32
  }
  func.func @transform_4(%arg0: i32) -> (i32, i32) {
    %c0_i32 = arith.constant 0 : i32
    %c0_i32_0 = arith.constant 0 : i32
    %c0_i32_1 = arith.constant 0 : i32
    return %c0_i32, %c0_i32_0 : i32, i32
  }
  func.func @transform_5(%arg0: i32) -> (i32, i32) {
    %c0_i32 = arith.constant 0 : i32
    %c0_i32_0 = arith.constant 0 : i32
    %c0_i32_1 = arith.constant 0 : i32
    return %c0_i32, %c0_i32_0 : i32, i32
  }
  func.func @transform_6(%arg0: i32) -> (i32, i32) {
    %c0_i32 = arith.constant 0 : i32
    %c0_i32_0 = arith.constant 0 : i32
    %c0_i32_1 = arith.constant 0 : i32
    return %c0_i32, %c0_i32_0 : i32, i32
  }
  func.func @transform_7(%arg0: i32) -> (i32, i32) {
    %c0_i32 = arith.constant 0 : i32
    %c0_i32_0 = arith.constant 0 : i32
    %c0_i32_1 = arith.constant 0 : i32
    return %c0_i32, %c0_i32_0 : i32, i32
  }
  func.func @transform_8(%arg0: i32) -> (i32, i32) {
    %c0_i32 = arith.constant 0 : i32
    %c0_i32_0 = arith.constant 0 : i32
    %c0_i32_1 = arith.constant 0 : i32
    return %c0_i32, %c0_i32_0 : i32, i32
  }
  func.func @transform_9(%arg0: i32) -> (i32, i32) {
    %c0_i32 = arith.constant 0 : i32
    %c0_i32_0 = arith.constant 0 : i32
    %c0_i32_1 = arith.constant 0 : i32
    return %c0_i32, %c0_i32_0 : i32, i32
  }
  func.func @transform_10(%arg0: i32) -> (i32, i32, i32) {
    %c0_i32 = arith.constant 0 : i32
    %c0_i32_0 = arith.constant 0 : i32
    %c0_i32_1 = arith.constant 0 : i32
    %c0_i32_2 = arith.constant 0 : i32
    return %c0_i32, %c0_i32_0, %c0_i32_1 : i32, i32, i32
  }
  func.func @transform_11(%arg0: i32) -> (i32, i32) {
    %c0_i32 = arith.constant 0 : i32
    %c0_i32_0 = arith.constant 0 : i32
    %c0_i32_1 = arith.constant 0 : i32
    return %c0_i32, %c0_i32_0 : i32, i32
  }
  func.func @transform_12(%arg0: i32) -> (i32, i32, i32) {
    %c0_i32 = arith.constant 0 : i32
    %c0_i32_0 = arith.constant 0 : i32
    %c0_i32_1 = arith.constant 0 : i32
    return %arg0, %c0_i32, %c0_i32_0 : i32, i32, i32
  }
}

</mosaic_0001>

<bundles_post_ra>
// kernel: tpu_custom_call.1
= control target key start
LH: loop header
LB: loop body
LE: loop exit
PB: predicated region body
PF: predicated region fallthrough
CT: control target
= control target key end

     0   :  { %s3809_s0 = inlined_call_operand.hbm [shape: f32[4,8,32], index: 0, kind: input, shape index: {}]   ;;  %s3810_s1 = inlined_call_operand.hbm [shape: f32[4,8,32], index: 1, kind: input, shape index: {}]   ;;  %s3811_s2 = inlined_call_operand.hbm [shape: f32[4,8,32], index: 2, kind: input, shape index: {}]   ;;  %s3812_s3 = inlined_call_operand.hbm [shape: bf16[32,32], index: 3, kind: input, shape index: {}]   ;;  %s3813_s4 = inlined_call_operand.vmem [shape: f32[1,32], index: 4, kind: input, shape index: {}]   ;;  %s3814_s5 = inlined_call_operand.vmem [shape: bf16[32,32], index: 5, kind: input, shape index: {}]   ;;  %s3815_s6 = inlined_call_operand.vmem [shape: f32[1,32], index: 6, kind: input, shape index: {}]   ;;  %s3816_s7 = inlined_call_operand.hbm [shape: bf16[32,32], index: 7, kind: input, shape index: {}]   ;;  %s3817_s8 = inlined_call_operand.hbm [shape: f32[1,32], index: 8, kind: input, shape index: {}]   ;;  %s3818_s9 = inlined_call_operand.vmem [shape: bf16[32,32], index: 9, kind: input, shape index: {}]   ;;  %s3819_s10 = inlined_call_operand.hbm [shape: bf16[5,32,32], index: 10, kind: input, shape index: {}]   ;;  %s3820_s11 = inlined_call_operand.vmem [shape: f32[1,32], index: 11, kind: input, shape index: {}]   ;;  %s3821_s12 = inlined_call_operand.hbm [shape: f32[4,8,32], index: 12, kind: output, shape index: {}]  }
   0x1   :  { %3852 = sst [smem:[#allocation26_spill]] %s3810_s1 }
   0x2   :  { %3853 = sst [smem:[#allocation27_spill]] %s3812_s3 }
   0x3   :  { %3854 = sst [smem:[#allocation28_spill]] %s3813_s4 }
   0x4   :  { %3855 = sst [smem:[#allocation29_spill]] %s3815_s6 }
   0x5   :  { %3856 = sst [smem:[#allocation30_spill]] %s3817_s8 }
   0x6   :  { %3857 = sst [smem:[#allocation31_spill]] %s3818_s9 }
   0x7   :  { %3858 = sst [smem:[#allocation32_spill]] %s3820_s11 }
   0x8   :  { %3859 = sst [smem:[#allocation33_spill]] %s3821_s12 }
   0x9   :  { %17 = vsyncpa [#allocation3], 0 }
   0xa   :  { %19 = vsyncpa [#allocation3 + $0x1], 0 }
   0xb   :  { %20 = vsyncpa [#allocation6], 0 }
   0xc   :  { %22 = vsyncpa [#allocation6 + $0x1], 0 }
   0xd   :  { %23 = vsyncpa [#allocation9], 0 }
   0xe   :  { %24 = vsyncpa [#allocation12], 0 }
   0xf   :  { %25 = vsyncpa [#allocation4], 0 }
  0x10   :  { %27 = vsyncpa [#allocation4 + $0x1], 0  ;;  %s3166_s21 = smov 0   ;;  %s3168_s22 = smov 0  }
  0x11   :  { %s3170_s23 = smov 0   ;;  %s3172_s24 = smov 0  }
  0x12 LB: > { %3860 = sst [smem:[#allocation20_spill]] %s3066_s21  ;;  %s3187_s25 = sadd.s32 4294967295, %s3078_s24   ;;  %s3078_s24 = sphi %s3172_s24, %s3905_s24   ;;  %s3074_s23 = sphi %s3170_s23, %s3909_s23   ;;  %s3070_s22 = sphi %s3168_s22, %s3908_s22   ;;  %s3066_s21 = sphi %s3166_s21, %s3907_s21  }
  0x13   : > { %3861 = sst [smem:[#allocation21_spill]] %s3078_s24  ;;  %s2303_s26 = sadd.s32 4294967294, %s3078_s24  }
  0x14   : > { %p53_p0 = scmp.ne.s32.totalorder %s3070_s22, %s3066_s21  ;;  %p3823_p1 = scmp.eq.s32.totalorder %s3187_s25, 0 }
  0x15   : > { %p324_p3 = scmp.eq.s32.totalorder %s2303_s26, 1  ;;  %p2304_p5 = scmp.ge.s32.totalorder %s3078_s24, 1 }
  0x16   : > { %p3196_p4 = por %p3823_p1, %p53_p0  ;;  %p331_p7 = scmp.lt.s32.totalorder %s3078_s24, 3 }
  0x17   : > { %p3201_p6 = por %p324_p3, %p53_p0  ;;  %s3080_s30 = smov [#allocation8]  }
  0x18   : > { %s3862_s27 = scalar_select %p3196_p4, 1, 0 }
  0x19   : > { %s3863_s28 = scalar_select %p3201_p6, 1, 0 }
  0x1a   : > { %p3206_p8 = pnand %p2304_p5, %p331_p7  ;;  %s343_s13 = sshll.u32 %s3080_s30, 4  ;;  %s3210_s13 = int_to_ptr.vmem [resolvable:$true] %s343_s13 }
  0x1b   : > { %3864 = sst [smem:[#allocation22_spill]] %s3863_s28  ;;  %s3081_s15 = smov [#allocation11]  }
  0x1c   : > { %s3865_s29 = scalar_select %p3206_p8, 1, 0 }
  0x1d   : > { %p2647_p9 = pneg %p3206_p8  ;;  %s379_s16 = sshll.u32 %s3081_s15, 4  ;;  %s3221_s16 = int_to_ptr.vmem [resolvable:$true] %s379_s16 }
  0x1e   : > { %s3867_s3 = sld [smem:[#allocation27_spill]] }
  0x1f   : > { %p3217_p11 = pnand %p2647_p9, %p3823_p1 }
  0x21   : > { %s3866_s14 = scalar_select %p3217_p11, 1, 0 }
  0x22   : > { %p3231_p13 = pneg %p3217_p11 }
  0x24   : > { %s2798_s19 = scalar_lea.hbm %s3867_s3, 256 }
  0x25   : > { %p2799_p12 = scmp.ne.s32.totalorder %s3867_s3, %s2798_s19  ;;  %p2805_p5 = scmp.lt.u32.totalorder %s2798_s19, %s3867_s3 }
  0x26   : > { %s3868_s30 = scalar_select %p3231_p13, 1, 0 }
  0x27   : > { %p2801_p0 = pnand %p3231_p13, %p2799_p12 }
  0x29   : > { %p2802_p3 = pneg %p2801_p0 }
  0x2b   : > { %p2807_p7 = pnand %p2805_p5, %p2802_p3 }
  0x2d   : > { %2810 = shalt.err (!%p2807_p7)
}
  0x2e   : > { %s2811_s17 = scalar_lea.vmem %s3210_s13, 256  ;;  %p2819_p2 = scmp.lt.s32.totalorder %s3210_s13, %s3210_s13 }
  0x2f   : > { %p2812_p9 = scmp.ne.s32.totalorder %s3210_s13, %s2811_s17  ;;  %p2820_p6 = scmp.lt.s32.totalorder %s2811_s17, %s2811_s17 }
  0x31   : > { %p2814_p10 = pnand %p2812_p9, %p3231_p13  ;;  %p2821_p12 = por %p2820_p6, %p2819_p2 }
  0x33   : > { %p2815_p1 = pneg %p2814_p10 }
  0x35   : > { %p2822_p0 = pnand %p2821_p12, %p2815_p1 }
  0x37   : > { %2825 = shalt.err (!%p2822_p0)
}
  0x38   : > { %s3828_s18 = smov 64   ;;  %s3830_s28 = smov 4  }
  0x39   : > { %2650 = dma.hbm_to_vmem [thread:$0]  (!%p3217_p11), %s3867_s3, 256, %s3210_s13, [#allocation9], %s3828_s18, %s3828_s18, %s3830_s28  }
  0x3a   : > { %s3869_s8 = sld [smem:[#allocation30_spill]] }
  0x40   : > { %s2826_s17 = scalar_lea.hbm %s3869_s8, 16 }
  0x41   : > { %p2827_p1 = scmp.ne.s32.totalorder %s3869_s8, %s2826_s17  ;;  %p2833_p10 = scmp.lt.u32.totalorder %s2826_s17, %s3869_s8 }
  0x43   : > { %p2829_p2 = pnand %p2827_p1, %p3231_p13 }
  0x45   : > { %p2830_p6 = pneg %p2829_p2 }
  0x47   : > { %p2835_p3 = pnand %p2833_p10, %p2830_p6 }
  0x49   : > { %2838 = shalt.err (!%p2835_p3)
}
  0x4a   : > { %s2839_s13 = scalar_lea.vmem %s3221_s16, 16  ;;  %s2846_s12 = scalar_lea.vmem %s3221_s16, 32 }
  0x4b   : > { %p2840_p5 = scmp.ne.s32.totalorder %s3221_s16, %s2839_s13  ;;  %p2847_p12 = scmp.lt.s32.totalorder %s3221_s16, %s3221_s16 }
  0x4c   : > { %p2848_p0 = scmp.lt.s32.totalorder %s2846_s12, %s2839_s13 }
  0x4d   : > { %p2842_p7 = pnand %p2840_p5, %p3231_p13 }
  0x4e   : > { %p2849_p1 = por %p2848_p0, %p2847_p12 }
  0x4f   : > { %p2843_p9 = pneg %p2842_p7 }
  0x51   : > { %p2850_p2 = pnand %p2849_p1, %p2843_p9 }
  0x53   : > { %2853 = shalt.err (!%p2850_p2)
}
  0x54   : > { %2656 = dma.hbm_to_vmem [thread:$0]  (!%p3217_p11), %s3869_s8, 16, %s3221_s16, [#allocation12]  }
  0x55   : > { %s3280_s21 = sadd.s32 1, %s3078_s24   ;;  %s40_s19 = sadd.s32 1, %s3074_s23 }
  0x56   : > { %3870 = sst [smem:[#allocation23_spill]] %s3280_s21  ;;  %s37_s20 = ssub.s32 %s3078_s24, %s3280_s21 }
  0x57   : > { %p47_p6 = scmp.ne.s32.totalorder %s3074_s23, %s3070_s22  ;;  %p38_p10 = scmp.eq.s32.totalorder %s37_s20, 0 }
  0x58   : > { %p48_p3 = scmp.eq.s32.totalorder %s3078_s24, 0  ;;  %p3871_p5 = scmp.eq.s32.totalorder %s3187_s25, 1 }
  0x59   : > { %p2678_p9 = scmp.lt.s32.totalorder %s3078_s24, 2  ;;  %s3827_s17 = sand.u32 1, %s3074_s23  }
  0x5a   : > { %p3290_p7 = por %p3871_p5, %p47_p6  ;;  %p49_p12 = por %p48_p3, %p47_p6 }
  0x5b   : > { %s3296_s15 = scalar_select %p38_p10, %s3074_s23, %s40_s19  }
  0x5c   : > { %s3872_s26 = scalar_select %p3290_p7, 1, 0 }
  0x5d   : > { %3874 = sst [smem:[#allocation25_spill]] %s3296_s15  ;;  %s3301_s16 = sshll.u32 %s3827_s17, 4 }
  0x5e   : > { %3873 = sst [smem:[#allocation24_spill]] %s3872_s26  ;;  %s3304_s13 = sshll.u32 %s3078_s24, 8 }
  0x5f   : > { %p3306_p0 = pnand %p2678_p9, %p49_p12  ;;  %s430_s9 = sand.u32 1, %s3078_s24  }
  0x60   : > { %s3876_s1 = sld [smem:[#allocation26_spill]]  ;;  %s434_s17 = scalar_lea.vmem [#allocation5], %s3301_s16 }
  0x61   : > { %s3875_s12 = scalar_select %p3306_p0, 1, 0 }
  0x62   : > { %s441_s18 = sshll.u32 %s434_s17, 4  ;;  %s3084_s28 = smov [#allocation10]   ;;  %s3318_s18 = int_to_ptr.vmem [resolvable:$true] %s441_s18 }
  0x63   : > { %s3320_s3 = sshll.u32 %s3084_s28, 4  ;;  %s3322_s8 = scalar_lea.sflag [#allocation6], %s430_s9  ;;  %s366_s3 = int_to_ptr.vmem [resolvable:$true] %s3320_s3 }
  0x64   : > { %p3328_p2 = pneg %p3306_p0 }
  0x66   : > { %s3315_s19 = scalar_lea.hbm %s3876_s1, %s3304_s13  ;;  %s2859_s21 = scalar_lea.hbm %s3876_s1, 512 }
  0x67   : > { %s2854_s15 = scalar_lea.hbm %s3315_s19, 256  ;;  %p2860_p3 = scmp.lt.u32.totalorder %s3315_s19, %s3876_s1 }
  0x68   : > { %p2855_p1 = scmp.ne.s32.totalorder %s3315_s19, %s2854_s15  ;;  %p2861_p5 = scmp.lt.u32.totalorder %s2859_s21, %s2854_s15 }
  0x69   : > { %s3877_s11 = scalar_select %p3328_p2, 1, 0 }
  0x6a   : > { %p2857_p6 = pnand %p3328_p2, %p2855_p1  ;;  %p2862_p9 = por %p2861_p5, %p2860_p3 }
  0x6b   : > { %p2863_p12 = scmp.lt.u32.totalorder %s2854_s15, %s3315_s19 }
  0x6c   : > { %p2858_p10 = pneg %p2857_p6 }
  0x6d   : > { %p2864_p7 = por %p2863_p12, %p2862_p9 }
  0x6f   : > { %p2865_p4 = pnand %p2864_p7, %p2858_p10 }
  0x71   : > { %2868 = shalt.err (!%p2865_p4)
}
  0x72   : > { %s2869_s9 = scalar_lea.vmem %s3318_s18, 256  ;;  %s3085_s20 = smov [#allocation5]  }
  0x73   : > { %p2870_p1 = scmp.ne.s32.totalorder %s3318_s18, %s2869_s9  ;;  %s2874_s17 = sshll.u32 %s3085_s20, 4  ;;  %s2875_s17 = int_to_ptr.vmem [resolvable:$false] %s2874_s17 }
  0x74   : > { %s2876_s24 = scalar_lea.vmem %s2875_s17, 512  ;;  %p2877_p11 = scmp.lt.s32.totalorder %s3318_s18, %s2875_s17 }
  0x75   : > { %p2872_p6 = pnand %p2870_p1, %p3328_p2  ;;  %p2878_p13 = scmp.lt.s32.totalorder %s2876_s24, %s2869_s9 }
  0x77   : > { %p2873_p8 = pneg %p2872_p6  ;;  %p2879_p3 = por %p2878_p13, %p2877_p11 }
  0x79   : > { %p2880_p5 = pnand %p2879_p3, %p2873_p8 }
  0x7b   : > { %2883 = shalt.err (!%p2880_p5)
}
  0x7c   : > { %s3846_s21 = smov 128   ;;  %s3848_s15 = smov 8  }
  0x7d   : > { %2666 = dma.hbm_to_vmem [thread:$0]  (!%p3306_p0), %s3315_s19, 256, %s3318_s18, %s3322_s8, %s3846_s21, %s3846_s21, %s3848_s15  }
  0x7e   : > { %s2884_s9 = scalar_lea.hbm %s3816_s7, 256  ;;  %p3878_p8 = scmp.ne.s32.totalorder %s3868_s30, 0 }
  0x7f   : > { %p2885_p4 = scmp.ne.s32.totalorder %s3816_s7, %s2884_s9  ;;  %p2891_p7 = scmp.lt.u32.totalorder %s2884_s9, %s3816_s7 }
  0x81   : > { %p2887_p11 = pnand %p2885_p4, %p3878_p8 }
  0x83   : > { %p2888_p13 = pneg %p2887_p11 }
  0x85   : > { %p2893_p10 = pnand %p2891_p7, %p2888_p13 }
  0x87   : > { %2896 = shalt.err (!%p2893_p10)
}
  0x88   : > { %s2897_s6 = scalar_lea.vmem %s366_s3, 256  ;;  %p2905_p6 = scmp.lt.s32.totalorder %s366_s3, %s366_s3 }
  0x89   : > { %p2898_p9 = scmp.ne.s32.totalorder %s366_s3, %s2897_s6  ;;  %p2906_p3 = scmp.lt.s32.totalorder %s2897_s6, %s2897_s6 }
  0x8b   : > { %p2900_p12 = pnand %p2898_p9, %p3878_p8  ;;  %p2907_p5 = por %p2906_p3, %p2905_p6 }
  0x8d   : > { %p2901_p1 = pneg %p2900_p12 }
  0x8f   : > { %p2908_p0 = pnand %p2907_p5, %p2901_p1 }
  0x91   : > { %2911 = shalt.err (!%p2908_p0)
}
  0x92   : > { %p3879_p4 = scmp.ne.s32.totalorder %s3866_s14, 0  ;;  %s3880_s18 = smov 4  }
  0x93   : > { %s3881_s19 = smov 64   ;;  %s3088_s28 = smov [#allocation13]  }
  0x94   : > { %2653 = dma.hbm_to_vmem [thread:$0]  (!%p3879_p4), %s3816_s7, 256, %s366_s3, [#allocation9], %s3881_s19, %s3881_s19, %s3880_s18  }
  0x95   : > { %s392_s20 = sshll.u32 %s3088_s28, 4  ;;  %s2912_s6 = scalar_lea.hbm %s3819_s10, 1280  ;;  %s393_s20 = int_to_ptr.vmem [resolvable:$true] %s392_s20 }
  0x96   : > { %p2913_p0 = scmp.ne.s32.totalorder %s3819_s10, %s2912_s6  ;;  %p2919_p7 = scmp.lt.u32.totalorder %s2912_s6, %s3819_s10 }
  0x98   : > { %p2915_p11 = pnand %p2913_p0, %p3878_p8 }
  0x9a   : > { %p2916_p13 = pneg %p2915_p11 }
  0x9c   : > { %p2921_p10 = pnand %p2919_p7, %p2916_p13 }
  0x9e   : > { %2924 = shalt.err (!%p2921_p10)
}
  0x9f   : > { %s2925_s3 = scalar_lea.vmem %s393_s20, 1280  ;;  %p2933_p6 = scmp.lt.s32.totalorder %s393_s20, %s393_s20 }
  0xa0   : > { %p2926_p9 = scmp.ne.s32.totalorder %s393_s20, %s2925_s3  ;;  %p2934_p3 = scmp.lt.s32.totalorder %s2925_s3, %s2925_s3 }
  0xa2   : > { %p2928_p12 = pnand %p2926_p9, %p3878_p8  ;;  %p2935_p5 = por %p2934_p3, %p2933_p6 }
  0xa4   : > { %p2929_p1 = pneg %p2928_p12 }
  0xa6   : > { %p2936_p2 = pnand %p2935_p5, %p2929_p1 }
  0xa8   : > { %2939 = shalt.err (!%p2936_p2)
}
  0xa9   : > { %2659 = dma.hbm_to_vmem [thread:$0]  (!%p3879_p4), %s3819_s10, 1280, %s393_s20, [#allocation12], %s3881_s19, %s3881_s19, %s3880_s18  }
  0xaa   : > { %s3402_s1 = scalar_lea.hbm %s3809_s0, %s3304_s13  ;;  %s413_s14 = scalar_lea.vmem [#allocation2], %s3301_s16 }
  0xab   : > { %s420_s26 = sshll.u32 %s413_s14, 4  ;;  %s3882_s28 = sand.u32 1, %s3074_s23   ;;  %s3405_s26 = int_to_ptr.vmem [resolvable:$true] %s420_s26 }
  0xac   : > { %s3409_s9 = scalar_lea.sflag [#allocation3], %s3882_s28  ;;  %s2940_s17 = scalar_lea.hbm %s3402_s1, 256 }
  0xad   : > { %p2941_p2 = scmp.ne.s32.totalorder %s3402_s1, %s2940_s17  ;;  %p3883_p8 = scmp.ne.s32.totalorder %s3877_s11, 0 }
  0xae   : > { %s2945_s20 = scalar_lea.hbm %s3809_s0, 512  ;;  %p2946_p11 = scmp.lt.u32.totalorder %s3402_s1, %s3809_s0 }
  0xaf   : > { %p2943_p4 = pnand %p2941_p2, %p3883_p8  ;;  %p2947_p13 = scmp.lt.u32.totalorder %s2945_s20, %s2940_s17 }
  0xb0   : > { %p2949_p10 = scmp.lt.u32.totalorder %s2940_s17, %s3402_s1 }
  0xb1   : > { %p2944_p0 = pneg %p2943_p4  ;;  %p2948_p7 = por %p2947_p13, %p2946_p11 }
  0xb3   : > { %p2950_p9 = por %p2949_p10, %p2948_p7 }
  0xb5   : > { %p2951_p12 = pnand %p2950_p9, %p2944_p0 }
  0xb7   : > { %2954 = shalt.err (!%p2951_p12)
}
  0xb8   : > { %s2955_s3 = scalar_lea.vmem %s3405_s26, 256  ;;  %s3089_s4 = smov [#allocation2]  }
  0xb9   : > { %p2956_p1 = scmp.ne.s32.totalorder %s3405_s26, %s2955_s3  ;;  %s2960_s21 = sshll.u32 %s3089_s4, 4  ;;  %s2961_s21 = int_to_ptr.vmem [resolvable:$false] %s2960_s21 }
  0xba   : > { %s2962_s30 = scalar_lea.vmem %s2961_s21, 512  ;;  %p2963_p5 = scmp.lt.s32.totalorder %s3405_s26, %s2961_s21 }
  0xbb   : > { %p2958_p6 = pnand %p2956_p1, %p3883_p8  ;;  %p2964_p2 = scmp.lt.s32.totalorder %s2962_s30, %s2955_s3 }
  0xbd   : > { %p2959_p3 = pneg %p2958_p6  ;;  %p2965_p4 = por %p2964_p2, %p2963_p5 }
  0xbf   : > { %p2966_p11 = pnand %p2965_p4, %p2959_p3 }
  0xc1   : > { %2969 = shalt.err (!%p2966_p11)
}
  0xc2   : > { %p3884_p0 = scmp.ne.s32.totalorder %s3875_s12, 0  ;;  %s3885_s15 = smov 8  }
  0xc3   : > { %s3886_s14 = smov 128   ;;  %s3440_s18 = scalar_lea.hbm %s3811_s2, %s3304_s13 }
  0xc4   : > { %2663 = dma.hbm_to_vmem [thread:$0]  (!%p3884_p0), %s3402_s1, 256, %s3405_s26, %s3409_s9, %s3886_s14, %s3886_s14, %s3885_s15  }
  0xc5   : > { %s455_s19 = scalar_lea.vmem [#allocation7], %s3301_s16  ;;  %s2970_s6 = scalar_lea.hbm %s3440_s18, 256 }
  0xc6   : > { %s462_s20 = sshll.u32 %s455_s19, 4  ;;  %p2971_p13 = scmp.ne.s32.totalorder %s3440_s18, %s2970_s6  ;;  %s3443_s20 = int_to_ptr.vmem [resolvable:$true] %s462_s20 }
  0xc7   : > { %s2975_s26 = scalar_lea.hbm %s3811_s2, 512  ;;  %p2976_p9 = scmp.lt.u32.totalorder %s3440_s18, %s3811_s2 }
  0xc8   : > { %p2973_p7 = pnand %p2971_p13, %p3883_p8  ;;  %p2977_p12 = scmp.lt.u32.totalorder %s2975_s26, %s2970_s6 }
  0xc9   : > { %p2979_p6 = scmp.lt.u32.totalorder %s2970_s6, %s3440_s18 }
  0xca   : > { %p2974_p10 = pneg %p2973_p7  ;;  %p2978_p1 = por %p2977_p12, %p2976_p9 }
  0xcc   : > { %p2980_p3 = por %p2979_p6, %p2978_p1 }
  0xce   : > { %p2981_p5 = pnand %p2980_p3, %p2974_p10 }
  0xd0   : > { %2984 = shalt.err (!%p2981_p5)
}
  0xd1   : > { %s2985_s16 = scalar_lea.vmem %s3443_s20, 256  ;;  %s3090_s3 = smov [#allocation7]  }
  0xd2   : > { %p2986_p2 = scmp.ne.s32.totalorder %s3443_s20, %s2985_s16  ;;  %s2990_s4 = sshll.u32 %s3090_s3, 4  ;;  %s2991_s4 = int_to_ptr.vmem [resolvable:$false] %s2990_s4 }
  0xd3   : > { %s2992_s21 = scalar_lea.vmem %s2991_s4, 512  ;;  %p2993_p13 = scmp.lt.s32.totalorder %s3443_s20, %s2991_s4 }
  0xd4   : > { %p2988_p4 = pnand %p2986_p2, %p3883_p8  ;;  %p2994_p7 = scmp.lt.s32.totalorder %s2992_s21, %s2985_s16 }
  0xd6   : > { %p2989_p11 = pneg %p2988_p4  ;;  %p2995_p9 = por %p2994_p7, %p2993_p13 }
  0xd8   : > { %p2996_p12 = pnand %p2995_p9, %p2989_p11 }
  0xda   : > { %2999 = shalt.err (!%p2996_p12)
}
  0xdb   : > { %2669 = dma.hbm_to_vmem [thread:$0]  (!%p3884_p0), %s3440_s18, 256, %s3443_s20, %s3322_s8, %s3886_s14, %s3886_s14, %s3885_s15  }
  0xdc   : > { %p3887_p8 = scmp.ne.s32.totalorder %s3865_s29, 0 }
  0xdd   : > { %s3473_s11 = sand.u32 (!%p3887_p8), 1, %s3070_s22   ;;  %p3888_p10 = scmp.ne.s32.totalorder (!%p3887_p8), %s3862_s27, 0 }
  0xde   : > { %474 = sbr.rel (%p3887_p8) target bundleno = 1765 (0x6e5), region = 68  ;;  %s3476_s30 = sshll.u32 (!%p3887_p8), %s3473_s11, 4 }
  0xdf   : > { %s477_s12 = scalar_lea.sflag (!%p3887_p8), [#allocation3], %s3473_s11  ;;  %s480_s28 = scalar_lea.vmem (!%p3887_p8), [#allocation2], %s3476_s30 }
  0xe5   : > { %3045 = dma.done.wait (%p3888_p10), %s477_s12, 256  }
  0xe6   : > { %3047 = vsyncadd (%p3888_p10), %s477_s12, 4294967040  ;;  %s485_s8 = sand.u32 1, %s3187_s25   ;;  %s489_s15 = scalar_lea.vmem [#allocation5], %s3476_s30 }
  0xe7   : > { %s486_s29 = scalar_lea.sflag [#allocation6], %s485_s8 }
  0xe8   : > { %3049 = dma.done.wait (%p3888_p10), %s486_s29, 512  }
  0xe9   : > { %3051 = vsyncadd (%p3888_p10), %s486_s29, 4294966784  ;;  %s498_s14 = scalar_lea.vmem [#allocation7], %s3476_s30  ;;  %p3889_p0 = scmp.eq.s32.totalorder %s3187_s25, 0 }
  0xeb   : > { %3053 = dma.done.wait (%p3889_p0), [#allocation9], 512   ;;  %p3890_p1 = pmov %p3889_p0 }
  0xec   : > { %p3891_p6 = pmov %p3889_p0 }
  0xed   : > { %3055 = vsyncadd (%p3890_p1), [#allocation9], 4294966784 }
  0xee   : > { %3057 = dma.done.wait (%p3891_p6), [#allocation12], 1296   ;;  %p3892_p3 = pmov %p3889_p0 }
  0xef   : > { %v3091_v0 = vmov 0.0   ;;  %vm3092_vm0 = vmmov 0   ;;  %v2748_v1 = vld [vmem:[#allocation8] sm:$0xff]   ;;  %v2750_v3 = vld [vmem:[#allocation8 + $0x8] sm:$0xff]   ;;  %vm602_vm1 = vcmask 261120   ;;  %v2752_v11 = vld [vmem:[#allocation10] sm:$0xff]  }
  0xf0   : > { %3059 = vsyncadd (%p3892_p3), [#allocation12], 4294966000  ;;  %2455 = vmatprep.subr.bf16.mxu0 %v3091_v0  ;;  %2463 = vmatprep.subr.bf16.mxu1 %v3091_v0  ;;  %v2749_v2 = vld [vmem:[%s3814_s5] sm:$0xff]   ;;  %v2751_v4 = vld [vmem:[%s3814_s5 + $0x8] sm:$0xff]   ;;  %s3893_s24 = sld [smem:[#allocation28_spill]]  ;;  %s3894_s9 = sld [smem:[#allocation29_spill]] }
  0xf1   : > { %2459 = vmatprep.mubr.msk.bf16.mxu0 %vm3092_vm0, %v3091_v0  ;;  %2467 = vmatprep.mubr.msk.bf16.mxu1 %vm3092_vm0, %v3091_v0  ;;  %v570_v5 = vld [vmem:[%s480_s28] sm:$0xff]  ;;  %v571_v6 = vld [vmem:[%s480_s28 + $0x8] sm:$0xff]  ;;  %vm835_vm2 = vcmask 64512   ;;  %s3093_s13 = smov 120   ;;  %s3094_s16 = smov 112   ;;  %vm1303_vm3 = vcmask 1043456  }
  0xf2   : > { %2456 = vmatpush3.bf16.msra.mxu0 %v2748_v1  ;;  %2464 = vmatpush3.bf16.msra.mxu1 %v2749_v2  ;;  %v573_v7 = vld [vmem:[%s489_s15] sm:$0xff]  ;;  %v572_v8 = vpack.c.bf16 %v571_v6, %v570_v5  ;;  %v574_v9 = vld [vmem:[%s489_s15 + $0x8] sm:$0xff]  ;;  %s3095_s3 = smov 104   ;;  %s3096_s4 = smov 8   ;;  %vm1695_vm10 = vcmask 130048   ;;  %vm1698_vm11 = vcmask 195584  }
  0xf3   : > { %2457 = vmatprep.subr.bf16.mxu0 %v3091_v0  ;;  %2465 = vmatprep.subr.bf16.mxu1 %v3091_v0  ;;  %v575_v10 = vpack.c.bf16 %v574_v9, %v573_v7  ;;  %v2753_v12 = vld [vmem:[#allocation10 + $0x8] sm:$0xff]   ;;  %v576_v13 = vld [vmem:[%s498_s14] sm:$0xff]  ;;  %s3895_s28 = sld [smem:[#allocation31_spill]]  ;;  %s3097_s15 = smov 16  }
  0xf4   : > { %v577_v14 = vld [vmem:[%s498_s14 + $0x8] sm:$0xff]  ;;  %v2336_v51 = vld [vmem:[#allocation11] ss:$0 sm:$0xff]  ;;  %s3098_s14 = smov 24   ;;  %s3896_s18 = sld [smem:[#allocation32_spill]] }
  0xf5   : > { %v578_v15 = vpack.c.bf16 %v577_v14, %v576_v13  ;;  %s3897_s19 = sld [smem:[#allocation24_spill]]  ;;  %s2395_s20 = sshll.u32 %s3187_s25, 8 }
  0xf6   : > { %2458 = vmatpush3.bf16.msra.mxu0 %v2750_v3  ;;  %2466 = vmatpush3.bf16.msra.mxu1 %v2751_v4  ;;  %v2328_v16 = vld [vmem:[%s3893_s24] ss:$0 sm:$0xff]  ;;  %s564_s6 = scalar_lea.vmem [#allocation14], %s3476_s30  ;;  %s2136_s25 = scalar_lea.sflag [#allocation4], %s3473_s11 }
  0xf7   : > { %2471 = vmatprep.subr.bf16.mxu0 %v3091_v0  ;;  %2479 = vmatprep.subr.bf16.mxu1 %v3091_v0  ;;  %v2332_v17 = vld [vmem:[%s3894_s9] ss:$0 sm:$0xff]  ;;  %s2149_s24 = sshll.u32 %s564_s6, 4  ;;  %s3898_s9 = sld [smem:[#allocation33_spill]]  ;;  %s3763_s24 = int_to_ptr.vmem [resolvable:$true] %s2149_s24 }
  0xf8   : > { %s3000_s30 = scalar_lea.vmem %s3763_s24, 256 }
  0xf9   : > { %2460 = vmatmul.mubr.msk.bf16.vlgmr.msra.gmra.mrb[0].mxu0 %vm602_vm1, %v572_v8  ;;  %2468 = vmatmul.mubr.msk.bf16.vlgmr.msra.gmra.mrb[0].mxu1 %vm602_vm1, %v575_v10  ;;  %p3001_p5 = scmp.ne.s32.totalorder %s3763_s24, %s3000_s30 }
  0xfa   : > { %2472 = vmatpush3.bf16.msra.mxu0 %v2752_v11  ;;  %2475 = vmatprep.mubr.msk.bf16.mxu0 %vm3092_vm0, %v3091_v0 }
  0xfb   : > { %2473 = vmatprep.subr.bf16.mxu0 %v3091_v0  ;;  %2481 = vmatprep.mubr.msk.bf16.mxu1 %vm3092_vm0, %v3091_v0  ;;  %p3899_p2 = scmp.ne.s32.totalorder %s3897_s19, 0 }
  0xfd   : > { %p3002_p4 = pnand %p3001_p5, %p3899_p2 }
  0xfe   : > { %2474 = vmatpush3.bf16.msra.mxu0 %v2753_v12 }
  0xff   : > { %2485 = vmatprep.subr.bf16.mxu0 %v3091_v0  ;;  %p3003_p11 = pneg %p3002_p4 }
 0x101   : > { %2476 = vmatmul.mubr.msk.bf16.vlgmr.msra.gmra.mrb[4].mxu0 %vm602_vm1, %v578_v15 }
 0x102   : > { %2487 = vmatprep.mubr.msk.bf16.mxu0 %vm3092_vm0, %v3091_v0 }
 0x1cc   : > { %v640_v18 = vpop.f32.mrb[0].mxu0  ;;  %v707_v20 = vpop.f32.mrb[0].mxu1 }
 0x1cd   : > { %v641_v19 = vadd.f32 %v2328_v16, %v640_v18  ;;  %v2461_v21 = vpop.f32.mrb[1].mxu0  ;;  %v708_v22 = vadd.f32 %v2332_v17, %v707_v20  ;;  %v2469_v23 = vpop.f32.mrb[1].mxu1 }
 0x1ce   : > { %v643_v24 = vpop.f32.mrb[2].mxu0  ;;  %v710_v26 = vpop.f32.mrb[2].mxu1 }
 0x1cf   : > { %v2389_v25 = vpack.c.bf16 %v641_v19, %v641_v19  ;;  %v644_v27 = vadd.f32 %v2328_v16, %v643_v24  ;;  %v2462_v28 = vpop.f32.mrb[3].mxu0  ;;  %v2391_v29 = vpack.c.bf16 %v708_v22, %v708_v22  ;;  %v711_v30 = vadd.f32 %v2332_v17, %v710_v26  ;;  %v2470_v31 = vpop.f32.mrb[3].mxu1 }
 0x1d1   : > { %v2390_v32 = vpack.c.bf16 %v644_v27, %v644_v27  ;;  %799 = vrot.lane.b32.xlu1 %v2389_v25, %s3093_s13  ;;  %v2392_v33 = vpack.c.bf16 %v711_v30, %v711_v30  ;;  %811 = vrot.lane.b32.xlu0 %v2391_v29, %s3093_s13  ;;  %v840_v34 = vsel %vm835_vm2, %v2391_v29, 0 }
 0x1d2   : > { %2480 = vmatpush3.bf16.xpose.msra.mxu1 %v840_v34 }
 0x1d3   : > { %v886_v35 = vsel %vm835_vm2, %v2392_v33, 0  ;;  %2491 = vmatprep.subr.bf16.mxu1 %v3091_v0 }
 0x1d4   : > { %2486 = vmatpush3.bf16.xpose.msra.mxu0 %v886_v35  ;;  %v774_v36 = vpop.f32.mrb[4].mxu0 }
 0x1d5   : > { %801 = vrot.lane.b32.xlu1 %v2390_v32, %s3093_s13  ;;  %813 = vrot.lane.b32.xlu0 %v2392_v33, %s3093_s13  ;;  %v2477_v37 = vpop.f32.mrb[5].mxu0  ;;  %v3572_v53 = vadd.f32 %v2336_v51, %v774_v36 }
 0x1d6   : > { %2497 = vmatprep.subr.bf16.mxu0 %v3091_v0  ;;  %v777_v38 = vpop.f32.mrb[6].mxu0 }
 0x1d7   : > { %v2478_v39 = vpop.f32.mrb[7].mxu0  ;;  %v3578_v57 = vadd.f32 %v2336_v51, %v777_v38  ;;  %v3583_v58 = vpack.c.bf16 %v3572_v53, %v3572_v53 }
 0x1d9   : > { %817 = vrot.lane.b32.xlu1 %v2392_v33, %s3094_s16  ;;  %815 = vrot.lane.b32.xlu0 %v2391_v29, %s3094_s16  ;;  %v1305_v60 = vsel %vm1303_vm3, %v3583_v58, 0  ;;  %v3594_v61 = vpack.c.bf16 %v3578_v57, %v3578_v57 }
 0x1da   : > { %2482 = vmatmul.mubr.msk.bf16.vlgmr.msra.gmra.mrb[4].mxu1 %vm835_vm2, %v2389_v25 }
 0x1db   : > { %2493 = vmatprep.mubr.msk.bf16.mxu1 %vm3092_vm0, %v3091_v0  ;;  %2488 = vmatmul.mubr.msk.bf16.vlgmr.msra.gmra.mrb[8].mxu0 %vm835_vm2, %v2390_v32  ;;  %v1351_v63 = vsel %vm1303_vm3, %v3594_v61, 0 }
 0x1dc   : > { %2499 = vmatprep.mubr.msk.bf16.mxu0 %vm3092_vm0, %v3091_v0 }
 0x1dd   : > { %805 = vrot.lane.b32.xlu1 %v2390_v32, %s3094_s16  ;;  %803 = vrot.lane.b32.xlu0 %v2389_v25, %s3094_s16 }
 0x1e1   : > { %821 = vrot.lane.b32.xlu1 %v2392_v33, %s3095_s3  ;;  %819 = vrot.lane.b32.xlu0 %v2391_v29, %s3095_s3 }
 0x1e5   : > { %809 = vrot.lane.b32.xlu1 %v2390_v32, %s3095_s3  ;;  %807 = vrot.lane.b32.xlu0 %v2389_v25, %s3095_s3 }
 0x243   : > { %v800_v40 = vpop.permute.xlu1 %799  ;;  %v812_v41 = vpop.permute.xlu0 %811 }
 0x244   : > { %v932_v42 = vsel %vm835_vm2, %v812_v41, 0 }
 0x245   : > { %2492 = vmatpush3.bf16.xpose.msra.mxu1 %v932_v42 }
 0x246   : > { %2503 = vmatprep.subr.bf16.mxu1 %v3091_v0 }
 0x247   : > { %v802_v43 = vpop.permute.xlu1 %801  ;;  %v814_v44 = vpop.permute.xlu0 %813 }
 0x248   : > { %v978_v45 = vsel %vm835_vm2, %v814_v44, 0 }
 0x249   : > { %2498 = vmatpush3.bf16.xpose.msra.mxu0 %v978_v45 }
 0x24a   : > { %2509 = vmatprep.subr.bf16.mxu0 %v3091_v0 }
 0x24b   : > { %v818_v46 = vpop.permute.xlu1 %817  ;;  %v816_v47 = vpop.permute.xlu0 %815 }
 0x24c   : > { %v1024_v48 = vsel %vm835_vm2, %v816_v47, 0  ;;  %2494 = vmatmul.mubr.msk.bf16.vlgmr.msra.gmra.mrb[8].mxu1 %vm835_vm2, %v800_v40  ;;  %v1070_v52 = vsel %vm835_vm2, %v818_v46, 0 }
 0x24d   : > { %2504 = vmatpush3.bf16.xpose.msra.mxu1 %v1024_v48  ;;  %2505 = vmatprep.mubr.msk.bf16.mxu1 %vm3092_vm0, %v3091_v0 }
 0x24e   : > { %2515 = vmatprep.subr.bf16.mxu1 %v3091_v0 }
 0x24f   : > { %v804_v49 = vpop.permute.xlu0 %803  ;;  %v806_v50 = vpop.permute.xlu1 %805 }
 0x250   : > { %2500 = vmatmul.mubr.msk.bf16.vlgmr.msra.gmra.mrb[12].mxu0 %vm835_vm2, %v802_v43 }
 0x251   : > { %2510 = vmatpush3.bf16.xpose.msra.mxu0 %v1070_v52  ;;  %2511 = vmatprep.mubr.msk.bf16.mxu0 %vm3092_vm0, %v3091_v0 }
 0x252   : > { %2521 = vmatprep.subr.bf16.mxu0 %v3091_v0 }
 0x253   : > { %v820_v54 = vpop.permute.xlu0 %819  ;;  %v822_v56 = vpop.permute.xlu1 %821 }
 0x254   : > { %v1116_v55 = vsel %vm835_vm2, %v820_v54, 0  ;;  %2506 = vmatmul.mubr.msk.bf16.vlgmr.msra.gmra.mrb[12].mxu1 %vm835_vm2, %v804_v49  ;;  %v1162_v59 = vsel %vm835_vm2, %v822_v56, 0 }
 0x255   : > { %2516 = vmatpush3.bf16.xpose.msra.mxu1 %v1116_v55  ;;  %2517 = vmatprep.mubr.msk.bf16.mxu1 %vm3092_vm0, %v3091_v0 }
 0x256   : > { %2527 = vmatprep.subr.bf16.mxu1 %v3091_v0 }
 0x257   : > { %v808_v62 = vpop.permute.xlu0 %807  ;;  %v810_v1 = vpop.permute.xlu1 %809 }
 0x258   : > { %2512 = vmatmul.mubr.msk.bf16.vlgmr.msra.gmra.mrb[16].mxu0 %vm835_vm2, %v806_v50 }
 0x259   : > { %2522 = vmatpush3.bf16.xpose.msra.mxu0 %v1162_v59  ;;  %2523 = vmatprep.mubr.msk.bf16.mxu0 %vm3092_vm0, %v3091_v0 }
 0x25a   : > { %2533 = vmatprep.subr.bf16.mxu0 %v3091_v0 }
 0x25c   : > { %2518 = vmatmul.mubr.msk.bf16.vlgmr.msra.gmra.mrb[16].mxu1 %vm835_vm2, %v808_v62 }
 0x25d   : > { %2528 = vmatpush3.bf16.msra.mxu1 %v1305_v60  ;;  %2529 = vmatprep.mubr.msk.bf16.mxu1 %vm3092_vm0, %v3091_v0 }
 0x25e   : > { %2539 = vmatprep.subr.bf16.mxu1 %v3091_v0 }
 0x260   : > { %2524 = vmatmul.mubr.msk.bf16.vlgmr.msra.gmra.mrb[20].mxu0 %vm835_vm2, %v810_v1 }
 0x261   : > { %2534 = vmatpush3.bf16.msra.mxu0 %v1351_v63  ;;  %2535 = vmatprep.mubr.msk.bf16.mxu0 %vm3092_vm0, %v3091_v0 }
 0x262   : > { %2545 = vmatprep.subr.bf16.mxu0 %v3091_v0 }
 0x2ad   : > { %v876_v2 = vpop.f32.mrb[4].mxu1 }
 0x2ae   : > { %v2483_v3 = vpop.f32.mrb[5].mxu1  ;;  %v1204_v4 = vsel %vm835_vm2, %v876_v2, -inf  ;;  %v922_v6 = vpop.f32.mrb[8].mxu0 }
 0x2af   : > { %1205 = vmax.xlane.f32.xlu0 %v1204_v4  ;;  %v879_v5 = vpop.f32.mrb[6].mxu1  ;;  %v2489_v8 = vpop.f32.mrb[9].mxu0  ;;  %v1207_v9 = vsel %vm835_vm2, %v922_v6, -inf }
 0x2b0   : > { %v2484_v7 = vpop.f32.mrb[7].mxu1  ;;  %1208 = vmax.xlane.f32.xlu1 %v1207_v9  ;;  %v925_v10 = vpop.f32.mrb[10].mxu0 }
 0x2b1   : > { %v2490_v11 = vpop.f32.mrb[11].mxu0 }
 0x31f   : > { %v968_v12 = vpop.f32.mrb[8].mxu1 }
 0x320   : > { %v2495_v13 = vpop.f32.mrb[9].mxu1  ;;  %v1210_v14 = vsel %vm835_vm2, %v968_v12, -inf }
 0x321   : > { %1211 = vmax.xlane.f32.xlu0 %v1210_v14  ;;  %v971_v15 = vpop.f32.mrb[10].mxu1 }
 0x322   : > { %v2496_v16 = vpop.f32.mrb[11].mxu1 }
 0x323   : > { %v1014_v17 = vpop.f32.mrb[12].mxu0 }
 0x324   : > { %v2501_v18 = vpop.f32.mrb[13].mxu0  ;;  %v1213_v19 = vsel %vm835_vm2, %v1014_v17, -inf }
 0x325   : > { %1214 = vmax.xlane.f32.xlu0 %v1213_v19  ;;  %v1017_v20 = vpop.f32.mrb[14].mxu0 }
 0x326   : > { %v2502_v21 = vpop.f32.mrb[15].mxu0 }
 0x327   : > { %v3610_v22 = vpop.f32.mrb[12].mxu1 }
 0x328   : > { %v2507_v23 = vpop.f32.mrb[13].mxu1  ;;  %v1216_v24 = vsel %vm835_vm2, %v3610_v22, -inf }
 0x329   : > { %v1063_v25 = vpop.f32.mrb[14].mxu1  ;;  %1217 = vmax.xlane.f32.xlu1 %v1216_v24 }
 0x32a   : > { %v2508_v26 = vpop.f32.mrb[15].mxu1 }
 0x32b   : > { %v1106_v27 = vpop.f32.mrb[16].mxu0 }
 0x32c   : > { %v2513_v28 = vpop.f32.mrb[17].mxu0  ;;  %v1219_v29 = vsel %vm835_vm2, %v1106_v27, -inf }
 0x32d   : > { %1220 = vmax.xlane.f32.xlu0 %v1219_v29  ;;  %v1109_v30 = vpop.f32.mrb[18].mxu0 }
 0x32e   : > { %v2514_v31 = vpop.f32.mrb[19].mxu0 }
 0x32f   : > { %v1152_v32 = vpop.f32.mrb[16].mxu1 }
 0x330   : > { %v2519_v33 = vpop.f32.mrb[17].mxu1  ;;  %v1222_v34 = vsel %vm835_vm2, %v1152_v32, -inf }
 0x331   : > { %v1155_v35 = vpop.f32.mrb[18].mxu1  ;;  %1223 = vmax.xlane.f32.xlu1 %v1222_v34 }
 0x332   : > { %v2520_v36 = vpop.f32.mrb[19].mxu1 }
 0x333   : > { %v1198_v37 = vpop.f32.mrb[20].mxu0 }
 0x334   : > { %v2525_v38 = vpop.f32.mrb[21].mxu0  ;;  %v1225_v39 = vsel %vm835_vm2, %v1198_v37, -inf }
 0x335   : > { %1226 = vmax.xlane.f32.xlu0 %v1225_v39  ;;  %v1201_v40 = vpop.f32.mrb[22].mxu0 }
 0x336   : > { %v2526_v41 = vpop.f32.mrb[23].mxu0 }
 0x33c   : > { %v1206_v46 = vpop.xlane.xlu0 %1205 }
 0x33d   : > { %v1209_v42 = vpop.xlane.xlu1 %1208  ;;  %v1228_v48 = vsub.f32 %v876_v2, %v1206_v46 }
 0x33e   : > { %v1229_v43 = vsub.f32 %v922_v6, %v1209_v42 }
 0x33f   : > { %v1236_v49 = vmul.f32 1.442695, %v1228_v48 }
 0x340   : > { %v1238_v44 = vmul.f32 1.442695, %v1229_v43 }
 0x342   : > { %2766 = vpow2.f32 %v1238_v44  ;;  %823 = vrot.lane.b32.xlu1 %v3583_v58, %s3093_s13 }
 0x343   : > { %2768 = vpow2.f32 %v1236_v49 }
 0x34c   : > { %v2767_v45 = vpop.eup %2766 }
 0x34d   : > { %v1255_v47 = vsel %vm835_vm2, %v2767_v45, 0.0  ;;  %v2769_v50 = vpop.eup %2768 }
 0x34e   : > { %1256 = vadd.xlane.f32.xlu0 %v1255_v47  ;;  %v1252_v51 = vsel %vm835_vm2, %v2769_v50, 0.0 }
 0x366   : > { %1253 = vadd.xlane.f32.xlu1 %v1252_v51 }
 0x3ae   : > { %v1212_v52 = vpop.xlane.xlu0 %1211 }
 0x3af   : > { %v1230_v54 = vsub.f32 %v968_v12, %v1212_v52  ;;  %v1706_v52 = vlaneseq }
 0x3b1   : > { %v1240_v55 = vmul.f32 1.442695, %v1230_v54 }
 0x3b2   : > { %v1215_v56 = vpop.xlane.xlu0 %1214 }
 0x3b3   : > { %2770 = vpow2.f32 %v1240_v55  ;;  %v1231_v59 = vsub.f32 %v1014_v17, %v1215_v56 }
 0x3b5   : > { %v1242_v60 = vmul.f32 1.442695, %v1231_v59 }
 0x3b6   : > { %v1218_v6 = vpop.xlane.xlu1 %1217 }
 0x3b7   : > { %2772 = vpow2.f32 %v1242_v60  ;;  %v1232_v7 = vsub.f32 %v3610_v22, %v1218_v6  ;;  %v1708_v6 = vrot.slane %v3572_v53, 6 }
 0x3b9   : > { %v1244_v10 = vmul.f32 1.442695, %v1232_v7  ;;  %v1709_v7 = vrot.slane %v3578_v57, 6 }
 0x3ba   : > { %v1221_v3 = vpop.xlane.xlu0 %1220 }
 0x3bb   : > { %v1233_v8 = vsub.f32 %v1106_v27, %v1221_v3 }
 0x3bd   : > { %v3621_v62 = vpop.eup %2770  ;;  %v1246_v13 = vmul.f32 1.442695, %v1233_v8 }
 0x3be   : > { %v1258_v63 = vsel %vm835_vm2, %v3621_v62, 0.0  ;;  %v1224_v9 = vpop.xlane.xlu1 %1223 }
 0x3bf   : > { %1259 = vadd.xlane.f32.xlu1 %v1258_v63  ;;  %v1234_v11 = vsub.f32 %v1152_v32, %v1224_v9  ;;  %v2754_v9 = vld [vmem:[#allocation13] sm:$0xff]  }
 0x3c1   : > { %v3625_v1 = vpop.eup %2772  ;;  %v1248_v16 = vmul.f32 1.442695, %v1234_v11 }
 0x3c2   : > { %v1261_v2 = vsel %vm835_vm2, %v3625_v1, 0.0  ;;  %v1227_v4 = vpop.xlane.xlu0 %1226  ;;  %v824_v19 = vpop.permute.xlu1 %823 }
 0x3c3   : > { %1262 = vadd.xlane.f32.xlu0 %v1261_v2  ;;  %v1235_v14 = vsub.f32 %v1198_v37, %v1227_v4  ;;  %v1397_v32 = vsel %vm1303_vm3, %v824_v19, 0  ;;  %v3674_v2 = vshrl.u32 %v1706_v52, 7 }
 0x3c5   : > { %v1250_v18 = vmul.f32 1.442695, %v1235_v14  ;;  %v1713_v8 = vadd.s32 4294967294, %v3674_v2  ;;  %vm1710_vm4 = vcmp.lt.s32.totalorder %v3674_v2, 2  ;;  %v2755_v14 = vld [vmem:[#allocation13 + $0x8] sm:$0xff]   ;;  %v1841_v19 = vadd.s32 4294967295, %v3674_v2 }
 0x3c6   : > { %vm1838_vm6 = vcmp.lt.s32.totalorder %v3674_v2, 1  ;;  %vm1976_vm8 = vcmp.lt.s32.totalorder %v3674_v2, 7  ;;  %vm2051_vm12 = vcmp.lt.s32.totalorder %v3674_v2, 6 }
 0x3c7   : > { %vm1714_vm5 = vcmp.ge.s32.totalorder %v1713_v8, 0  ;;  %vm1842_vm7 = vcmp.ge.s32.totalorder %v1841_v19, 0 }
 0x3d0   : > { %827 = vrot.lane.b32.xlu1 %v3583_v58, %s3094_s16 }
 0x3d4   : > { %829 = vrot.lane.b32.xlu1 %v3594_v61, %s3094_s16  ;;  %s3099_s16 = smov [#allocation14]  }
 0x3d9   : > { %825 = vrot.lane.b32.xlu0 %v3594_v61, %s3093_s13  ;;  %s3760_s13 = scalar_lea.hbm %s3898_s9, %s2395_s20 }
 0x3db   : > { %v1257_v5 = vpop.xlane.xlu0 %1256 }
 0x3dc   : > { %2774 = vrcp.f32 %v1257_v5 }
 0x3dd   : > { %2776 = vpow2.f32 %v1244_v10 }
 0x3de   : > { %2778 = vpow2.f32 %v1246_v13  ;;  %v1712_v13 = vsel %vm1710_vm4, %v1709_v7, %v1708_v6 }
 0x3df   : > { %2780 = vpow2.f32 %v1248_v16 }
 0x3e0   : > { %2782 = vpow2.f32 %v1250_v18  ;;  %v1837_v18 = vrot.slane %v3578_v57, 7 }
 0x3e6   : > { %v2775_v12 = vpop.eup %2774 }
 0x3e7   : > { %v1285_v15 = vmul.f32 %v2775_v12, %v2767_v45  ;;  %v2777_v20 = vpop.eup %2776  ;;  %v1711_v12 = vsel %vm1710_vm4, %v1708_v6, %v1709_v7 }
 0x3e8   : > { %v2779_v22 = vpop.eup %2778  ;;  %v1264_v24 = vsel %vm835_vm2, %v2777_v20, 0.0  ;;  %v1718_v16 = vsel %vm1714_vm5, %v1711_v12, 0.0 }
 0x3e9   : > { %v1293_v17 = vpack.c.bf16 %v1285_v15, %v1285_v15  ;;  %v3639_v23 = vpop.eup %2780  ;;  %v1267_v25 = vsel %vm835_vm2, %v2779_v22, 0.0  ;;  %v1717_v15 = vsel %vm1714_vm5, %v1712_v13, 0.0 }
 0x3ea   : > { %v3643_v26 = vpop.eup %2782  ;;  %v1270_v27 = vsel %vm835_vm2, %v3639_v23, 0.0 }
 0x3eb   : > { %2536 = vmatmul.mubr.msk.bf16.vlgmr.msra.gmra.mrb[24].mxu0 %vm835_vm2, %v1293_v17  ;;  %v1273_v28 = vsel %vm835_vm2, %v3643_v26, 0.0  ;;  %v1836_v17 = vrot.slane %v3572_v53, 7 }
 0x3ec   : > { %2547 = vmatprep.mubr.msk.bf16.mxu0 %vm3092_vm0, %v3091_v0 }
 0x3f3   : > { %v1254_v21 = vpop.xlane.xlu1 %1253 }
 0x3f4   : > { %2784 = vrcp.f32 %v1254_v21  ;;  %v1719_v21 = vpack.c.bf16 %v1718_v16, %v1717_v15 }
 0x3f8   : > { %1265 = vadd.xlane.f32.xlu1 %v1264_v24  ;;  %1268 = vadd.xlane.f32.xlu0 %v1267_v25  ;;  %v2757_v24 = vld [vmem:[#allocation13 + $0x18] sm:$0xff]  }
 0x3fc   : > { %1271 = vadd.xlane.f32.xlu1 %v1270_v27  ;;  %1274 = vadd.xlane.f32.xlu0 %v1273_v28  ;;  %v1974_v27 = vrot.slane %v3572_v53, 1  ;;  %v1975_v28 = vrot.slane %v3578_v57, 1 }
 0x3fe   : > { %v2785_v29 = vpop.eup %2784 }
 0x3ff   : > { %v1284_v30 = vmul.f32 %v2785_v29, %v2769_v50  ;;  %v1979_v29 = vadd.s32 1, %v3674_v2 }
 0x401   : > { %v1292_v31 = vpack.c.bf16 %v1284_v30, %v1284_v30  ;;  %v2758_v30 = vld [vmem:[#allocation13 + $0x30] sm:$0xff]   ;;  %vm1981_vm9 = vcmp.lt.s32.totalorder %v1979_v29, 8 }
 0x403   : > { %2530 = vmatmul.mubr.msk.bf16.vlgmr.msra.gmra.mrb[20].mxu1 %vm835_vm2, %v1292_v31 }
 0x404   : > { %2540 = vmatpush3.bf16.msra.mxu1 %v1397_v32  ;;  %2541 = vmatprep.mubr.msk.bf16.mxu1 %vm3092_vm0, %v3091_v0  ;;  %v1977_v32 = vsel %vm1976_vm8, %v1974_v27, %v1975_v28 }
 0x405   : > { %2551 = vmatprep.subr.bf16.mxu1 %v3091_v0 }
 0x40d   : > { %833 = vrot.lane.b32.xlu1 %v3594_v61, %s3095_s3 }
 0x412   : > { %831 = vrot.lane.b32.xlu0 %v3583_v58, %s3095_s3  ;;  %s3004_s3 = sshll.u32 %s3099_s16, 4  ;;  %s3005_s3 = int_to_ptr.vmem [resolvable:$false] %s3004_s3 }
 0x413   : > { %s3006_s21 = scalar_lea.vmem %s3005_s3, 512  ;;  %p3007_p13 = scmp.lt.s32.totalorder %s3763_s24, %s3005_s3 }
 0x414   : > { %p3008_p7 = scmp.lt.s32.totalorder %s3006_s21, %s3000_s30 }
 0x416   : > { %p3009_p9 = por %p3008_p7, %p3007_p13 }
 0x418   : > { %p3010_p12 = pnand %p3009_p9, %p3003_p11 }
 0x44c   : > { %v1260_v33 = vpop.xlane.xlu1 %1259 }
 0x44d   : > { %2786 = vrcp.f32 %v1260_v33  ;;  %v1978_v33 = vsel %vm1976_vm8, %v1975_v28, %v1974_v27 }
 0x450   : > { %v1263_v34 = vpop.xlane.xlu0 %1262  ;;  %v828_v38 = vpop.permute.xlu1 %827 }
 0x451   : > { %2788 = vrcp.f32 %v1263_v34  ;;  %v1489_v61 = vsel %vm1303_vm3, %v828_v38, 0  ;;  %v2759_v34 = vld [vmem:[#allocation13 + $0x38] sm:$0xff]  }
 0x454   : > { %v826_v35 = vpop.permute.xlu0 %825  ;;  %v830_v42 = vpop.permute.xlu1 %829 }
 0x455   : > { %v1443_v36 = vsel %vm1303_vm3, %v826_v35, 0  ;;  %v1535_v44 = vsel %vm1303_vm3, %v830_v42, 0  ;;  %v1983_v35 = vsel %vm1981_vm9, %v1977_v32, 0.0 }
 0x456   : > { %2546 = vmatpush3.bf16.msra.mxu0 %v1443_v36  ;;  %v1984_v36 = vsel %vm1981_vm9, %v1978_v33, 0.0 }
 0x457   : > { %v2787_v37 = vpop.eup %2786  ;;  %2557 = vmatprep.subr.bf16.mxu0 %v3091_v0 }
 0x458   : > { %v1286_v39 = vmul.f32 %v2787_v37, %v3621_v62  ;;  %v1985_v37 = vpack.c.bf16 %v1984_v36, %v1983_v35 }
 0x45a   : > { %v1294_v40 = vpack.c.bf16 %v1286_v39, %v1286_v39 }
 0x45b   : > { %v2789_v41 = vpop.eup %2788 }
 0x45c   : > { %v1287_v58 = vmul.f32 %v2789_v41, %v3625_v1  ;;  %2542 = vmatmul.mubr.msk.bf16.vlgmr.msra.gmra.mrb[24].mxu1 %vm835_vm2, %v1294_v40 }
 0x45d   : > { %2552 = vmatpush3.bf16.msra.mxu1 %v1489_v61  ;;  %2553 = vmatprep.mubr.msk.bf16.mxu1 %vm3092_vm0, %v3091_v0 }
 0x45e   : > { %v1295_v43 = vpack.c.bf16 %v1287_v58, %v1287_v58  ;;  %2563 = vmatprep.subr.bf16.mxu1 %v3091_v0 }
 0x460   : > { %2548 = vmatmul.mubr.msk.bf16.vlgmr.msra.gmra.mrb[28].mxu0 %vm835_vm2, %v1295_v43 }
 0x461   : > { %2558 = vmatpush3.bf16.msra.mxu0 %v1535_v44  ;;  %2559 = vmatprep.mubr.msk.bf16.mxu0 %vm3092_vm0, %v3091_v0 }
 0x462   : > { %2569 = vmatprep.subr.bf16.mxu0 %v3091_v0 }
 0x485   : > { %v1266_v45 = vpop.xlane.xlu1 %1265  ;;  %v1269_v46 = vpop.xlane.xlu0 %1268 }
 0x486   : > { %2790 = vrcp.f32 %v1266_v45 }
 0x487   : > { %2792 = vrcp.f32 %v1269_v46 }
 0x489   : > { %v1272_v47 = vpop.xlane.xlu1 %1271  ;;  %v1275_v48 = vpop.xlane.xlu0 %1274 }
 0x48a   : > { %2794 = vrcp.f32 %v1272_v47 }
 0x48b   : > { %2796 = vrcp.f32 %v1275_v48 }
 0x48d   : > { %v832_v55 = vpop.permute.xlu0 %831  ;;  %v834_v56 = vpop.permute.xlu1 %833 }
 0x48e   : > { %v1581_v1 = vsel %vm1303_vm3, %v832_v55, 0  ;;  %v1627_v3 = vsel %vm1303_vm3, %v834_v56, 0  ;;  %v2761_v56 = vld [vmem:[%s3895_s28 + $0x8] sm:$0xff]  }
 0x490   : > { %v2791_v49 = vpop.eup %2790 }
 0x491   : > { %v2793_v50 = vpop.eup %2792  ;;  %v1288_v51 = vmul.f32 %v2791_v49, %v2777_v20  ;;  %v2756_v20 = vld [vmem:[#allocation13 + $0x10] sm:$0xff]  }
 0x492   : > { %v1289_v54 = vmul.f32 %v2793_v50, %v2779_v22  ;;  %v1839_v22 = vsel %vm1838_vm6, %v1836_v17, %v1837_v18 }
 0x493   : > { %v1296_v59 = vpack.c.bf16 %v1288_v51, %v1288_v51 }
 0x494   : > { %v2795_v60 = vpop.eup %2794  ;;  %v1297_v62 = vpack.c.bf16 %v1289_v54, %v1289_v54  ;;  %v2760_v54 = vld [vmem:[%s3895_s28] sm:$0xff]  }
 0x495   : > { %v2797_v63 = vpop.eup %2796  ;;  %2554 = vmatmul.mubr.msk.bf16.vlgmr.msra.gmra.mrb[28].mxu1 %vm835_vm2, %v1296_v59  ;;  %v1290_v4 = vmul.f32 %v2795_v60, %v3639_v23  ;;  %v1840_v23 = vsel %vm1838_vm6, %v1837_v18, %v1836_v17 }
 0x496   : > { %2560 = vmatmul.mubr.msk.bf16.vlgmr.msra.gmra.mrb[32].mxu0 %vm835_vm2, %v1297_v62  ;;  %2564 = vmatpush3.bf16.msra.mxu1 %v1581_v1  ;;  %v1291_v5 = vmul.f32 %v2797_v63, %v3643_v26  ;;  %v1845_v25 = vsel %vm1842_vm7, %v1840_v23, 0.0  ;;  %v1846_v26 = vsel %vm1842_vm7, %v1839_v22, 0.0 }
 0x497   : > { %2570 = vmatpush3.bf16.msra.mxu0 %v1627_v3  ;;  %2565 = vmatprep.mubr.msk.bf16.mxu1 %vm3092_vm0, %v3091_v0  ;;  %v1298_v10 = vpack.c.bf16 %v1290_v4, %v1290_v4  ;;  %v1847_v31 = vpack.c.bf16 %v1846_v26, %v1845_v25 }
 0x498   : > { %2571 = vmatprep.mubr.msk.bf16.mxu0 %vm3092_vm0, %v3091_v0  ;;  %2575 = vmatprep.subr.bf16.mxu1 %v3091_v0  ;;  %v1299_v11 = vpack.c.bf16 %v1291_v5, %v1291_v5 }
 0x499   : > { %2583 = vmatprep.subr.bf16.mxu0 %v3091_v0 }
 0x49d   : > { %2566 = vmatmul.mubr.msk.bf16.vlgmr.msra.gmra.mrb[32].mxu1 %vm835_vm2, %v1298_v10 }
 0x49e   : > { %2572 = vmatmul.mubr.msk.bf16.vlgmr.msra.gmra.mrb[36].mxu0 %vm835_vm2, %v1299_v11  ;;  %2576 = vmatpush3.bf16.msra.mxu1 %v2754_v9 }
 0x49f   : > { %2577 = vmatprep.subr.bf16.mxu1 %v3091_v0  ;;  %2579 = vmatprep.mubr.msk.bf16.mxu1 %vm3092_vm0, %v3091_v0 }
 0x4a0   : > { %2587 = vmatprep.mubr.msk.bf16.mxu0 %vm3092_vm0, %v3091_v0  ;;  %2584 = vmatpush3.bf16.msra.mxu0 %v2760_v54 }
 0x4a1   : > { %2585 = vmatprep.subr.bf16.mxu0 %v3091_v0 }
 0x4a2   : > { %2578 = vmatpush3.bf16.msra.mxu1 %v2755_v14 }
 0x4a3   : > { %2591 = vmatprep.subr.bf16.mxu1 %v3091_v0 }
 0x4a4   : > { %2586 = vmatpush3.bf16.msra.mxu0 %v2761_v56 }
 0x4a5   : > { %2580 = vmatmul.mubr.msk.bf16.vlgmr.msra.gmra.mrb[36].mxu1 %vm602_vm1, %v1719_v21  ;;  %2599 = vmatprep.subr.bf16.mxu0 %v3091_v0 }
 0x4a6   : > { %2592 = vmatpush3.bf16.msra.mxu1 %v2756_v20  ;;  %2595 = vmatprep.mubr.msk.bf16.mxu1 %vm3092_vm0, %v3091_v0 }
 0x4a7   : > { %2593 = vmatprep.subr.bf16.mxu1 %v3091_v0 }
 0x4aa   : > { %2594 = vmatpush3.bf16.msra.mxu1 %v2757_v24 }
 0x4ab   : > { %2607 = vmatprep.subr.bf16.mxu1 %v3091_v0 }
 0x4ad   : > { %2596 = vmatmul.mubr.msk.bf16.vlgmr.msra.gmra.mrb[40].mxu1 %vm602_vm1, %v1847_v31 }
 0x4ae   : > { %2608 = vmatpush3.bf16.msra.mxu1 %v2758_v30  ;;  %2611 = vmatprep.mubr.msk.bf16.mxu1 %vm3092_vm0, %v3091_v0 }
 0x4af   : > { %2609 = vmatprep.subr.bf16.mxu1 %v3091_v0 }
 0x4b2   : > { %2610 = vmatpush3.bf16.msra.mxu1 %v2759_v34 }
 0x4b5   : > { %2612 = vmatmul.mubr.msk.bf16.vlgmr.msra.gmra.mrb[44].mxu1 %vm602_vm1, %v1985_v37 }
 0x4be   : > { %v3716_v38 = vpop.f32.mrb[24].mxu0 }
 0x4bf   : > { %v2537_v39 = vpop.f32.mrb[25].mxu0 }
 0x4c0   : > { %v1390_v40 = vpop.f32.mrb[26].mxu0 }
 0x4c1   : > { %v2538_v41 = vpop.f32.mrb[27].mxu0 }
 0x4d6   : > { %v3718_v61 = vpop.f32.mrb[20].mxu1 }
 0x4d7   : > { %v2531_v58 = vpop.f32.mrb[21].mxu1 }
 0x4d8   : > { %v1344_v42 = vpop.f32.mrb[22].mxu1 }
 0x4d9   : > { %v2532_v43 = vpop.f32.mrb[23].mxu1  ;;  %v2762_v42 = vld [vmem:[#allocation13 + $0x20] sm:$0xff]  }
 0x52f   : > { %v1433_v44 = vpop.f32.mrb[24].mxu1 }
 0x530   : > { %v2543_v45 = vpop.f32.mrb[25].mxu1 }
 0x531   : > { %v1436_v46 = vpop.f32.mrb[26].mxu1  ;;  %v2054_v45 = vadd.s32 2, %v3674_v2 }
 0x532   : > { %v2544_v47 = vpop.f32.mrb[27].mxu1  ;;  %v2764_v46 = vld [vmem:[#allocation13 + $0x40] sm:$0xff]  }
 0x533   : > { %v1479_v48 = vpop.f32.mrb[28].mxu0  ;;  %v793_v47 = vpack.c.bf16 %v3578_v57, %v3572_v53  ;;  %vm2056_vm13 = vcmp.lt.s32.totalorder %v2054_v45, 8 }
 0x534   : > { %v2733_v49 = vpack.i.bf16 %v1479_v48, %v1433_v44  ;;  %v2549_v50 = vpop.f32.mrb[29].mxu0  ;;  %v2763_v44 = vld [vmem:[#allocation13 + $0x28] sm:$0xff]  }
 0x535   : > { %v1482_v51 = vpop.f32.mrb[30].mxu0  ;;  %v2765_v50 = vld [vmem:[#allocation13 + $0x48] sm:$0xff]  }
 0x536   : > { %2734 = vrot.lane.b32.xlu0 %v2733_v49, %s3096_s4  ;;  %v2550_v52 = vpop.f32.mrb[31].mxu0 }
 0x568   : > { %v1525_v55 = vpop.f32.mrb[28].mxu1 }
 0x569   : > { %v1571_v59 = vpop.f32.mrb[32].mxu0  ;;  %v2555_v60 = vpop.f32.mrb[29].mxu1 }
 0x56a   : > { %v2738_v62 = vpack.i.bf16 %v1571_v59, %v1525_v55  ;;  %v2561_v63 = vpop.f32.mrb[33].mxu0  ;;  %v1528_v1 = vpop.f32.mrb[30].mxu1 }
 0x56b   : > { %v1574_v3 = vpop.f32.mrb[34].mxu0  ;;  %v2556_v4 = vpop.f32.mrb[31].mxu1 }
 0x56c   : > { %2739 = vrot.lane.b32.xlu1 %v2738_v62, %s3097_s15  ;;  %v2562_v5 = vpop.f32.mrb[35].mxu0 }
 0x570   : > { %v1617_v6 = vpop.f32.mrb[32].mxu1 }
 0x571   : > { %v1663_v7 = vpop.f32.mrb[36].mxu0  ;;  %v2567_v8 = vpop.f32.mrb[33].mxu1 }
 0x572   : > { %v2743_v9 = vpack.i.bf16 %v1663_v7, %v1617_v6  ;;  %v2573_v10 = vpop.f32.mrb[37].mxu0  ;;  %v1620_v11 = vpop.f32.mrb[34].mxu1 }
 0x573   : > { %v1666_v12 = vpop.f32.mrb[38].mxu0  ;;  %v2568_v13 = vpop.f32.mrb[35].mxu1 }
 0x574   : > { %2744 = vrot.lane.b32.xlu0 %v2743_v9, %s3098_s14  ;;  %v2574_v14 = vpop.f32.mrb[39].mxu0  ;;  %v2380_v9 = vld [vmem:[%s3896_s18] ss:$0 sm:$0xff] }
 0x578   : > { %v1773_v15 = vpop.f32.mrb[36].mxu1 }
 0x579   : > { %v2581_v16 = vpop.f32.mrb[37].mxu1 }
 0x57a   : > { %v1776_v17 = vpop.f32.mrb[38].mxu1 }
 0x57b   : > { %v2582_v18 = vpop.f32.mrb[39].mxu1 }
 0x580   : > { %v1902_v19 = vpop.f32.mrb[40].mxu1 }
 0x581   : > { %v2597_v20 = vpop.f32.mrb[41].mxu1 }
 0x582   : > { %v1905_v21 = vpop.f32.mrb[42].mxu1 }
 0x583   : > { %v2598_v22 = vpop.f32.mrb[43].mxu1 }
 0x588   : > { %v3729_v23 = vpop.f32.mrb[44].mxu1 }
 0x589   : > { %v2613_v24 = vpop.f32.mrb[45].mxu1 }
 0x58a   : > { %v2043_v25 = vpop.f32.mrb[46].mxu1 }
 0x58b   : > { %v2614_v26 = vpop.f32.mrb[47].mxu1 }
 0x5a8   : > { %v2735_v27 = vpop.permute.xlu0 %2734 }
 0x5a9   : > { %v2737_v29 = vunpack.i.h.bf16 %v2735_v27  ;;  %v2736_v30 = vunpack.i.l.bf16 %v2735_v27 }
 0x5ab   : > { %v1694_v34 = vsel %vm835_vm2, %v3716_v38, %v2737_v29  ;;  %v1693_v35 = vsel %vm835_vm2, %v3718_v61, %v2736_v30  ;;  %v2049_v38 = vrot.slane %v3572_v53, 2  ;;  %v2050_v61 = vrot.slane %v3578_v57, 2 }
 0x5ad   : > { %v2052_v48 = vsel %vm2051_vm12, %v2049_v38, %v2050_v61  ;;  %v2053_v49 = vsel %vm2051_vm12, %v2050_v61, %v2049_v38 }
 0x5ae   : > { %v2058_v51 = vsel %vm2056_vm13, %v2052_v48, 0.0  ;;  %v2059_v52 = vsel %vm2056_vm13, %v2053_v49, 0.0 }
 0x5af   : > { %v2060_v2 = vpack.c.bf16 %v2059_v52, %v2058_v51 }
 0x5de   : > { %v2740_v28 = vpop.permute.xlu1 %2739 }
 0x5df   : > { %v2742_v31 = vunpack.i.h.bf16 %v2740_v28  ;;  %v2741_v32 = vunpack.i.l.bf16 %v2740_v28 }
 0x5e1   : > { %v1697_v39 = vsel %vm1695_vm10, %v1694_v34, %v2742_v31  ;;  %v1696_v40 = vsel %vm1695_vm10, %v1693_v35, %v2741_v32 }
 0x5e6   : > { %v2745_v33 = vpop.permute.xlu0 %2744 }
 0x5e7   : > { %v2747_v36 = vunpack.i.h.bf16 %v2745_v33  ;;  %v2746_v37 = vunpack.i.l.bf16 %v2745_v33 }
 0x5e9   : > { %v1700_v41 = vsel %vm1698_vm11, %v1697_v39, %v2747_v36  ;;  %v1699_v58 = vsel %vm1698_vm11, %v1696_v40, %v2746_v37 }
 0x5ea   : > { %v1701_v43 = vpack.c.bf16 %v1700_v41, %v1699_v58 }
 0x5ec   : > { %2588 = vmatmul.mubr.msk.bf16.vlgmr.msra.gmra.mrb[40].mxu0 %vm602_vm1, %v1701_v43 }
 0x5ed   : > { %2600 = vmatpush3.bf16.msra.mxu0 %v2762_v42  ;;  %2603 = vmatprep.mubr.msk.bf16.mxu0 %vm3092_vm0, %v3091_v0 }
 0x5ee   : > { %2601 = vmatprep.subr.bf16.mxu0 %v3091_v0 }
 0x5f1   : > { %2602 = vmatpush3.bf16.msra.mxu0 %v2763_v44 }
 0x5f2   : > { %2615 = vmatprep.subr.bf16.mxu0 %v3091_v0 }
 0x5f4   : > { %2604 = vmatmul.mubr.msk.bf16.vlgmr.msra.gmra.mrb[44].mxu0 %vm602_vm1, %v793_v47 }
 0x5f5   : > { %2616 = vmatpush3.bf16.msra.mxu0 %v2764_v46  ;;  %2619 = vmatprep.mubr.msk.bf16.mxu0 %vm3092_vm0, %v3091_v0 }
 0x5f6   : > { %2617 = vmatprep.subr.bf16.mxu0 %v3091_v0 }
 0x5f9   : > { %2618 = vmatpush3.bf16.msra.mxu0 %v2765_v50 }
 0x5fc   : > { %2620 = vmatmul.mubr.msk.bf16.vlgmr.msra.gmra.mrb[48].mxu0 %vm602_vm1, %v2060_v2 }
 0x6bf   : > { %v1829_v53 = vpop.f32.mrb[40].mxu0 }
 0x6c0   : > { %v1830_v57 = vadd.f32 %v1829_v53, %v1773_v15  ;;  %v2589_v54 = vpop.f32.mrb[41].mxu0 }
 0x6c1   : > { %v1832_v55 = vpop.f32.mrb[42].mxu0 }
 0x6c2   : > { %v1833_v56 = vadd.f32 %v1832_v55, %v1776_v17  ;;  %v2590_v59 = vpop.f32.mrb[43].mxu0  ;;  %v1909_v60 = vadd.f32 %v1902_v19, %v1830_v57 }
 0x6c4   : > { %v1910_v62 = vadd.f32 %v1905_v21, %v1833_v56 }
 0x6c7   : > { %v1965_v63 = vpop.f32.mrb[44].mxu0 }
 0x6c8   : > { %v1972_v1 = vadd.f32 %v1965_v63, %v1909_v60  ;;  %v2605_v3 = vpop.f32.mrb[45].mxu0 }
 0x6c9   : > { %v1968_v0 = vpop.f32.mrb[46].mxu0 }
 0x6ca   : > { %v1973_v4 = vadd.f32 %v1968_v0, %v1910_v62  ;;  %v2606_v5 = vpop.f32.mrb[47].mxu0  ;;  %v2047_v6 = vadd.f32 %v3729_v23, %v1972_v1 }
 0x6cc   : > { %v2048_v7 = vadd.f32 %v2043_v25, %v1973_v4 }
 0x6cf   : > { %v2115_v8 = vpop.f32.mrb[48].mxu0 }
 0x6d0   : > { %v2122_v10 = vadd.f32 %v2115_v8, %v2047_v6  ;;  %v2621_v11 = vpop.f32.mrb[49].mxu0 }
 0x6d1   : > { %v2118_v12 = vpop.f32.mrb[50].mxu0 }
 0x6d2   : > { %v2131_v13 = vadd.f32 %v2380_v9, %v2122_v10  ;;  %v2123_v14 = vadd.f32 %v2118_v12, %v2048_v7  ;;  %v2622_v15 = vpop.f32.mrb[51].mxu0 }
 0x6d4   : > { %2133 = vst.msk [vmem:[%s564_s6] sm:$0xff] %vm602_vm1, %v2131_v13  ;;  %v2132_v16 = vadd.f32 %v2380_v9, %v2123_v14 }
 0x6d6   : > { %2134 = vst.msk [vmem:[%s564_s6 + $0x8] sm:$0xff] %vm602_vm1, %v2132_v16 }
 0x6d7   : > { %3013 = shalt.err (!%p3010_p12)
}
 0x6d8   : > { %s3014_s12 = scalar_lea.hbm %s3760_s13, 256  ;;  %s3018_s15 = scalar_lea.hbm %s3898_s9, 512 }
 0x6d9   : > { %p3015_p8 = scmp.ne.s32.totalorder %s3760_s13, %s3014_s12  ;;  %p3019_p1 = scmp.lt.u32.totalorder %s3760_s13, %s3898_s9 }
 0x6da   : > { %p3020_p6 = scmp.lt.u32.totalorder %s3018_s15, %s3014_s12  ;;  %p3022_p5 = scmp.lt.u32.totalorder %s3014_s12, %s3760_s13 }
 0x6db   : > { %p3016_p10 = pnand %p3015_p8, %p3899_p2 }
 0x6dc   : > { %p3021_p3 = por %p3020_p6, %p3019_p1 }
 0x6dd   : > { %p3017_p0 = pneg %p3016_p10 }
 0x6de   : > { %p3023_p4 = por %p3022_p5, %p3021_p3 }
 0x6e0   : > { %p3024_p11 = pnand %p3023_p4, %p3017_p0 }
 0x6e2   : > { %3027 = shalt.err (!%p3024_p11)
}
 0x6e3   : > { %s3100_s17 = smov 128  }
 0x6e4   : > { %2645 = dma.vmem_to_hbm [thread:$0]  (%p3899_p2), %s3763_s24, 256, %s3760_s13, %s2136_s25, %s3100_s17, %s3100_s17, %s3096_s4  }
 0x6e5 PF: > { %s3900_s18 = sld [smem:[#allocation20_spill]]  ;;  %s3901_s20 = sld [smem:[#allocation22_spill]] }
 0x6e6   : > { %s3902_s6 = sld [smem:[#allocation21_spill]] }
 0x6eb   : > { %s2164_s1 = sand.u32 1, %s3900_s18   ;;  %p3903_p13 = scmp.ne.s32.totalorder %s3901_s20, 0 }
 0x6ec   : > { %p3904_p7 = scmp.ge.s32.totalorder %s3902_s6, 2  ;;  %s2165_s26 = scalar_lea.sflag [#allocation4], %s2164_s1 }
 0x6ee   : > { %p2671_p9 = pnand %p3904_p7, %p3903_p13 }
 0x6f0   : > { %3061 = dma.done.wait (!%p2671_p9), %s2165_s26, 256  }
 0x6f1   : > { %3063 = vsyncadd (!%p2671_p9), %s2165_s26, 4294967040  ;;  %s3905_s24 = sld [smem:[#allocation23_spill]]  ;;  %s3906_s19 = sld [smem:[#allocation25_spill]] }
 0x6f2   : > { %s3907_s21 = smov %s3070_s22  ;;  %s3908_s22 = smov %s3074_s23 }
 0x6f7   : > { %p30_p12 = scmp.ge.s32.totalorder %s3905_s24, 4   ;;  %s3909_s23 = smov %s3906_s19 }
 0x6f9   :  { %32 = sbr.rel (!%p30_p12) target bundleno = 18 (0x12), region = 157 }
 0x700   :  { %2170 = vsyncpa [#allocation3], 1 }
 0x701   :  { %2172 = vsyncpa [#allocation3 + $0x1], 1 }
 0x702   :  { %2173 = vsyncpa [#allocation6], 1 }
 0x703   :  { %2175 = vsyncpa [#allocation6 + $0x1], 1 }
 0x704   :  { %2176 = vsyncpa [#allocation9], 1 }
 0x705   :  { %2177 = vsyncpa [#allocation12], 1 }
 0x706   :  { %2178 = vsyncpa [#allocation4], 1 }
 0x707   :  { %2180 = vsyncpa [#allocation4 + $0x1], 1 }

// kernel: tpu_custom_call.1
= control target key start
LH: loop header
LB: loop body
LE: loop exit
PB: predicated region body
PF: predicated region fallthrough
CT: control target
= control target key end

     0   :  { %s3809_s0 = inlined_call_operand.hbm [shape: f32[4,8,32], index: 0, kind: input, shape index: {}]   ;;  %s3810_s1 = inlined_call_operand.hbm [shape: f32[4,8,32], index: 1, kind: input, shape index: {}]   ;;  %s3811_s2 = inlined_call_operand.hbm [shape: f32[4,8,32], index: 2, kind: input, shape index: {}]   ;;  %s3812_s3 = inlined_call_operand.hbm [shape: bf16[32,32], index: 3, kind: input, shape index: {}]   ;;  %s3813_s4 = inlined_call_operand.vmem [shape: f32[1,32], index: 4, kind: input, shape index: {}]   ;;  %s3814_s5 = inlined_call_operand.vmem [shape: bf16[32,32], index: 5, kind: input, shape index: {}]   ;;  %s3815_s6 = inlined_call_operand.vmem [shape: f32[1,32], index: 6, kind: input, shape index: {}]   ;;  %s3816_s7 = inlined_call_operand.hbm [shape: bf16[32,32], index: 7, kind: input, shape index: {}]   ;;  %s3817_s8 = inlined_call_operand.hbm [shape: f32[1,32], index: 8, kind: input, shape index: {}]   ;;  %s3818_s9 = inlined_call_operand.vmem [shape: bf16[32,32], index: 9, kind: input, shape index: {}]   ;;  %s3819_s10 = inlined_call_operand.hbm [shape: bf16[5,32,32], index: 10, kind: input, shape index: {}]   ;;  %s3820_s11 = inlined_call_operand.vmem [shape: f32[1,32], index: 11, kind: input, shape index: {}]   ;;  %s3821_s12 = inlined_call_operand.hbm [shape: f32[4,8,32], index: 12, kind: output, shape index: {}]  }
   0x1   :  { %3852 = sst [smem:[#allocation26_spill]] %s3810_s1 }
   0x2   :  { %3853 = sst [smem:[#allocation27_spill]] %s3812_s3 }
   0x3   :  { %3854 = sst [smem:[#allocation28_spill]] %s3813_s4 }
   0x4   :  { %3855 = sst [smem:[#allocation29_spill]] %s3815_s6 }
   0x5   :  { %3856 = sst [smem:[#allocation30_spill]] %s3817_s8 }
   0x6   :  { %3857 = sst [smem:[#allocation31_spill]] %s3818_s9 }
   0x7   :  { %3858 = sst [smem:[#allocation32_spill]] %s3820_s11 }
   0x8   :  { %3859 = sst [smem:[#allocation33_spill]] %s3821_s12 }
   0x9   :  { %17 = vsyncpa [#allocation3], 0 }
   0xa   :  { %19 = vsyncpa [#allocation3 + $0x1], 0 }
   0xb   :  { %20 = vsyncpa [#allocation6], 0 }
   0xc   :  { %22 = vsyncpa [#allocation6 + $0x1], 0 }
   0xd   :  { %23 = vsyncpa [#allocation9], 0 }
   0xe   :  { %24 = vsyncpa [#allocation12], 0 }
   0xf   :  { %25 = vsyncpa [#allocation4], 0 }
  0x10   :  { %27 = vsyncpa [#allocation4 + $0x1], 0  ;;  %s3166_s21 = smov 0   ;;  %s3168_s22 = smov 0  }
  0x11   :  { %s3170_s23 = smov 0   ;;  %s3172_s24 = smov 0  }
  0x12 LB: > { %3860 = sst [smem:[#allocation20_spill]] %s3066_s21  ;;  %s3187_s25 = sadd.s32 4294967295, %s3078_s24   ;;  %s3078_s24 = sphi %s3172_s24, %s3905_s24   ;;  %s3074_s23 = sphi %s3170_s23, %s3909_s23   ;;  %s3070_s22 = sphi %s3168_s22, %s3908_s22   ;;  %s3066_s21 = sphi %s3166_s21, %s3907_s21  }
  0x13   : > { %3861 = sst [smem:[#allocation21_spill]] %s3078_s24  ;;  %s2303_s26 = sadd.s32 4294967294, %s3078_s24  }
  0x14   : > { %p53_p0 = scmp.ne.s32.totalorder %s3070_s22, %s3066_s21  ;;  %p3823_p1 = scmp.eq.s32.totalorder %s3187_s25, 0 }
  0x15   : > { %p324_p3 = scmp.eq.s32.totalorder %s2303_s26, 1  ;;  %p2304_p5 = scmp.ge.s32.totalorder %s3078_s24, 1 }
  0x16   : > { %p3196_p4 = por %p3823_p1, %p53_p0  ;;  %p331_p7 = scmp.lt.s32.totalorder %s3078_s24, 3 }
  0x17   : > { %p3201_p6 = por %p324_p3, %p53_p0  ;;  %s3080_s30 = smov [#allocation8]  }
  0x18   : > { %s3862_s27 = scalar_select %p3196_p4, 1, 0 }
  0x19   : > { %s3863_s28 = scalar_select %p3201_p6, 1, 0 }
  0x1a   : > { %p3206_p8 = pnand %p2304_p5, %p331_p7  ;;  %s343_s13 = sshll.u32 %s3080_s30, 4  ;;  %s3210_s13 = int_to_ptr.vmem [resolvable:$true] %s343_s13 }
  0x1b   : > { %3864 = sst [smem:[#allocation22_spill]] %s3863_s28  ;;  %s3081_s15 = smov [#allocation11]  }
  0x1c   : > { %s3865_s29 = scalar_select %p3206_p8, 1, 0 }
  0x1d   : > { %p2647_p9 = pneg %p3206_p8  ;;  %s379_s16 = sshll.u32 %s3081_s15, 4  ;;  %s3221_s16 = int_to_ptr.vmem [resolvable:$true] %s379_s16 }
  0x1e   : > { %s3867_s3 = sld [smem:[#allocation27_spill]] }
  0x1f   : > { %p3217_p11 = pnand %p2647_p9, %p3823_p1 }
  0x21   : > { %s3866_s14 = scalar_select %p3217_p11, 1, 0 }
  0x22   : > { %p3231_p13 = pneg %p3217_p11 }
  0x24   : > { %s2798_s19 = scalar_lea.hbm %s3867_s3, 256 }
  0x25   : > { %p2799_p12 = scmp.ne.s32.totalorder %s3867_s3, %s2798_s19  ;;  %p2805_p5 = scmp.lt.u32.totalorder %s2798_s19, %s3867_s3 }
  0x26   : > { %s3868_s30 = scalar_select %p3231_p13, 1, 0 }
  0x27   : > { %p2801_p0 = pnand %p3231_p13, %p2799_p12 }
  0x29   : > { %p2802_p3 = pneg %p2801_p0 }
  0x2b   : > { %p2807_p7 = pnand %p2805_p5, %p2802_p3 }
  0x2d   : > { %2810 = shalt.err (!%p2807_p7)
}
  0x2e   : > { %s2811_s17 = scalar_lea.vmem %s3210_s13, 256  ;;  %p2819_p2 = scmp.lt.s32.totalorder %s3210_s13, %s3210_s13 }
  0x2f   : > { %p2812_p9 = scmp.ne.s32.totalorder %s3210_s13, %s2811_s17  ;;  %p2820_p6 = scmp.lt.s32.totalorder %s2811_s17, %s2811_s17 }
  0x31   : > { %p2814_p10 = pnand %p2812_p9, %p3231_p13  ;;  %p2821_p12 = por %p2820_p6, %p2819_p2 }
  0x33   : > { %p2815_p1 = pneg %p2814_p10 }
  0x35   : > { %p2822_p0 = pnand %p2821_p12, %p2815_p1 }
  0x37   : > { %2825 = shalt.err (!%p2822_p0)
}
  0x38   : > { %s3828_s18 = smov 64   ;;  %s3830_s28 = smov 4  }
  0x39   : > { %2650 = dma.hbm_to_vmem [thread:$0]  (!%p3217_p11), %s3867_s3, 256, %s3210_s13, [#allocation9], %s3828_s18, %s3828_s18, %s3830_s28  }
  0x3a   : > { %s3869_s8 = sld [smem:[#allocation30_spill]] }
  0x40   : > { %s2826_s17 = scalar_lea.hbm %s3869_s8, 16 }
  0x41   : > { %p2827_p1 = scmp.ne.s32.totalorder %s3869_s8, %s2826_s17  ;;  %p2833_p10 = scmp.lt.u32.totalorder %s2826_s17, %s3869_s8 }
  0x43   : > { %p2829_p2 = pnand %p2827_p1, %p3231_p13 }
  0x45   : > { %p2830_p6 = pneg %p2829_p2 }
  0x47   : > { %p2835_p3 = pnand %p2833_p10, %p2830_p6 }
  0x49   : > { %2838 = shalt.err (!%p2835_p3)
}
  0x4a   : > { %s2839_s13 = scalar_lea.vmem %s3221_s16, 16  ;;  %s2846_s12 = scalar_lea.vmem %s3221_s16, 32 }
  0x4b   : > { %p2840_p5 = scmp.ne.s32.totalorder %s3221_s16, %s2839_s13  ;;  %p2847_p12 = scmp.lt.s32.totalorder %s3221_s16, %s3221_s16 }
  0x4c   : > { %p2848_p0 = scmp.lt.s32.totalorder %s2846_s12, %s2839_s13 }
  0x4d   : > { %p2842_p7 = pnand %p2840_p5, %p3231_p13 }
  0x4e   : > { %p2849_p1 = por %p2848_p0, %p2847_p12 }
  0x4f   : > { %p2843_p9 = pneg %p2842_p7 }
  0x51   : > { %p2850_p2 = pnand %p2849_p1, %p2843_p9 }
  0x53   : > { %2853 = shalt.err (!%p2850_p2)
}
  0x54   : > { %2656 = dma.hbm_to_vmem [thread:$0]  (!%p3217_p11), %s3869_s8, 16, %s3221_s16, [#allocation12]  }
  0x55   : > { %s3280_s21 = sadd.s32 1, %s3078_s24   ;;  %s40_s19 = sadd.s32 1, %s3074_s23 }
  0x56   : > { %3870 = sst [smem:[#allocation23_spill]] %s3280_s21  ;;  %s37_s20 = ssub.s32 %s3078_s24, %s3280_s21 }
  0x57   : > { %p47_p6 = scmp.ne.s32.totalorder %s3074_s23, %s3070_s22  ;;  %p38_p10 = scmp.eq.s32.totalorder %s37_s20, 0 }
  0x58   : > { %p48_p3 = scmp.eq.s32.totalorder %s3078_s24, 0  ;;  %p3871_p5 = scmp.eq.s32.totalorder %s3187_s25, 1 }
  0x59   : > { %p2678_p9 = scmp.lt.s32.totalorder %s3078_s24, 2  ;;  %s3827_s17 = sand.u32 1, %s3074_s23  }
  0x5a   : > { %p3290_p7 = por %p3871_p5, %p47_p6  ;;  %p49_p12 = por %p48_p3, %p47_p6 }
  0x5b   : > { %s3296_s15 = scalar_select %p38_p10, %s3074_s23, %s40_s19  }
  0x5c   : > { %s3872_s26 = scalar_select %p3290_p7, 1, 0 }
  0x5d   : > { %3874 = sst [smem:[#allocation25_spill]] %s3296_s15  ;;  %s3301_s16 = sshll.u32 %s3827_s17, 4 }
  0x5e   : > { %3873 = sst [smem:[#allocation24_spill]] %s3872_s26  ;;  %s3304_s13 = sshll.u32 %s3078_s24, 8 }
  0x5f   : > { %p3306_p0 = pnand %p2678_p9, %p49_p12  ;;  %s430_s9 = sand.u32 1, %s3078_s24  }
  0x60   : > { %s3876_s1 = sld [smem:[#allocation26_spill]]  ;;  %s434_s17 = scalar_lea.vmem [#allocation5], %s3301_s16 }
  0x61   : > { %s3875_s12 = scalar_select %p3306_p0, 1, 0 }
  0x62   : > { %s441_s18 = sshll.u32 %s434_s17, 4  ;;  %s3084_s28 = smov [#allocation10]   ;;  %s3318_s18 = int_to_ptr.vmem [resolvable:$true] %s441_s18 }
  0x63   : > { %s3320_s3 = sshll.u32 %s3084_s28, 4  ;;  %s3322_s8 = scalar_lea.sflag [#allocation6], %s430_s9  ;;  %s366_s3 = int_to_ptr.vmem [resolvable:$true] %s3320_s3 }
  0x64   : > { %p3328_p2 = pneg %p3306_p0 }
  0x66   : > { %s3315_s19 = scalar_lea.hbm %s3876_s1, %s3304_s13  ;;  %s2859_s21 = scalar_lea.hbm %s3876_s1, 512 }
  0x67   : > { %s2854_s15 = scalar_lea.hbm %s3315_s19, 256  ;;  %p2860_p3 = scmp.lt.u32.totalorder %s3315_s19, %s3876_s1 }
  0x68   : > { %p2855_p1 = scmp.ne.s32.totalorder %s3315_s19, %s2854_s15  ;;  %p2861_p5 = scmp.lt.u32.totalorder %s2859_s21, %s2854_s15 }
  0x69   : > { %s3877_s11 = scalar_select %p3328_p2, 1, 0 }
  0x6a   : > { %p2857_p6 = pnand %p3328_p2, %p2855_p1  ;;  %p2862_p9 = por %p2861_p5, %p2860_p3 }
  0x6b   : > { %p2863_p12 = scmp.lt.u32.totalorder %s2854_s15, %s3315_s19 }
  0x6c   : > { %p2858_p10 = pneg %p2857_p6 }
  0x6d   : > { %p2864_p7 = por %p2863_p12, %p2862_p9 }
  0x6f   : > { %p2865_p4 = pnand %p2864_p7, %p2858_p10 }
  0x71   : > { %2868 = shalt.err (!%p2865_p4)
}
  0x72   : > { %s2869_s9 = scalar_lea.vmem %s3318_s18, 256  ;;  %s3085_s20 = smov [#allocation5]  }
  0x73   : > { %p2870_p1 = scmp.ne.s32.totalorder %s3318_s18, %s2869_s9  ;;  %s2874_s17 = sshll.u32 %s3085_s20, 4  ;;  %s2875_s17 = int_to_ptr.vmem [resolvable:$false] %s2874_s17 }
  0x74   : > { %s2876_s24 = scalar_lea.vmem %s2875_s17, 512  ;;  %p2877_p11 = scmp.lt.s32.totalorder %s3318_s18, %s2875_s17 }
  0x75   : > { %p2872_p6 = pnand %p2870_p1, %p3328_p2  ;;  %p2878_p13 = scmp.lt.s32.totalorder %s2876_s24, %s2869_s9 }
  0x77   : > { %p2873_p8 = pneg %p2872_p6  ;;  %p2879_p3 = por %p2878_p13, %p2877_p11 }
  0x79   : > { %p2880_p5 = pnand %p2879_p3, %p2873_p8 }
  0x7b   : > { %2883 = shalt.err (!%p2880_p5)
}
  0x7c   : > { %s3846_s21 = smov 128   ;;  %s3848_s15 = smov 8  }
  0x7d   : > { %2666 = dma.hbm_to_vmem [thread:$0]  (!%p3306_p0), %s3315_s19, 256, %s3318_s18, %s3322_s8, %s3846_s21, %s3846_s21, %s3848_s15  }
  0x7e   : > { %s2884_s9 = scalar_lea.hbm %s3816_s7, 256  ;;  %p3878_p8 = scmp.ne.s32.totalorder %s3868_s30, 0 }
  0x7f   : > { %p2885_p4 = scmp.ne.s32.totalorder %s3816_s7, %s2884_s9  ;;  %p2891_p7 = scmp.lt.u32.totalorder %s2884_s9, %s3816_s7 }
  0x81   : > { %p2887_p11 = pnand %p2885_p4, %p3878_p8 }
  0x83   : > { %p2888_p13 = pneg %p2887_p11 }
  0x85   : > { %p2893_p10 = pnand %p2891_p7, %p2888_p13 }
  0x87   : > { %2896 = shalt.err (!%p2893_p10)
}
  0x88   : > { %s2897_s6 = scalar_lea.vmem %s366_s3, 256  ;;  %p2905_p6 = scmp.lt.s32.totalorder %s366_s3, %s366_s3 }
  0x89   : > { %p2898_p9 = scmp.ne.s32.totalorder %s366_s3, %s2897_s6  ;;  %p2906_p3 = scmp.lt.s32.totalorder %s2897_s6, %s2897_s6 }
  0x8b   : > { %p2900_p12 = pnand %p2898_p9, %p3878_p8  ;;  %p2907_p5 = por %p2906_p3, %p2905_p6 }
  0x8d   : > { %p2901_p1 = pneg %p2900_p12 }
  0x8f   : > { %p2908_p0 = pnand %p2907_p5, %p2901_p1 }
  0x91   : > { %2911 = shalt.err (!%p2908_p0)
}
  0x92   : > { %p3879_p4 = scmp.ne.s32.totalorder %s3866_s14, 0  ;;  %s3880_s18 = smov 4  }
  0x93   : > { %s3881_s19 = smov 64   ;;  %s3088_s28 = smov [#allocation13]  }
  0x94   : > { %2653 = dma.hbm_to_vmem [thread:$0]  (!%p3879_p4), %s3816_s7, 256, %s366_s3, [#allocation9], %s3881_s19, %s3881_s19, %s3880_s18  }
  0x95   : > { %s392_s20 = sshll.u32 %s3088_s28, 4  ;;  %s2912_s6 = scalar_lea.hbm %s3819_s10, 1280  ;;  %s393_s20 = int_to_ptr.vmem [resolvable:$true] %s392_s20 }
  0x96   : > { %p2913_p0 = scmp.ne.s32.totalorder %s3819_s10, %s2912_s6  ;;  %p2919_p7 = scmp.lt.u32.totalorder %s2912_s6, %s3819_s10 }
  0x98   : > { %p2915_p11 = pnand %p2913_p0, %p3878_p8 }
  0x9a   : > { %p2916_p13 = pneg %p2915_p11 }
  0x9c   : > { %p2921_p10 = pnand %p2919_p7, %p2916_p13 }
  0x9e   : > { %2924 = shalt.err (!%p2921_p10)
}
  0x9f   : > { %s2925_s3 = scalar_lea.vmem %s393_s20, 1280  ;;  %p2933_p6 = scmp.lt.s32.totalorder %s393_s20, %s393_s20 }
  0xa0   : > { %p2926_p9 = scmp.ne.s32.totalorder %s393_s20, %s2925_s3  ;;  %p2934_p3 = scmp.lt.s32.totalorder %s2925_s3, %s2925_s3 }
  0xa2   : > { %p2928_p12 = pnand %p2926_p9, %p3878_p8  ;;  %p2935_p5 = por %p2934_p3, %p2933_p6 }
  0xa4   : > { %p2929_p1 = pneg %p2928_p12 }
  0xa6   : > { %p2936_p2 = pnand %p2935_p5, %p2929_p1 }
  0xa8   : > { %2939 = shalt.err (!%p2936_p2)
}
  0xa9   : > { %2659 = dma.hbm_to_vmem [thread:$0]  (!%p3879_p4), %s3819_s10, 1280, %s393_s20, [#allocation12], %s3881_s19, %s3881_s19, %s3880_s18  }
  0xaa   : > { %s3402_s1 = scalar_lea.hbm %s3809_s0, %s3304_s13  ;;  %s413_s14 = scalar_lea.vmem [#allocation2], %s3301_s16 }
  0xab   : > { %s420_s26 = sshll.u32 %s413_s14, 4  ;;  %s3882_s28 = sand.u32 1, %s3074_s23   ;;  %s3405_s26 = int_to_ptr.vmem [resolvable:$true] %s420_s26 }
  0xac   : > { %s3409_s9 = scalar_lea.sflag [#allocation3], %s3882_s28  ;;  %s2940_s17 = scalar_lea.hbm %s3402_s1, 256 }
  0xad   : > { %p2941_p2 = scmp.ne.s32.totalorder %s3402_s1, %s2940_s17  ;;  %p3883_p8 = scmp.ne.s32.totalorder %s3877_s11, 0 }
  0xae   : > { %s2945_s20 = scalar_lea.hbm %s3809_s0, 512  ;;  %p2946_p11 = scmp.lt.u32.totalorder %s3402_s1, %s3809_s0 }
  0xaf   : > { %p2943_p4 = pnand %p2941_p2, %p3883_p8  ;;  %p2947_p13 = scmp.lt.u32.totalorder %s2945_s20, %s2940_s17 }
  0xb0   : > { %p2949_p10 = scmp.lt.u32.totalorder %s2940_s17, %s3402_s1 }
  0xb1   : > { %p2944_p0 = pneg %p2943_p4  ;;  %p2948_p7 = por %p2947_p13, %p2946_p11 }
  0xb3   : > { %p2950_p9 = por %p2949_p10, %p2948_p7 }
  0xb5   : > { %p2951_p12 = pnand %p2950_p9, %p2944_p0 }
  0xb7   : > { %2954 = shalt.err (!%p2951_p12)
}
  0xb8   : > { %s2955_s3 = scalar_lea.vmem %s3405_s26, 256  ;;  %s3089_s4 = smov [#allocation2]  }
  0xb9   : > { %p2956_p1 = scmp.ne.s32.totalorder %s3405_s26, %s2955_s3  ;;  %s2960_s21 = sshll.u32 %s3089_s4, 4  ;;  %s2961_s21 = int_to_ptr.vmem [resolvable:$false] %s2960_s21 }
  0xba   : > { %s2962_s30 = scalar_lea.vmem %s2961_s21, 512  ;;  %p2963_p5 = scmp.lt.s32.totalorder %s3405_s26, %s2961_s21 }
  0xbb   : > { %p2958_p6 = pnand %p2956_p1, %p3883_p8  ;;  %p2964_p2 = scmp.lt.s32.totalorder %s2962_s30, %s2955_s3 }
  0xbd   : > { %p2959_p3 = pneg %p2958_p6  ;;  %p2965_p4 = por %p2964_p2, %p2963_p5 }
  0xbf   : > { %p2966_p11 = pnand %p2965_p4, %p2959_p3 }
  0xc1   : > { %2969 = shalt.err (!%p2966_p11)
}
  0xc2   : > { %p3884_p0 = scmp.ne.s32.totalorder %s3875_s12, 0  ;;  %s3885_s15 = smov 8  }
  0xc3   : > { %s3886_s14 = smov 128   ;;  %s3440_s18 = scalar_lea.hbm %s3811_s2, %s3304_s13 }
  0xc4   : > { %2663 = dma.hbm_to_vmem [thread:$0]  (!%p3884_p0), %s3402_s1, 256, %s3405_s26, %s3409_s9, %s3886_s14, %s3886_s14, %s3885_s15  }
  0xc5   : > { %s455_s19 = scalar_lea.vmem [#allocation7], %s3301_s16  ;;  %s2970_s6 = scalar_lea.hbm %s3440_s18, 256 }
  0xc6   : > { %s462_s20 = sshll.u32 %s455_s19, 4  ;;  %p2971_p13 = scmp.ne.s32.totalorder %s3440_s18, %s2970_s6  ;;  %s3443_s20 = int_to_ptr.vmem [resolvable:$true] %s462_s20 }
  0xc7   : > { %s2975_s26 = scalar_lea.hbm %s3811_s2, 512  ;;  %p2976_p9 = scmp.lt.u32.totalorder %s3440_s18, %s3811_s2 }
  0xc8   : > { %p2973_p7 = pnand %p2971_p13, %p3883_p8  ;;  %p2977_p12 = scmp.lt.u32.totalorder %s2975_s26, %s2970_s6 }
  0xc9   : > { %p2979_p6 = scmp.lt.u32.totalorder %s2970_s6, %s3440_s18 }
  0xca   : > { %p2974_p10 = pneg %p2973_p7  ;;  %p2978_p1 = por %p2977_p12, %p2976_p9 }
  0xcc   : > { %p2980_p3 = por %p2979_p6, %p2978_p1 }
  0xce   : > { %p2981_p5 = pnand %p2980_p3, %p2974_p10 }
  0xd0   : > { %2984 = shalt.err (!%p2981_p5)
}
  0xd1   : > { %s2985_s16 = scalar_lea.vmem %s3443_s20, 256  ;;  %s3090_s3 = smov [#allocation7]  }
  0xd2   : > { %p2986_p2 = scmp.ne.s32.totalorder %s3443_s20, %s2985_s16  ;;  %s2990_s4 = sshll.u32 %s3090_s3, 4  ;;  %s2991_s4 = int_to_ptr.vmem [resolvable:$false] %s2990_s4 }
  0xd3   : > { %s2992_s21 = scalar_lea.vmem %s2991_s4, 512  ;;  %p2993_p13 = scmp.lt.s32.totalorder %s3443_s20, %s2991_s4 }
  0xd4   : > { %p2988_p4 = pnand %p2986_p2, %p3883_p8  ;;  %p2994_p7 = scmp.lt.s32.totalorder %s2992_s21, %s2985_s16 }
  0xd6   : > { %p2989_p11 = pneg %p2988_p4  ;;  %p2995_p9 = por %p2994_p7, %p2993_p13 }
  0xd8   : > { %p2996_p12 = pnand %p2995_p9, %p2989_p11 }
  0xda   : > { %2999 = shalt.err (!%p2996_p12)
}
  0xdb   : > { %2669 = dma.hbm_to_vmem [thread:$0]  (!%p3884_p0), %s3440_s18, 256, %s3443_s20, %s3322_s8, %s3886_s14, %s3886_s14, %s3885_s15  }
  0xdc   : > { %p3887_p8 = scmp.ne.s32.totalorder %s3865_s29, 0 }
  0xdd   : > { %s3473_s11 = sand.u32 (!%p3887_p8), 1, %s3070_s22   ;;  %p3888_p10 = scmp.ne.s32.totalorder (!%p3887_p8), %s3862_s27, 0 }
  0xde   : > { %474 = sbr.rel (%p3887_p8) target bundleno = 1765 (0x6e5), region = 68  ;;  %s3476_s30 = sshll.u32 (!%p3887_p8), %s3473_s11, 4 }
  0xdf   : > { %s477_s12 = scalar_lea.sflag (!%p3887_p8), [#allocation3], %s3473_s11  ;;  %s480_s28 = scalar_lea.vmem (!%p3887_p8), [#allocation2], %s3476_s30 }
  0xe5   : > { %3045 = dma.done.wait (%p3888_p10), %s477_s12, 256  }
  0xe6   : > { %3047 = vsyncadd (%p3888_p10), %s477_s12, 4294967040  ;;  %s485_s8 = sand.u32 1, %s3187_s25   ;;  %s489_s15 = scalar_lea.vmem [#allocation5], %s3476_s30 }
  0xe7   : > { %s486_s29 = scalar_lea.sflag [#allocation6], %s485_s8 }
  0xe8   : > { %3049 = dma.done.wait (%p3888_p10), %s486_s29, 512  }
  0xe9   : > { %3051 = vsyncadd (%p3888_p10), %s486_s29, 4294966784  ;;  %s498_s14 = scalar_lea.vmem [#allocation7], %s3476_s30  ;;  %p3889_p0 = scmp.eq.s32.totalorder %s3187_s25, 0 }
  0xeb   : > { %3053 = dma.done.wait (%p3889_p0), [#allocation9], 512   ;;  %p3890_p1 = pmov %p3889_p0 }
  0xec   : > { %p3891_p6 = pmov %p3889_p0 }
  0xed   : > { %3055 = vsyncadd (%p3890_p1), [#allocation9], 4294966784 }
  0xee   : > { %3057 = dma.done.wait (%p3891_p6), [#allocation12], 1296   ;;  %p3892_p3 = pmov %p3889_p0 }
  0xef   : > { %v3091_v0 = vmov 0.0   ;;  %vm3092_vm0 = vmmov 0   ;;  %v2748_v1 = vld [vmem:[#allocation8] sm:$0xff]   ;;  %v2750_v3 = vld [vmem:[#allocation8 + $0x8] sm:$0xff]   ;;  %vm602_vm1 = vcmask 261120   ;;  %v2752_v11 = vld [vmem:[#allocation10] sm:$0xff]  }
  0xf0   : > { %3059 = vsyncadd (%p3892_p3), [#allocation12], 4294966000  ;;  %2455 = vmatprep.subr.bf16.mxu0 %v3091_v0  ;;  %2463 = vmatprep.subr.bf16.mxu1 %v3091_v0  ;;  %v2749_v2 = vld [vmem:[%s3814_s5] sm:$0xff]   ;;  %v2751_v4 = vld [vmem:[%s3814_s5 + $0x8] sm:$0xff]   ;;  %s3893_s24 = sld [smem:[#allocation28_spill]]  ;;  %s3894_s9 = sld [smem:[#allocation29_spill]] }
  0xf1   : > { %2459 = vmatprep.mubr.msk.bf16.mxu0 %vm3092_vm0, %v3091_v0  ;;  %2467 = vmatprep.mubr.msk.bf16.mxu1 %vm3092_vm0, %v3091_v0  ;;  %v570_v5 = vld [vmem:[%s480_s28] sm:$0xff]  ;;  %v571_v6 = vld [vmem:[%s480_s28 + $0x8] sm:$0xff]  ;;  %vm835_vm2 = vcmask 64512   ;;  %s3093_s13 = smov 120   ;;  %s3094_s16 = smov 112   ;;  %vm1303_vm3 = vcmask 1043456  }
  0xf2   : > { %2456 = vmatpush3.bf16.msra.mxu0 %v2748_v1  ;;  %2464 = vmatpush3.bf16.msra.mxu1 %v2749_v2  ;;  %v573_v7 = vld [vmem:[%s489_s15] sm:$0xff]  ;;  %v572_v8 = vpack.c.bf16 %v571_v6, %v570_v5  ;;  %v574_v9 = vld [vmem:[%s489_s15 + $0x8] sm:$0xff]  ;;  %s3095_s3 = smov 104   ;;  %s3096_s4 = smov 8   ;;  %vm1695_vm10 = vcmask 130048   ;;  %vm1698_vm11 = vcmask 195584  }
  0xf3   : > { %2457 = vmatprep.subr.bf16.mxu0 %v3091_v0  ;;  %2465 = vmatprep.subr.bf16.mxu1 %v3091_v0  ;;  %v575_v10 = vpack.c.bf16 %v574_v9, %v573_v7  ;;  %v2753_v12 = vld [vmem:[#allocation10 + $0x8] sm:$0xff]   ;;  %v576_v13 = vld [vmem:[%s498_s14] sm:$0xff]  ;;  %s3895_s28 = sld [smem:[#allocation31_spill]]  ;;  %s3097_s15 = smov 16  }
  0xf4   : > { %v577_v14 = vld [vmem:[%s498_s14 + $0x8] sm:$0xff]  ;;  %v2336_v51 = vld [vmem:[#allocation11] ss:$0 sm:$0xff]  ;;  %s3098_s14 = smov 24   ;;  %s3896_s18 = sld [smem:[#allocation32_spill]] }
  0xf5   : > { %v578_v15 = vpack.c.bf16 %v577_v14, %v576_v13  ;;  %s3897_s19 = sld [smem:[#allocation24_spill]]  ;;  %s2395_s20 = sshll.u32 %s3187_s25, 8 }
  0xf6   : > { %2458 = vmatpush3.bf16.msra.mxu0 %v2750_v3  ;;  %2466 = vmatpush3.bf16.msra.mxu1 %v2751_v4  ;;  %v2328_v16 = vld [vmem:[%s3893_s24] ss:$0 sm:$0xff]  ;;  %s564_s6 = scalar_lea.vmem [#allocation14], %s3476_s30  ;;  %s2136_s25 = scalar_lea.sflag [#allocation4], %s3473_s11 }
  0xf7   : > { %2471 = vmatprep.subr.bf16.mxu0 %v3091_v0  ;;  %2479 = vmatprep.subr.bf16.mxu1 %v3091_v0  ;;  %v2332_v17 = vld [vmem:[%s3894_s9] ss:$0 sm:$0xff]  ;;  %s2149_s24 = sshll.u32 %s564_s6, 4  ;;  %s3898_s9 = sld [smem:[#allocation33_spill]]  ;;  %s3763_s24 = int_to_ptr.vmem [resolvable:$true] %s2149_s24 }
  0xf8   : > { %s3000_s30 = scalar_lea.vmem %s3763_s24, 256 }
  0xf9   : > { %2460 = vmatmul.mubr.msk.bf16.vlgmr.msra.gmra.mrb[0].mxu0 %vm602_vm1, %v572_v8  ;;  %2468 = vmatmul.mubr.msk.bf16.vlgmr.msra.gmra.mrb[0].mxu1 %vm602_vm1, %v575_v10  ;;  %p3001_p5 = scmp.ne.s32.totalorder %s3763_s24, %s3000_s30 }
  0xfa   : > { %2472 = vmatpush3.bf16.msra.mxu0 %v2752_v11  ;;  %2475 = vmatprep.mubr.msk.bf16.mxu0 %vm3092_vm0, %v3091_v0 }
  0xfb   : > { %2473 = vmatprep.subr.bf16.mxu0 %v3091_v0  ;;  %2481 = vmatprep.mubr.msk.bf16.mxu1 %vm3092_vm0, %v3091_v0  ;;  %p3899_p2 = scmp.ne.s32.totalorder %s3897_s19, 0 }
  0xfd   : > { %p3002_p4 = pnand %p3001_p5, %p3899_p2 }
  0xfe   : > { %2474 = vmatpush3.bf16.msra.mxu0 %v2753_v12 }
  0xff   : > { %2485 = vmatprep.subr.bf16.mxu0 %v3091_v0  ;;  %p3003_p11 = pneg %p3002_p4 }
 0x101   : > { %2476 = vmatmul.mubr.msk.bf16.vlgmr.msra.gmra.mrb[4].mxu0 %vm602_vm1, %v578_v15 }
 0x102   : > { %2487 = vmatprep.mubr.msk.bf16.mxu0 %vm3092_vm0, %v3091_v0 }
 0x1cc   : > { %v640_v18 = vpop.f32.mrb[0].mxu0  ;;  %v707_v20 = vpop.f32.mrb[0].mxu1 }
 0x1cd   : > { %v641_v19 = vadd.f32 %v2328_v16, %v640_v18  ;;  %v2461_v21 = vpop.f32.mrb[1].mxu0  ;;  %v708_v22 = vadd.f32 %v2332_v17, %v707_v20  ;;  %v2469_v23 = vpop.f32.mrb[1].mxu1 }
 0x1ce   : > { %v643_v24 = vpop.f32.mrb[2].mxu0  ;;  %v710_v26 = vpop.f32.mrb[2].mxu1 }
 0x1cf   : > { %v2389_v25 = vpack.c.bf16 %v641_v19, %v641_v19  ;;  %v644_v27 = vadd.f32 %v2328_v16, %v643_v24  ;;  %v2462_v28 = vpop.f32.mrb[3].mxu0  ;;  %v2391_v29 = vpack.c.bf16 %v708_v22, %v708_v22  ;;  %v711_v30 = vadd.f32 %v2332_v17, %v710_v26  ;;  %v2470_v31 = vpop.f32.mrb[3].mxu1 }
 0x1d1   : > { %v2390_v32 = vpack.c.bf16 %v644_v27, %v644_v27  ;;  %799 = vrot.lane.b32.xlu1 %v2389_v25, %s3093_s13  ;;  %v2392_v33 = vpack.c.bf16 %v711_v30, %v711_v30  ;;  %811 = vrot.lane.b32.xlu0 %v2391_v29, %s3093_s13  ;;  %v840_v34 = vsel %vm835_vm2, %v2391_v29, 0 }
 0x1d2   : > { %2480 = vmatpush3.bf16.xpose.msra.mxu1 %v840_v34 }
 0x1d3   : > { %v886_v35 = vsel %vm835_vm2, %v2392_v33, 0  ;;  %2491 = vmatprep.subr.bf16.mxu1 %v3091_v0 }
 0x1d4   : > { %2486 = vmatpush3.bf16.xpose.msra.mxu0 %v886_v35  ;;  %v774_v36 = vpop.f32.mrb[4].mxu0 }
 0x1d5   : > { %801 = vrot.lane.b32.xlu1 %v2390_v32, %s3093_s13  ;;  %813 = vrot.lane.b32.xlu0 %v2392_v33, %s3093_s13  ;;  %v2477_v37 = vpop.f32.mrb[5].mxu0  ;;  %v3572_v53 = vadd.f32 %v2336_v51, %v774_v36 }
 0x1d6   : > { %2497 = vmatprep.subr.bf16.mxu0 %v3091_v0  ;;  %v777_v38 = vpop.f32.mrb[6].mxu0 }
 0x1d7   : > { %v2478_v39 = vpop.f32.mrb[7].mxu0  ;;  %v3578_v57 = vadd.f32 %v2336_v51, %v777_v38  ;;  %v3583_v58 = vpack.c.bf16 %v3572_v53, %v3572_v53 }
 0x1d9   : > { %817 = vrot.lane.b32.xlu1 %v2392_v33, %s3094_s16  ;;  %815 = vrot.lane.b32.xlu0 %v2391_v29, %s3094_s16  ;;  %v1305_v60 = vsel %vm1303_vm3, %v3583_v58, 0  ;;  %v3594_v61 = vpack.c.bf16 %v3578_v57, %v3578_v57 }
 0x1da   : > { %2482 = vmatmul.mubr.msk.bf16.vlgmr.msra.gmra.mrb[4].mxu1 %vm835_vm2, %v2389_v25 }
 0x1db   : > { %2493 = vmatprep.mubr.msk.bf16.mxu1 %vm3092_vm0, %v3091_v0  ;;  %2488 = vmatmul.mubr.msk.bf16.vlgmr.msra.gmra.mrb[8].mxu0 %vm835_vm2, %v2390_v32  ;;  %v1351_v63 = vsel %vm1303_vm3, %v3594_v61, 0 }
 0x1dc   : > { %2499 = vmatprep.mubr.msk.bf16.mxu0 %vm3092_vm0, %v3091_v0 }
 0x1dd   : > { %805 = vrot.lane.b32.xlu1 %v2390_v32, %s3094_s16  ;;  %803 = vrot.lane.b32.xlu0 %v2389_v25, %s3094_s16 }
 0x1e1   : > { %821 = vrot.lane.b32.xlu1 %v2392_v33, %s3095_s3  ;;  %819 = vrot.lane.b32.xlu0 %v2391_v29, %s3095_s3 }
 0x1e5   : > { %809 = vrot.lane.b32.xlu1 %v2390_v32, %s3095_s3  ;;  %807 = vrot.lane.b32.xlu0 %v2389_v25, %s3095_s3 }
 0x243   : > { %v800_v40 = vpop.permute.xlu1 %799  ;;  %v812_v41 = vpop.permute.xlu0 %811 }
 0x244   : > { %v932_v42 = vsel %vm835_vm2, %v812_v41, 0 }
 0x245   : > { %2492 = vmatpush3.bf16.xpose.msra.mxu1 %v932_v42 }
 0x246   : > { %2503 = vmatprep.subr.bf16.mxu1 %v3091_v0 }
 0x247   : > { %v802_v43 = vpop.permute.xlu1 %801  ;;  %v814_v44 = vpop.permute.xlu0 %813 }
 0x248   : > { %v978_v45 = vsel %vm835_vm2, %v814_v44, 0 }
 0x249   : > { %2498 = vmatpush3.bf16.xpose.msra.mxu0 %v978_v45 }
 0x24a   : > { %2509 = vmatprep.subr.bf16.mxu0 %v3091_v0 }
 0x24b   : > { %v818_v46 = vpop.permute.xlu1 %817  ;;  %v816_v47 = vpop.permute.xlu0 %815 }
 0x24c   : > { %v1024_v48 = vsel %vm835_vm2, %v816_v47, 0  ;;  %2494 = vmatmul.mubr.msk.bf16.vlgmr.msra.gmra.mrb[8].mxu1 %vm835_vm2, %v800_v40  ;;  %v1070_v52 = vsel %vm835_vm2, %v818_v46, 0 }
 0x24d   : > { %2504 = vmatpush3.bf16.xpose.msra.mxu1 %v1024_v48  ;;  %2505 = vmatprep.mubr.msk.bf16.mxu1 %vm3092_vm0, %v3091_v0 }
 0x24e   : > { %2515 = vmatprep.subr.bf16.mxu1 %v3091_v0 }
 0x24f   : > { %v804_v49 = vpop.permute.xlu0 %803  ;;  %v806_v50 = vpop.permute.xlu1 %805 }
 0x250   : > { %2500 = vmatmul.mubr.msk.bf16.vlgmr.msra.gmra.mrb[12].mxu0 %vm835_vm2, %v802_v43 }
 0x251   : > { %2510 = vmatpush3.bf16.xpose.msra.mxu0 %v1070_v52  ;;  %2511 = vmatprep.mubr.msk.bf16.mxu0 %vm3092_vm0, %v3091_v0 }
 0x252   : > { %2521 = vmatprep.subr.bf16.mxu0 %v3091_v0 }
 0x253   : > { %v820_v54 = vpop.permute.xlu0 %819  ;;  %v822_v56 = vpop.permute.xlu1 %821 }
 0x254   : > { %v1116_v55 = vsel %vm835_vm2, %v820_v54, 0  ;;  %2506 = vmatmul.mubr.msk.bf16.vlgmr.msra.gmra.mrb[12].mxu1 %vm835_vm2, %v804_v49  ;;  %v1162_v59 = vsel %vm835_vm2, %v822_v56, 0 }
 0x255   : > { %2516 = vmatpush3.bf16.xpose.msra.mxu1 %v1116_v55  ;;  %2517 = vmatprep.mubr.msk.bf16.mxu1 %vm3092_vm0, %v3091_v0 }
 0x256   : > { %2527 = vmatprep.subr.bf16.mxu1 %v3091_v0 }
 0x257   : > { %v808_v62 = vpop.permute.xlu0 %807  ;;  %v810_v1 = vpop.permute.xlu1 %809 }
 0x258   : > { %2512 = vmatmul.mubr.msk.bf16.vlgmr.msra.gmra.mrb[16].mxu0 %vm835_vm2, %v806_v50 }
 0x259   : > { %2522 = vmatpush3.bf16.xpose.msra.mxu0 %v1162_v59  ;;  %2523 = vmatprep.mubr.msk.bf16.mxu0 %vm3092_vm0, %v3091_v0 }
 0x25a   : > { %2533 = vmatprep.subr.bf16.mxu0 %v3091_v0 }
 0x25c   : > { %2518 = vmatmul.mubr.msk.bf16.vlgmr.msra.gmra.mrb[16].mxu1 %vm835_vm2, %v808_v62 }
 0x25d   : > { %2528 = vmatpush3.bf16.msra.mxu1 %v1305_v60  ;;  %2529 = vmatprep.mubr.msk.bf16.mxu1 %vm3092_vm0, %v3091_v0 }
 0x25e   : > { %2539 = vmatprep.subr.bf16.mxu1 %v3091_v0 }
 0x260   : > { %2524 = vmatmul.mubr.msk.bf16.vlgmr.msra.gmra.mrb[20].mxu0 %vm835_vm2, %v810_v1 }
 0x261   : > { %2534 = vmatpush3.bf16.msra.mxu0 %v1351_v63  ;;  %2535 = vmatprep.mubr.msk.bf16.mxu0 %vm3092_vm0, %v3091_v0 }
 0x262   : > { %2545 = vmatprep.subr.bf16.mxu0 %v3091_v0 }
 0x2ad   : > { %v876_v2 = vpop.f32.mrb[4].mxu1 }
 0x2ae   : > { %v2483_v3 = vpop.f32.mrb[5].mxu1  ;;  %v1204_v4 = vsel %vm835_vm2, %v876_v2, -inf  ;;  %v922_v6 = vpop.f32.mrb[8].mxu0 }
 0x2af   : > { %1205 = vmax.xlane.f32.xlu0 %v1204_v4  ;;  %v879_v5 = vpop.f32.mrb[6].mxu1  ;;  %v2489_v8 = vpop.f32.mrb[9].mxu0  ;;  %v1207_v9 = vsel %vm835_vm2, %v922_v6, -inf }
 0x2b0   : > { %v2484_v7 = vpop.f32.mrb[7].mxu1  ;;  %1208 = vmax.xlane.f32.xlu1 %v1207_v9  ;;  %v925_v10 = vpop.f32.mrb[10].mxu0 }
 0x2b1   : > { %v2490_v11 = vpop.f32.mrb[11].mxu0 }
 0x31f   : > { %v968_v12 = vpop.f32.mrb[8].mxu1 }
 0x320   : > { %v2495_v13 = vpop.f32.mrb[9].mxu1  ;;  %v1210_v14 = vsel %vm835_vm2, %v968_v12, -inf }
 0x321   : > { %1211 = vmax.xlane.f32.xlu0 %v1210_v14  ;;  %v971_v15 = vpop.f32.mrb[10].mxu1 }
 0x322   : > { %v2496_v16 = vpop.f32.mrb[11].mxu1 }
 0x323   : > { %v1014_v17 = vpop.f32.mrb[12].mxu0 }
 0x324   : > { %v2501_v18 = vpop.f32.mrb[13].mxu0  ;;  %v1213_v19 = vsel %vm835_vm2, %v1014_v17, -inf }
 0x325   : > { %1214 = vmax.xlane.f32.xlu0 %v1213_v19  ;;  %v1017_v20 = vpop.f32.mrb[14].mxu0 }
 0x326   : > { %v2502_v21 = vpop.f32.mrb[15].mxu0 }
 0x327   : > { %v3610_v22 = vpop.f32.mrb[12].mxu1 }
 0x328   : > { %v2507_v23 = vpop.f32.mrb[13].mxu1  ;;  %v1216_v24 = vsel %vm835_vm2, %v3610_v22, -inf }
 0x329   : > { %v1063_v25 = vpop.f32.mrb[14].mxu1  ;;  %1217 = vmax.xlane.f32.xlu1 %v1216_v24 }
 0x32a   : > { %v2508_v26 = vpop.f32.mrb[15].mxu1 }
 0x32b   : > { %v1106_v27 = vpop.f32.mrb[16].mxu0 }
 0x32c   : > { %v2513_v28 = vpop.f32.mrb[17].mxu0  ;;  %v1219_v29 = vsel %vm835_vm2, %v1106_v27, -inf }
 0x32d   : > { %1220 = vmax.xlane.f32.xlu0 %v1219_v29  ;;  %v1109_v30 = vpop.f32.mrb[18].mxu0 }
 0x32e   : > { %v2514_v31 = vpop.f32.mrb[19].mxu0 }
 0x32f   : > { %v1152_v32 = vpop.f32.mrb[16].mxu1 }
 0x330   : > { %v2519_v33 = vpop.f32.mrb[17].mxu1  ;;  %v1222_v34 = vsel %vm835_vm2, %v1152_v32, -inf }
 0x331   : > { %v1155_v35 = vpop.f32.mrb[18].mxu1  ;;  %1223 = vmax.xlane.f32.xlu1 %v1222_v34 }
 0x332   : > { %v2520_v36 = vpop.f32.mrb[19].mxu1 }
 0x333   : > { %v1198_v37 = vpop.f32.mrb[20].mxu0 }
 0x334   : > { %v2525_v38 = vpop.f32.mrb[21].mxu0  ;;  %v1225_v39 = vsel %vm835_vm2, %v1198_v37, -inf }
 0x335   : > { %1226 = vmax.xlane.f32.xlu0 %v1225_v39  ;;  %v1201_v40 = vpop.f32.mrb[22].mxu0 }
 0x336   : > { %v2526_v41 = vpop.f32.mrb[23].mxu0 }
 0x33c   : > { %v1206_v46 = vpop.xlane.xlu0 %1205 }
 0x33d   : > { %v1209_v42 = vpop.xlane.xlu1 %1208  ;;  %v1228_v48 = vsub.f32 %v876_v2, %v1206_v46 }
 0x33e   : > { %v1229_v43 = vsub.f32 %v922_v6, %v1209_v42 }
 0x33f   : > { %v1236_v49 = vmul.f32 1.442695, %v1228_v48 }
 0x340   : > { %v1238_v44 = vmul.f32 1.442695, %v1229_v43 }
 0x342   : > { %2766 = vpow2.f32 %v1238_v44  ;;  %823 = vrot.lane.b32.xlu1 %v3583_v58, %s3093_s13 }
 0x343   : > { %2768 = vpow2.f32 %v1236_v49 }
 0x34c   : > { %v2767_v45 = vpop.eup %2766 }
 0x34d   : > { %v1255_v47 = vsel %vm835_vm2, %v2767_v45, 0.0  ;;  %v2769_v50 = vpop.eup %2768 }
 0x34e   : > { %1256 = vadd.xlane.f32.xlu0 %v1255_v47  ;;  %v1252_v51 = vsel %vm835_vm2, %v2769_v50, 0.0 }
 0x366   : > { %1253 = vadd.xlane.f32.xlu1 %v1252_v51 }
 0x3ae   : > { %v1212_v52 = vpop.xlane.xlu0 %1211 }
 0x3af   : > { %v1230_v54 = vsub.f32 %v968_v12, %v1212_v52  ;;  %v1706_v52 = vlaneseq }
 0x3b1   : > { %v1240_v55 = vmul.f32 1.442695, %v1230_v54 }
 0x3b2   : > { %v1215_v56 = vpop.xlane.xlu0 %1214 }
 0x3b3   : > { %2770 = vpow2.f32 %v1240_v55  ;;  %v1231_v59 = vsub.f32 %v1014_v17, %v1215_v56 }
 0x3b5   : > { %v1242_v60 = vmul.f32 1.442695, %v1231_v59 }
 0x3b6   : > { %v1218_v6 = vpop.xlane.xlu1 %1217 }
 0x3b7   : > { %2772 = vpow2.f32 %v1242_v60  ;;  %v1232_v7 = vsub.f32 %v3610_v22, %v1218_v6  ;;  %v1708_v6 = vrot.slane %v3572_v53, 6 }
 0x3b9   : > { %v1244_v10 = vmul.f32 1.442695, %v1232_v7  ;;  %v1709_v7 = vrot.slane %v3578_v57, 6 }
 0x3ba   : > { %v1221_v3 = vpop.xlane.xlu0 %1220 }
 0x3bb   : > { %v1233_v8 = vsub.f32 %v1106_v27, %v1221_v3 }
 0x3bd   : > { %v3621_v62 = vpop.eup %2770  ;;  %v1246_v13 = vmul.f32 1.442695, %v1233_v8 }
 0x3be   : > { %v1258_v63 = vsel %vm835_vm2, %v3621_v62, 0.0  ;;  %v1224_v9 = vpop.xlane.xlu1 %1223 }
 0x3bf   : > { %1259 = vadd.xlane.f32.xlu1 %v1258_v63  ;;  %v1234_v11 = vsub.f32 %v1152_v32, %v1224_v9  ;;  %v2754_v9 = vld [vmem:[#allocation13] sm:$0xff]  }
 0x3c1   : > { %v3625_v1 = vpop.eup %2772  ;;  %v1248_v16 = vmul.f32 1.442695, %v1234_v11 }
 0x3c2   : > { %v1261_v2 = vsel %vm835_vm2, %v3625_v1, 0.0  ;;  %v1227_v4 = vpop.xlane.xlu0 %1226  ;;  %v824_v19 = vpop.permute.xlu1 %823 }
 0x3c3   : > { %1262 = vadd.xlane.f32.xlu0 %v1261_v2  ;;  %v1235_v14 = vsub.f32 %v1198_v37, %v1227_v4  ;;  %v1397_v32 = vsel %vm1303_vm3, %v824_v19, 0  ;;  %v3674_v2 = vshrl.u32 %v1706_v52, 7 }
 0x3c5   : > { %v1250_v18 = vmul.f32 1.442695, %v1235_v14  ;;  %v1713_v8 = vadd.s32 4294967294, %v3674_v2  ;;  %vm1710_vm4 = vcmp.lt.s32.totalorder %v3674_v2, 2  ;;  %v2755_v14 = vld [vmem:[#allocation13 + $0x8] sm:$0xff]   ;;  %v1841_v19 = vadd.s32 4294967295, %v3674_v2 }
 0x3c6   : > { %vm1838_vm6 = vcmp.lt.s32.totalorder %v3674_v2, 1  ;;  %vm1976_vm8 = vcmp.lt.s32.totalorder %v3674_v2, 7  ;;  %vm2051_vm12 = vcmp.lt.s32.totalorder %v3674_v2, 6 }
 0x3c7   : > { %vm1714_vm5 = vcmp.ge.s32.totalorder %v1713_v8, 0  ;;  %vm1842_vm7 = vcmp.ge.s32.totalorder %v1841_v19, 0 }
 0x3d0   : > { %827 = vrot.lane.b32.xlu1 %v3583_v58, %s3094_s16 }
 0x3d4   : > { %829 = vrot.lane.b32.xlu1 %v3594_v61, %s3094_s16  ;;  %s3099_s16 = smov [#allocation14]  }
 0x3d9   : > { %825 = vrot.lane.b32.xlu0 %v3594_v61, %s3093_s13  ;;  %s3760_s13 = scalar_lea.hbm %s3898_s9, %s2395_s20 }
 0x3db   : > { %v1257_v5 = vpop.xlane.xlu0 %1256 }
 0x3dc   : > { %2774 = vrcp.f32 %v1257_v5 }
 0x3dd   : > { %2776 = vpow2.f32 %v1244_v10 }
 0x3de   : > { %2778 = vpow2.f32 %v1246_v13  ;;  %v1712_v13 = vsel %vm1710_vm4, %v1709_v7, %v1708_v6 }
 0x3df   : > { %2780 = vpow2.f32 %v1248_v16 }
 0x3e0   : > { %2782 = vpow2.f32 %v1250_v18  ;;  %v1837_v18 = vrot.slane %v3578_v57, 7 }
 0x3e6   : > { %v2775_v12 = vpop.eup %2774 }
 0x3e7   : > { %v1285_v15 = vmul.f32 %v2775_v12, %v2767_v45  ;;  %v2777_v20 = vpop.eup %2776  ;;  %v1711_v12 = vsel %vm1710_vm4, %v1708_v6, %v1709_v7 }
 0x3e8   : > { %v2779_v22 = vpop.eup %2778  ;;  %v1264_v24 = vsel %vm835_vm2, %v2777_v20, 0.0  ;;  %v1718_v16 = vsel %vm1714_vm5, %v1711_v12, 0.0 }
 0x3e9   : > { %v1293_v17 = vpack.c.bf16 %v1285_v15, %v1285_v15  ;;  %v3639_v23 = vpop.eup %2780  ;;  %v1267_v25 = vsel %vm835_vm2, %v2779_v22, 0.0  ;;  %v1717_v15 = vsel %vm1714_vm5, %v1712_v13, 0.0 }
 0x3ea   : > { %v3643_v26 = vpop.eup %2782  ;;  %v1270_v27 = vsel %vm835_vm2, %v3639_v23, 0.0 }
 0x3eb   : > { %2536 = vmatmul.mubr.msk.bf16.vlgmr.msra.gmra.mrb[24].mxu0 %vm835_vm2, %v1293_v17  ;;  %v1273_v28 = vsel %vm835_vm2, %v3643_v26, 0.0  ;;  %v1836_v17 = vrot.slane %v3572_v53, 7 }
 0x3ec   : > { %2547 = vmatprep.mubr.msk.bf16.mxu0 %vm3092_vm0, %v3091_v0 }
 0x3f3   : > { %v1254_v21 = vpop.xlane.xlu1 %1253 }
 0x3f4   : > { %2784 = vrcp.f32 %v1254_v21  ;;  %v1719_v21 = vpack.c.bf16 %v1718_v16, %v1717_v15 }
 0x3f8   : > { %1265 = vadd.xlane.f32.xlu1 %v1264_v24  ;;  %1268 = vadd.xlane.f32.xlu0 %v1267_v25  ;;  %v2757_v24 = vld [vmem:[#allocation13 + $0x18] sm:$0xff]  }
 0x3fc   : > { %1271 = vadd.xlane.f32.xlu1 %v1270_v27  ;;  %1274 = vadd.xlane.f32.xlu0 %v1273_v28  ;;  %v1974_v27 = vrot.slane %v3572_v53, 1  ;;  %v1975_v28 = vrot.slane %v3578_v57, 1 }
 0x3fe   : > { %v2785_v29 = vpop.eup %2784 }
 0x3ff   : > { %v1284_v30 = vmul.f32 %v2785_v29, %v2769_v50  ;;  %v1979_v29 = vadd.s32 1, %v3674_v2 }
 0x401   : > { %v1292_v31 = vpack.c.bf16 %v1284_v30, %v1284_v30  ;;  %v2758_v30 = vld [vmem:[#allocation13 + $0x30] sm:$0xff]   ;;  %vm1981_vm9 = vcmp.lt.s32.totalorder %v1979_v29, 8 }
 0x403   : > { %2530 = vmatmul.mubr.msk.bf16.vlgmr.msra.gmra.mrb[20].mxu1 %vm835_vm2, %v1292_v31 }
 0x404   : > { %2540 = vmatpush3.bf16.msra.mxu1 %v1397_v32  ;;  %2541 = vmatprep.mubr.msk.bf16.mxu1 %vm3092_vm0, %v3091_v0  ;;  %v1977_v32 = vsel %vm1976_vm8, %v1974_v27, %v1975_v28 }
 0x405   : > { %2551 = vmatprep.subr.bf16.mxu1 %v3091_v0 }
 0x40d   : > { %833 = vrot.lane.b32.xlu1 %v3594_v61, %s3095_s3 }
 0x412   : > { %831 = vrot.lane.b32.xlu0 %v3583_v58, %s3095_s3  ;;  %s3004_s3 = sshll.u32 %s3099_s16, 4  ;;  %s3005_s3 = int_to_ptr.vmem [resolvable:$false] %s3004_s3 }
 0x413   : > { %s3006_s21 = scalar_lea.vmem %s3005_s3, 512  ;;  %p3007_p13 = scmp.lt.s32.totalorder %s3763_s24, %s3005_s3 }
 0x414   : > { %p3008_p7 = scmp.lt.s32.totalorder %s3006_s21, %s3000_s30 }
 0x416   : > { %p3009_p9 = por %p3008_p7, %p3007_p13 }
 0x418   : > { %p3010_p12 = pnand %p3009_p9, %p3003_p11 }
 0x44c   : > { %v1260_v33 = vpop.xlane.xlu1 %1259 }
 0x44d   : > { %2786 = vrcp.f32 %v1260_v33  ;;  %v1978_v33 = vsel %vm1976_vm8, %v1975_v28, %v1974_v27 }
 0x450   : > { %v1263_v34 = vpop.xlane.xlu0 %1262  ;;  %v828_v38 = vpop.permute.xlu1 %827 }
 0x451   : > { %2788 = vrcp.f32 %v1263_v34  ;;  %v1489_v61 = vsel %vm1303_vm3, %v828_v38, 0  ;;  %v2759_v34 = vld [vmem:[#allocation13 + $0x38] sm:$0xff]  }
 0x454   : > { %v826_v35 = vpop.permute.xlu0 %825  ;;  %v830_v42 = vpop.permute.xlu1 %829 }
 0x455   : > { %v1443_v36 = vsel %vm1303_vm3, %v826_v35, 0  ;;  %v1535_v44 = vsel %vm1303_vm3, %v830_v42, 0  ;;  %v1983_v35 = vsel %vm1981_vm9, %v1977_v32, 0.0 }
 0x456   : > { %2546 = vmatpush3.bf16.msra.mxu0 %v1443_v36  ;;  %v1984_v36 = vsel %vm1981_vm9, %v1978_v33, 0.0 }
 0x457   : > { %v2787_v37 = vpop.eup %2786  ;;  %2557 = vmatprep.subr.bf16.mxu0 %v3091_v0 }
 0x458   : > { %v1286_v39 = vmul.f32 %v2787_v37, %v3621_v62  ;;  %v1985_v37 = vpack.c.bf16 %v1984_v36, %v1983_v35 }
 0x45a   : > { %v1294_v40 = vpack.c.bf16 %v1286_v39, %v1286_v39 }
 0x45b   : > { %v2789_v41 = vpop.eup %2788 }
 0x45c   : > { %v1287_v58 = vmul.f32 %v2789_v41, %v3625_v1  ;;  %2542 = vmatmul.mubr.msk.bf16.vlgmr.msra.gmra.mrb[24].mxu1 %vm835_vm2, %v1294_v40 }
 0x45d   : > { %2552 = vmatpush3.bf16.msra.mxu1 %v1489_v61  ;;  %2553 = vmatprep.mubr.msk.bf16.mxu1 %vm3092_vm0, %v3091_v0 }
 0x45e   : > { %v1295_v43 = vpack.c.bf16 %v1287_v58, %v1287_v58  ;;  %2563 = vmatprep.subr.bf16.mxu1 %v3091_v0 }
 0x460   : > { %2548 = vmatmul.mubr.msk.bf16.vlgmr.msra.gmra.mrb[28].mxu0 %vm835_vm2, %v1295_v43 }
 0x461   : > { %2558 = vmatpush3.bf16.msra.mxu0 %v1535_v44  ;;  %2559 = vmatprep.mubr.msk.bf16.mxu0 %vm3092_vm0, %v3091_v0 }
 0x462   : > { %2569 = vmatprep.subr.bf16.mxu0 %v3091_v0 }
 0x485   : > { %v1266_v45 = vpop.xlane.xlu1 %1265  ;;  %v1269_v46 = vpop.xlane.xlu0 %1268 }
 0x486   : > { %2790 = vrcp.f32 %v1266_v45 }
 0x487   : > { %2792 = vrcp.f32 %v1269_v46 }
 0x489   : > { %v1272_v47 = vpop.xlane.xlu1 %1271  ;;  %v1275_v48 = vpop.xlane.xlu0 %1274 }
 0x48a   : > { %2794 = vrcp.f32 %v1272_v47 }
 0x48b   : > { %2796 = vrcp.f32 %v1275_v48 }
 0x48d   : > { %v832_v55 = vpop.permute.xlu0 %831  ;;  %v834_v56 = vpop.permute.xlu1 %833 }
 0x48e   : > { %v1581_v1 = vsel %vm1303_vm3, %v832_v55, 0  ;;  %v1627_v3 = vsel %vm1303_vm3, %v834_v56, 0  ;;  %v2761_v56 = vld [vmem:[%s3895_s28 + $0x8] sm:$0xff]  }
 0x490   : > { %v2791_v49 = vpop.eup %2790 }
 0x491   : > { %v2793_v50 = vpop.eup %2792  ;;  %v1288_v51 = vmul.f32 %v2791_v49, %v2777_v20  ;;  %v2756_v20 = vld [vmem:[#allocation13 + $0x10] sm:$0xff]  }
 0x492   : > { %v1289_v54 = vmul.f32 %v2793_v50, %v2779_v22  ;;  %v1839_v22 = vsel %vm1838_vm6, %v1836_v17, %v1837_v18 }
 0x493   : > { %v1296_v59 = vpack.c.bf16 %v1288_v51, %v1288_v51 }
 0x494   : > { %v2795_v60 = vpop.eup %2794  ;;  %v1297_v62 = vpack.c.bf16 %v1289_v54, %v1289_v54  ;;  %v2760_v54 = vld [vmem:[%s3895_s28] sm:$0xff]  }
 0x495   : > { %v2797_v63 = vpop.eup %2796  ;;  %2554 = vmatmul.mubr.msk.bf16.vlgmr.msra.gmra.mrb[28].mxu1 %vm835_vm2, %v1296_v59  ;;  %v1290_v4 = vmul.f32 %v2795_v60, %v3639_v23  ;;  %v1840_v23 = vsel %vm1838_vm6, %v1837_v18, %v1836_v17 }
 0x496   : > { %2560 = vmatmul.mubr.msk.bf16.vlgmr.msra.gmra.mrb[32].mxu0 %vm835_vm2, %v1297_v62  ;;  %2564 = vmatpush3.bf16.msra.mxu1 %v1581_v1  ;;  %v1291_v5 = vmul.f32 %v2797_v63, %v3643_v26  ;;  %v1845_v25 = vsel %vm1842_vm7, %v1840_v23, 0.0  ;;  %v1846_v26 = vsel %vm1842_vm7, %v1839_v22, 0.0 }
 0x497   : > { %2570 = vmatpush3.bf16.msra.mxu0 %v1627_v3  ;;  %2565 = vmatprep.mubr.msk.bf16.mxu1 %vm3092_vm0, %v3091_v0  ;;  %v1298_v10 = vpack.c.bf16 %v1290_v4, %v1290_v4  ;;  %v1847_v31 = vpack.c.bf16 %v1846_v26, %v1845_v25 }
 0x498   : > { %2571 = vmatprep.mubr.msk.bf16.mxu0 %vm3092_vm0, %v3091_v0  ;;  %2575 = vmatprep.subr.bf16.mxu1 %v3091_v0  ;;  %v1299_v11 = vpack.c.bf16 %v1291_v5, %v1291_v5 }
 0x499   : > { %2583 = vmatprep.subr.bf16.mxu0 %v3091_v0 }
 0x49d   : > { %2566 = vmatmul.mubr.msk.bf16.vlgmr.msra.gmra.mrb[32].mxu1 %vm835_vm2, %v1298_v10 }
 0x49e   : > { %2572 = vmatmul.mubr.msk.bf16.vlgmr.msra.gmra.mrb[36].mxu0 %vm835_vm2, %v1299_v11  ;;  %2576 = vmatpush3.bf16.msra.mxu1 %v2754_v9 }
 0x49f   : > { %2577 = vmatprep.subr.bf16.mxu1 %v3091_v0  ;;  %2579 = vmatprep.mubr.msk.bf16.mxu1 %vm3092_vm0, %v3091_v0 }
 0x4a0   : > { %2587 = vmatprep.mubr.msk.bf16.mxu0 %vm3092_vm0, %v3091_v0  ;;  %2584 = vmatpush3.bf16.msra.mxu0 %v2760_v54 }
 0x4a1   : > { %2585 = vmatprep.subr.bf16.mxu0 %v3091_v0 }
 0x4a2   : > { %2578 = vmatpush3.bf16.msra.mxu1 %v2755_v14 }
 0x4a3   : > { %2591 = vmatprep.subr.bf16.mxu1 %v3091_v0 }
 0x4a4   : > { %2586 = vmatpush3.bf16.msra.mxu0 %v2761_v56 }
 0x4a5   : > { %2580 = vmatmul.mubr.msk.bf16.vlgmr.msra.gmra.mrb[36].mxu1 %vm602_vm1, %v1719_v21  ;;  %2599 = vmatprep.subr.bf16.mxu0 %v3091_v0 }
 0x4a6   : > { %2592 = vmatpush3.bf16.msra.mxu1 %v2756_v20  ;;  %2595 = vmatprep.mubr.msk.bf16.mxu1 %vm3092_vm0, %v3091_v0 }
 0x4a7   : > { %2593 = vmatprep.subr.bf16.mxu1 %v3091_v0 }
 0x4aa   : > { %2594 = vmatpush3.bf16.msra.mxu1 %v2757_v24 }
 0x4ab   : > { %2607 = vmatprep.subr.bf16.mxu1 %v3091_v0 }
 0x4ad   : > { %2596 = vmatmul.mubr.msk.bf16.vlgmr.msra.gmra.mrb[40].mxu1 %vm602_vm1, %v1847_v31 }
 0x4ae   : > { %2608 = vmatpush3.bf16.msra.mxu1 %v2758_v30  ;;  %2611 = vmatprep.mubr.msk.bf16.mxu1 %vm3092_vm0, %v3091_v0 }
 0x4af   : > { %2609 = vmatprep.subr.bf16.mxu1 %v3091_v0 }
 0x4b2   : > { %2610 = vmatpush3.bf16.msra.mxu1 %v2759_v34 }
 0x4b5   : > { %2612 = vmatmul.mubr.msk.bf16.vlgmr.msra.gmra.mrb[44].mxu1 %vm602_vm1, %v1985_v37 }
 0x4be   : > { %v3716_v38 = vpop.f32.mrb[24].mxu0 }
 0x4bf   : > { %v2537_v39 = vpop.f32.mrb[25].mxu0 }
 0x4c0   : > { %v1390_v40 = vpop.f32.mrb[26].mxu0 }
 0x4c1   : > { %v2538_v41 = vpop.f32.mrb[27].mxu0 }
 0x4d6   : > { %v3718_v61 = vpop.f32.mrb[20].mxu1 }
 0x4d7   : > { %v2531_v58 = vpop.f32.mrb[21].mxu1 }
 0x4d8   : > { %v1344_v42 = vpop.f32.mrb[22].mxu1 }
 0x4d9   : > { %v2532_v43 = vpop.f32.mrb[23].mxu1  ;;  %v2762_v42 = vld [vmem:[#allocation13 + $0x20] sm:$0xff]  }
 0x52f   : > { %v1433_v44 = vpop.f32.mrb[24].mxu1 }
 0x530   : > { %v2543_v45 = vpop.f32.mrb[25].mxu1 }
 0x531   : > { %v1436_v46 = vpop.f32.mrb[26].mxu1  ;;  %v2054_v45 = vadd.s32 2, %v3674_v2 }
 0x532   : > { %v2544_v47 = vpop.f32.mrb[27].mxu1  ;;  %v2764_v46 = vld [vmem:[#allocation13 + $0x40] sm:$0xff]  }
 0x533   : > { %v1479_v48 = vpop.f32.mrb[28].mxu0  ;;  %v793_v47 = vpack.c.bf16 %v3578_v57, %v3572_v53  ;;  %vm2056_vm13 = vcmp.lt.s32.totalorder %v2054_v45, 8 }
 0x534   : > { %v2733_v49 = vpack.i.bf16 %v1479_v48, %v1433_v44  ;;  %v2549_v50 = vpop.f32.mrb[29].mxu0  ;;  %v2763_v44 = vld [vmem:[#allocation13 + $0x28] sm:$0xff]  }
 0x535   : > { %v1482_v51 = vpop.f32.mrb[30].mxu0  ;;  %v2765_v50 = vld [vmem:[#allocation13 + $0x48] sm:$0xff]  }
 0x536   : > { %2734 = vrot.lane.b32.xlu0 %v2733_v49, %s3096_s4  ;;  %v2550_v52 = vpop.f32.mrb[31].mxu0 }
 0x568   : > { %v1525_v55 = vpop.f32.mrb[28].mxu1 }
 0x569   : > { %v1571_v59 = vpop.f32.mrb[32].mxu0  ;;  %v2555_v60 = vpop.f32.mrb[29].mxu1 }
 0x56a   : > { %v2738_v62 = vpack.i.bf16 %v1571_v59, %v1525_v55  ;;  %v2561_v63 = vpop.f32.mrb[33].mxu0  ;;  %v1528_v1 = vpop.f32.mrb[30].mxu1 }
 0x56b   : > { %v1574_v3 = vpop.f32.mrb[34].mxu0  ;;  %v2556_v4 = vpop.f32.mrb[31].mxu1 }
 0x56c   : > { %2739 = vrot.lane.b32.xlu1 %v2738_v62, %s3097_s15  ;;  %v2562_v5 = vpop.f32.mrb[35].mxu0 }
 0x570   : > { %v1617_v6 = vpop.f32.mrb[32].mxu1 }
 0x571   : > { %v1663_v7 = vpop.f32.mrb[36].mxu0  ;;  %v2567_v8 = vpop.f32.mrb[33].mxu1 }
 0x572   : > { %v2743_v9 = vpack.i.bf16 %v1663_v7, %v1617_v6  ;;  %v2573_v10 = vpop.f32.mrb[37].mxu0  ;;  %v1620_v11 = vpop.f32.mrb[34].mxu1 }
 0x573   : > { %v1666_v12 = vpop.f32.mrb[38].mxu0  ;;  %v2568_v13 = vpop.f32.mrb[35].mxu1 }
 0x574   : > { %2744 = vrot.lane.b32.xlu0 %v2743_v9, %s3098_s14  ;;  %v2574_v14 = vpop.f32.mrb[39].mxu0  ;;  %v2380_v9 = vld [vmem:[%s3896_s18] ss:$0 sm:$0xff] }
 0x578   : > { %v1773_v15 = vpop.f32.mrb[36].mxu1 }
 0x579   : > { %v2581_v16 = vpop.f32.mrb[37].mxu1 }
 0x57a   : > { %v1776_v17 = vpop.f32.mrb[38].mxu1 }
 0x57b   : > { %v2582_v18 = vpop.f32.mrb[39].mxu1 }
 0x580   : > { %v1902_v19 = vpop.f32.mrb[40].mxu1 }
 0x581   : > { %v2597_v20 = vpop.f32.mrb[41].mxu1 }
 0x582   : > { %v1905_v21 = vpop.f32.mrb[42].mxu1 }
 0x583   : > { %v2598_v22 = vpop.f32.mrb[43].mxu1 }
 0x588   : > { %v3729_v23 = vpop.f32.mrb[44].mxu1 }
 0x589   : > { %v2613_v24 = vpop.f32.mrb[45].mxu1 }
 0x58a   : > { %v2043_v25 = vpop.f32.mrb[46].mxu1 }
 0x58b   : > { %v2614_v26 = vpop.f32.mrb[47].mxu1 }
 0x5a8   : > { %v2735_v27 = vpop.permute.xlu0 %2734 }
 0x5a9   : > { %v2737_v29 = vunpack.i.h.bf16 %v2735_v27  ;;  %v2736_v30 = vunpack.i.l.bf16 %v2735_v27 }
 0x5ab   : > { %v1694_v34 = vsel %vm835_vm2, %v3716_v38, %v2737_v29  ;;  %v1693_v35 = vsel %vm835_vm2, %v3718_v61, %v2736_v30  ;;  %v2049_v38 = vrot.slane %v3572_v53, 2  ;;  %v2050_v61 = vrot.slane %v3578_v57, 2 }
 0x5ad   : > { %v2052_v48 = vsel %vm2051_vm12, %v2049_v38, %v2050_v61  ;;  %v2053_v49 = vsel %vm2051_vm12, %v2050_v61, %v2049_v38 }
 0x5ae   : > { %v2058_v51 = vsel %vm2056_vm13, %v2052_v48, 0.0  ;;  %v2059_v52 = vsel %vm2056_vm13, %v2053_v49, 0.0 }
 0x5af   : > { %v2060_v2 = vpack.c.bf16 %v2059_v52, %v2058_v51 }
 0x5de   : > { %v2740_v28 = vpop.permute.xlu1 %2739 }
 0x5df   : > { %v2742_v31 = vunpack.i.h.bf16 %v2740_v28  ;;  %v2741_v32 = vunpack.i.l.bf16 %v2740_v28 }
 0x5e1   : > { %v1697_v39 = vsel %vm1695_vm10, %v1694_v34, %v2742_v31  ;;  %v1696_v40 = vsel %vm1695_vm10, %v1693_v35, %v2741_v32 }
 0x5e6   : > { %v2745_v33 = vpop.permute.xlu0 %2744 }
 0x5e7   : > { %v2747_v36 = vunpack.i.h.bf16 %v2745_v33  ;;  %v2746_v37 = vunpack.i.l.bf16 %v2745_v33 }
 0x5e9   : > { %v1700_v41 = vsel %vm1698_vm11, %v1697_v39, %v2747_v36  ;;  %v1699_v58 = vsel %vm1698_vm11, %v1696_v40, %v2746_v37 }
 0x5ea   : > { %v1701_v43 = vpack.c.bf16 %v1700_v41, %v1699_v58 }
 0x5ec   : > { %2588 = vmatmul.mubr.msk.bf16.vlgmr.msra.gmra.mrb[40].mxu0 %vm602_vm1, %v1701_v43 }
 0x5ed   : > { %2600 = vmatpush3.bf16.msra.mxu0 %v2762_v42  ;;  %2603 = vmatprep.mubr.msk.bf16.mxu0 %vm3092_vm0, %v3091_v0 }
 0x5ee   : > { %2601 = vmatprep.subr.bf16.mxu0 %v3091_v0 }
 0x5f1   : > { %2602 = vmatpush3.bf16.msra.mxu0 %v2763_v44 }
 0x5f2   : > { %2615 = vmatprep.subr.bf16.mxu0 %v3091_v0 }
 0x5f4   : > { %2604 = vmatmul.mubr.msk.bf16.vlgmr.msra.gmra.mrb[44].mxu0 %vm602_vm1, %v793_v47 }
 0x5f5   : > { %2616 = vmatpush3.bf16.msra.mxu0 %v2764_v46  ;;  %2619 = vmatprep.mubr.msk.bf16.mxu0 %vm3092_vm0, %v3091_v0 }
 0x5f6   : > { %2617 = vmatprep.subr.bf16.mxu0 %v3091_v0 }
 0x5f9   : > { %2618 = vmatpush3.bf16.msra.mxu0 %v2765_v50 }
 0x5fc   : > { %2620 = vmatmul.mubr.msk.bf16.vlgmr.msra.gmra.mrb[48].mxu0 %vm602_vm1, %v2060_v2 }
 0x6bf   : > { %v1829_v53 = vpop.f32.mrb[40].mxu0 }
 0x6c0   : > { %v1830_v57 = vadd.f32 %v1829_v53, %v1773_v15  ;;  %v2589_v54 = vpop.f32.mrb[41].mxu0 }
 0x6c1   : > { %v1832_v55 = vpop.f32.mrb[42].mxu0 }
 0x6c2   : > { %v1833_v56 = vadd.f32 %v1832_v55, %v1776_v17  ;;  %v2590_v59 = vpop.f32.mrb[43].mxu0  ;;  %v1909_v60 = vadd.f32 %v1902_v19, %v1830_v57 }
 0x6c4   : > { %v1910_v62 = vadd.f32 %v1905_v21, %v1833_v56 }
 0x6c7   : > { %v1965_v63 = vpop.f32.mrb[44].mxu0 }
 0x6c8   : > { %v1972_v1 = vadd.f32 %v1965_v63, %v1909_v60  ;;  %v2605_v3 = vpop.f32.mrb[45].mxu0 }
 0x6c9   : > { %v1968_v0 = vpop.f32.mrb[46].mxu0 }
 0x6ca   : > { %v1973_v4 = vadd.f32 %v1968_v0, %v1910_v62  ;;  %v2606_v5 = vpop.f32.mrb[47].mxu0  ;;  %v2047_v6 = vadd.f32 %v3729_v23, %v1972_v1 }
 0x6cc   : > { %v2048_v7 = vadd.f32 %v2043_v25, %v1973_v4 }
 0x6cf   : > { %v2115_v8 = vpop.f32.mrb[48].mxu0 }
 0x6d0   : > { %v2122_v10 = vadd.f32 %v2115_v8, %v2047_v6  ;;  %v2621_v11 = vpop.f32.mrb[49].mxu0 }
 0x6d1   : > { %v2118_v12 = vpop.f32.mrb[50].mxu0 }
 0x6d2   : > { %v2131_v13 = vadd.f32 %v2380_v9, %v2122_v10  ;;  %v2123_v14 = vadd.f32 %v2118_v12, %v2048_v7  ;;  %v2622_v15 = vpop.f32.mrb[51].mxu0 }
 0x6d4   : > { %2133 = vst.msk [vmem:[%s564_s6] sm:$0xff] %vm602_vm1, %v2131_v13  ;;  %v2132_v16 = vadd.f32 %v2380_v9, %v2123_v14 }
 0x6d6   : > { %2134 = vst.msk [vmem:[%s564_s6 + $0x8] sm:$0xff] %vm602_vm1, %v2132_v16 }
 0x6d7   : > { %3013 = shalt.err (!%p3010_p12)
}
 0x6d8   : > { %s3014_s12 = scalar_lea.hbm %s3760_s13, 256  ;;  %s3018_s15 = scalar_lea.hbm %s3898_s9, 512 }
 0x6d9   : > { %p3015_p8 = scmp.ne.s32.totalorder %s3760_s13, %s3014_s12  ;;  %p3019_p1 = scmp.lt.u32.totalorder %s3760_s13, %s3898_s9 }
 0x6da   : > { %p3020_p6 = scmp.lt.u32.totalorder %s3018_s15, %s3014_s12  ;;  %p3022_p5 = scmp.lt.u32.totalorder %s3014_s12, %s3760_s13 }
 0x6db   : > { %p3016_p10 = pnand %p3015_p8, %p3899_p2 }
 0x6dc   : > { %p3021_p3 = por %p3020_p6, %p3019_p1 }
 0x6dd   : > { %p3017_p0 = pneg %p3016_p10 }
 0x6de   : > { %p3023_p4 = por %p3022_p5, %p3021_p3 }
 0x6e0   : > { %p3024_p11 = pnand %p3023_p4, %p3017_p0 }
 0x6e2   : > { %3027 = shalt.err (!%p3024_p11)
}
 0x6e3   : > { %s3100_s17 = smov 128  }
 0x6e4   : > { %2645 = dma.vmem_to_hbm [thread:$0]  (%p3899_p2), %s3763_s24, 256, %s3760_s13, %s2136_s25, %s3100_s17, %s3100_s17, %s3096_s4  }
 0x6e5 PF: > { %s3900_s18 = sld [smem:[#allocation20_spill]]  ;;  %s3901_s20 = sld [smem:[#allocation22_spill]] }
 0x6e6   : > { %s3902_s6 = sld [smem:[#allocation21_spill]] }
 0x6eb   : > { %s2164_s1 = sand.u32 1, %s3900_s18   ;;  %p3903_p13 = scmp.ne.s32.totalorder %s3901_s20, 0 }
 0x6ec   : > { %p3904_p7 = scmp.ge.s32.totalorder %s3902_s6, 2  ;;  %s2165_s26 = scalar_lea.sflag [#allocation4], %s2164_s1 }
 0x6ee   : > { %p2671_p9 = pnand %p3904_p7, %p3903_p13 }
 0x6f0   : > { %3061 = dma.done.wait (!%p2671_p9), %s2165_s26, 256  }
 0x6f1   : > { %3063 = vsyncadd (!%p2671_p9), %s2165_s26, 4294967040  ;;  %s3905_s24 = sld [smem:[#allocation23_spill]]  ;;  %s3906_s19 = sld [smem:[#allocation25_spill]] }
 0x6f2   : > { %s3907_s21 = smov %s3070_s22  ;;  %s3908_s22 = smov %s3074_s23 }
 0x6f7   : > { %p30_p12 = scmp.ge.s32.totalorder %s3905_s24, 4   ;;  %s3909_s23 = smov %s3906_s19 }
 0x6f9   :  { %32 = sbr.rel (!%p30_p12) target bundleno = 18 (0x12), region = 157 }
 0x700   :  { %2170 = vsyncpa [#allocation3], 1 }
 0x701   :  { %2172 = vsyncpa [#allocation3 + $0x1], 1 }
 0x702   :  { %2173 = vsyncpa [#allocation6], 1 }
 0x703   :  { %2175 = vsyncpa [#allocation6 + $0x1], 1 }
 0x704   :  { %2176 = vsyncpa [#allocation9], 1 }
 0x705   :  { %2177 = vsyncpa [#allocation12], 1 }
 0x706   :  { %2178 = vsyncpa [#allocation4], 1 }
 0x707   :  { %2180 = vsyncpa [#allocation4 + $0x1], 1 }

</bundles_post_ra>
